<compile_context>
chip_gen: v7x
topology: tpu7x:2x2x1
jax: 0.10.0
libtpu: 0.0.40
codegen_flags: <defaults>
</compile_context>

<pallas_src>
import math
from functools import partial

import jax
import jax.numpy as jnp
from jax.experimental import pallas as pl
from jax.experimental.pallas import tpu as pltpu


# ----------------------------- shared math helpers (pure jnp, usable in-kernel) ----------

def _layernorm(x, g, b, eps=1e-5):
    mu = jnp.mean(x, axis=-1, keepdims=True)
    var = jnp.mean(jnp.square(x - mu), axis=-1, keepdims=True)
    return (x - mu) * jax.lax.rsqrt(var + eps) * g + b


def _erf(x):
    # Abramowitz & Stegun 7.1.26 polynomial (max abs err ~1.5e-7); elementwise-only.
    a1, a2, a3, a4, a5 = 0.254829592, -0.284496736, 1.421413741, -1.453152027, 1.061405429
    p = 0.3275911
    s = jnp.where(x >= 0.0, 1.0, -1.0)
    z = jnp.abs(x)
    t = 1.0 / (1.0 + p * z)
    poly = ((((a5 * t + a4) * t + a3) * t + a2) * t + a1) * t
    return s * (1.0 - poly * jnp.exp(-z * z))


def _gelu_exact(x):
    # matches PyTorch nn.GELU() (approximate='none') to ~1e-7; stays in f32 on the VPU/EUP.
    return 0.5 * x * (1.0 + _erf(x * (1.0 / math.sqrt(2.0))))


def _mm(a, w):
    # bf16 MXU operands, f32 accumulation (weights may already be bf16 -> no-op cast).
    return jnp.dot(a.astype(jnp.bfloat16), w.astype(jnp.bfloat16),
                   preferred_element_type=jnp.float32)


# ----------------------------- Pallas kernel ---------------------------------------------

def _gated_xattn_kernel(
    q_ref, k_ref, v_ref,            # (Rq, D), (Rk, D), (Rk, D)  f32 activation slabs
    gates_ref,                      # (2,) f32 in SMEM: [tanh(attn_gate), tanh(ff_gate)]
    w_qkv_ref, b_qkv_ref,           # (3, D, D) bf16, (3, 1, D) f32
    w_out_ref, b_out_ref,           # (D, D)   bf16, (1, D)    f32
    ln_g_ref, ln_b_ref,             # (4, D) f32 rows: [attn-LN, ffn-LN, enc-final-LN, ff-block-LN]
    fc1_w_ref, fc1_b_ref,           # (D, 4D) bf16, (1, 4D) f32
    fc2_w_ref, fc2_b_ref,           # (4D, D) bf16, (1, D)  f32
    ff_w1_ref, ff_w2_ref,           # (D, 4D) bf16, (4D, D) bf16
    out_ref,                        # (Rq, D)
    k_sc,                           # VMEM (Rk, D) bf16          K slab, cast once
    qh_sc,                          # VMEM (G, Rq, D) bf16       per-head masked+scaled Q (G=H) or plain Q (G=1)
    vh_sc,                          # VMEM (G, Rk, D) bf16       per-head masked V (G=H) or plain V (G=1)
    attn_sc,                        # VMEM (Rq, D) bf16          attention output slab
    *, num_heads, batch_tile, lq, lk, slice_heads,
):
    D = q_ref.shape[-1]
    H = num_heads
    Hd = D // H
    embed_scale = math.sqrt(D)
    inv_sqrt_hd = 1.0 / math.sqrt(Hd)

    ln_g = ln_g_ref[...]
    ln_b = ln_b_ref[...]
    q_in = q_ref[...]                                # original query (residual of gated block)

    # ---------------- TransformerEncoder (1 layer, cross-attention, pre-norm) ----------
    x = q_in * embed_scale
    xk = k_ref[...] * embed_scale
    xv = v_ref[...] * embed_scale

    residual = x
    xq_n = _layernorm(x, ln_g[0:1], ln_b[0:1])
    xk_n = _layernorm(xk, ln_g[0:1], ln_b[0:1])
    xv_n = _layernorm(xv, ln_g[0:1], ln_b[0:1])

    # Three full-width slab GEMMs; weight/bias selection is leading-axis (cheap) indexing.
    Q = _mm(xq_n, w_qkv_ref[0]) + b_qkv_ref[0]       # (Rq, D) f32
    K = _mm(xk_n, w_qkv_ref[1]) + b_qkv_ref[1]       # (Rk, D) f32
    V = _mm(xv_n, w_qkv_ref[2]) + b_qkv_ref[2]       # (Rk, D) f32

    # Stage attention operands into VMEM scratch once per grid step (slab level), so the
    # per-(batch, head) loop below is just MXU dots + softmax (no per-iter mask/cast work).
    k_sc[...] = K.astype(jnp.bfloat16)
    if slice_heads:
        # Hd is lane-aligned: one plain copy; real head column slices below
        # (contracts over Hd, not D -> no wasted MXU work at large D).
        qh_sc[0] = (Q * inv_sqrt_hd).astype(jnp.bfloat16)
        vh_sc[0] = V.astype(jnp.bfloat16)
    else:
        # Small-D path: per-head column masks baked into H pre-masked slab copies; all
        # matmul dims stay at/below the MXU width, so the masked columns are free.
        col = jax.lax.broadcasted_iota(jnp.int32, (1, D), 1)
        for h in range(H):
            m = ((col >= h * Hd) & (col < (h + 1) * Hd)).astype(jnp.float32)
            qh_sc[h] = (Q * (m * inv_sqrt_hd)).astype(jnp.bfloat16)
            vh_sc[h] = (V * m).astype(jnp.bfloat16)

    align_q = math.gcd(lq, 8)
    align_k = math.gcd(lk, 8)

    # TODO(synk): for long Lk, tile the score/softmax/PV step over Lk (online softmax)
    #             instead of materializing the full (Lq, Lk) score per head.
    # TODO(synk): for very short Lk, fold heads into the lane axis of the score matrix
    #             (segmented softmax) so exp/sum reductions are lane-dense.
    def _attn_body(b, carry):
        row_q = b * lq
        row_k = b * lk
        if align_q > 1:
            row_q = pl.multiple_of(row_q, align_q)
        if align_k > 1:
            row_k = pl.multiple_of(row_k, align_k)

        if slice_heads:
            for h in range(H):
                cols = slice(h * Hd, (h + 1) * Hd)
                qbh = qh_sc[0, pl.ds(row_q, lq), cols]
                kbh = k_sc[pl.ds(row_k, lk), cols]
                vbh = vh_sc[0, pl.ds(row_k, lk), cols]
                s = jnp.einsum("qd,kd->qk", qbh, kbh,
                               preferred_element_type=jnp.float32)        # (Lq, Lk)
                s = s - jnp.max(s, axis=-1, keepdims=True)
                p = jnp.exp(s)
                p = p * pl.reciprocal(jnp.sum(p, axis=-1, keepdims=True), approx=True)
                o = jnp.dot(p.astype(jnp.bfloat16), vbh,
                            preferred_element_type=jnp.float32)           # (Lq, Hd)
                attn_sc[pl.ds(row_q, lq), cols] = o.astype(attn_sc.dtype)
        else:
            kb = k_sc[pl.ds(row_k, lk), :]
            acc = jnp.zeros((lq, D), jnp.float32)
            for h in range(H):                        # small static loop over heads only
                qbh = qh_sc[h, pl.ds(row_q, lq), :]
                s = jnp.einsum("qd,kd->qk", qbh, kb,
                               preferred_element_type=jnp.float32)        # (Lq, Lk)
                s = s - jnp.max(s, axis=-1, keepdims=True)
                p = jnp.exp(s)
                p = p * pl.reciprocal(jnp.sum(p, axis=-1, keepdims=True), approx=True)
                # V pre-masked per head -> contributions land in disjoint columns; just add.
                acc = acc + jnp.dot(p.astype(jnp.bfloat16),
                                    vh_sc[h, pl.ds(row_k, lk), :],
                                    preferred_element_type=jnp.float32)   # (Lq, D)
            attn_sc[pl.ds(row_q, lq), :] = acc.astype(attn_sc.dtype)
        return carry

    jax.lax.fori_loop(0, batch_tile, _attn_body, 0, unroll=batch_tile <= 4)

    attn = _mm(attn_sc[...], w_out_ref[...]) + b_out_ref[...]
    x = residual + attn

    # position-wise FFN (ReLU), pre-norm, then the encoder's final LayerNorm
    residual = x
    y = _layernorm(x, ln_g[1:2], ln_b[1:2])
    y = jnp.maximum(_mm(y, fc1_w_ref[...]) + fc1_b_ref[...], 0.0)
    y = _mm(y, fc2_w_ref[...]) + fc2_b_ref[...]
    x = _layernorm(residual + y, ln_g[2:3], ln_b[2:3])

    # ---------------- gated residual around attention ----------------------------------
    attn_gate = gates_ref[0]                         # SMEM scalars (tanh applied in wrapper)
    ff_gate = gates_ref[1]
    x = x * attn_gate + q_in

    # ---------------- FeedForward: LN -> Linear(no bias) -> GELU -> Linear(no bias) ----
    z = _layernorm(x, ln_g[3:4], ln_b[3:4])
    z = _mm(z, ff_w1_ref[...])
    z = _gelu_exact(z)
    z = _mm(z, ff_w2_ref[...])

    out_ref[...] = (z * ff_gate + x).astype(out_ref.dtype)


# ----------------------------- wrapper helpers --------------------------------------------

def _weight_spec(shape, single_buffer):
    """BlockSpec for a grid-invariant operand (full array, constant index_map).

    With single_buffer=True the pipeline is asked to keep ONE VMEM buffer (weights never
    change across grid steps), halving weight VMEM vs. default double buffering."""
    idx = lambda *_args, _n=len(shape): (0,) * _n
    if single_buffer:
        try:
            return pl.BlockSpec(shape, idx, pipeline_mode=pl.Buffered(1))
        except (TypeError, AttributeError):
            pass  # older jax: no pipeline_mode kwarg -> default buffering
    return pl.BlockSpec(shape, idx)


def _vmem_limit_bytes():
    """~80% of physical VMEM: ~102 MiB on v5e/v6e (128 MiB), ~51 MiB on v7x (64 MiB)."""
    cap = 64 * 1024 * 1024
    try:
        cap = pltpu.get_tpu_info().vmem_capacity_bytes
    except Exception:
        pass
    return int(max(32 * 1024 * 1024, min(cap * 0.8, 112 * 1024 * 1024)))


def _batch_tile(B, Lq, Lk, target_rows=1024, min_grid_steps=2):
    """Batches fused per grid step.

    Prefers the biggest divisor of B whose activation slab stays within `target_rows`
    rows AND leaves >= min_grid_steps grid steps (so v7x's two TensorCores both get work).
    Falls back to bt=1 (not bt=B) when no divisor fits the row budget."""
    def legal(bt):
        rq, rk = bt * Lq, bt * Lk
        aligned = (rq % 8 == 0) and (rk % 8 == 0)
        return (bt == B) or aligned

    divisors = [d for d in range(1, B + 1) if B % d == 0]
    cands = [d for d in divisors if legal(d) and d * max(Lq, Lk) <= target_rows]
    if cands:
        multi = [d for d in cands if B // d >= min_grid_steps]
        return max(multi) if multi else max(cands)
    if (Lq % 8 == 0) and (Lk % 8 == 0):
        return 1
    # TODO(synk): pad Lq/Lk to a multiple of 8 outside the kernel instead of fusing all of B.
    return B


# ----------------------------- wrapper ----------------------------------------------------

def gated_cross_attention_block(query, key, value, params, *, num_heads,
                                single_buffer_weights=True,
                                target_rows=1024, min_grid_steps=2):
    B, Lq, D = query.shape
    Lk = key.shape[1]
    assert D % num_heads == 0, "embed_dim must be divisible by num_heads"
    Hd = D // num_heads
    inner = params["fc1_w"].shape[1]
    ff_inner = params["ff_w1"].shape[1]

    bt = _batch_tile(B, Lq, Lk, target_rows=target_rows, min_grid_steps=min_grid_steps)
    grid = (B // bt,)
    rq, rk = bt * Lq, bt * Lk

    # Lane-aligned head slices when possible (contract Hd, not D, on the MXU); otherwise
    # the masked full-D small-D path.
    slice_heads = (Hd % 128 == 0)
    # TODO(synk): for D > MXU width with Hd not lane-aligned, pad Hd to 128 outside the
    #             kernel (the masked path then does H x the necessary QK^T/PV MXU work).
    n_head_copies = 1 if slice_heads else num_heads

    # lane/sublane-dense activation slabs: (B*L, D), feature dim on the 128-lane axis
    # TODO(synk): pad D to a multiple of 128 (with LayerNorm masking) for lane-dense vst.
    q2 = query.reshape(B * Lq, D)
    k2 = key.reshape(B * Lk, D)
    v2 = value.reshape(B * Lk, D)

    # gate scalars: tanh once in the wrapper, ride the scalar (SMEM) path in the kernel
    gates_t = jnp.tanh(params["gates"]).astype(jnp.float32)

    # bf16 matmul operands (MXU-native); biases / LN params stay f32 for the VPU/EUP path
    wdt = jnp.bfloat16
    w_qkv = params["w_qkv"].astype(wdt)
    w_out = params["w_out"].astype(wdt)
    fc1_w = params["fc1_w"].astype(wdt)
    fc2_w = params["fc2_w"].astype(wdt)
    ff_w1 = params["ff_w1"].astype(wdt)
    ff_w2 = params["ff_w2"].astype(wdt)

    full = partial(_weight_spec, single_buffer=single_buffer_weights)

    in_specs = [
        pl.BlockSpec((rq, D), lambda i: (i, 0)),                 # query slab
        pl.BlockSpec((rk, D), lambda i: (i, 0)),                 # key slab
        pl.BlockSpec((rk, D), lambda i: (i, 0)),                 # value slab
        pl.BlockSpec(memory_space=pltpu.MemorySpace.SMEM),       # tanh(gates) scalars
        full((3, D, D)), full((3, 1, D)),                        # w_qkv, b_qkv
        full((D, D)), full((1, D)),                              # w_out, b_out
        full((4, D)), full((4, D)),                              # ln gammas / betas
        full((D, inner)), full((1, inner)),                      # fc1
        full((inner, D)), full((1, D)),                          # fc2
        full((D, ff_inner)), full((ff_inner, D)),                # ff block linears
    ]
    out_spec = pl.BlockSpec((rq, D), lambda i: (i, 0))

    scratch_shapes = [
        pltpu.VMEM((rk, D), jnp.bfloat16),                       # K slab (bf16)
        pltpu.VMEM((n_head_copies, rq, D), jnp.bfloat16),        # per-head Q
        pltpu.VMEM((n_head_copies, rk, D), jnp.bfloat16),        # per-head V
        pltpu.VMEM((rq, D), jnp.bfloat16),                       # attention output slab
    ]

    kernel = partial(_gated_xattn_kernel, num_heads=num_heads, batch_tile=bt,
                     lq=Lq, lk=Lk, slice_heads=slice_heads)
    out2 = pl.pallas_call(
        kernel,
        out_shape=jax.ShapeDtypeStruct((B * Lq, D), query.dtype),
        grid_spec=pltpu.PrefetchScalarGridSpec(
            num_scalar_prefetch=0,
            grid=grid,
            in_specs=in_specs,
            out_specs=out_spec,
            scratch_shapes=scratch_shapes,
        ),
        compiler_params=pltpu.CompilerParams(
            dimension_semantics=("parallel",),
            vmem_limit_bytes=_vmem_limit_bytes(),
        ),
    )(
        q2, k2, v2, gates_t,
        w_qkv, params["b_qkv"], w_out, params["b_out"],
        params["ln_g"], params["ln_b"],
        fc1_w, params["fc1_b"], fc2_w, params["fc2_b"],
        ff_w1, ff_w2,
    )
    return out2.reshape(B, Lq, D)


# ----------------------------- pure-JAX reference (for validation) ------------------------

def gated_cross_attention_ref(query, key, value, params, *, num_heads):
    B, Lq, D = query.shape
    Lk = key.shape[1]
    Hd = D // num_heads
    scale = math.sqrt(D)
    inv_sqrt_hd = 1.0 / math.sqrt(Hd)
    ln_g, ln_b = params["ln_g"], params["ln_b"]
    w_qkv, b_qkv = params["w_qkv"], params["b_qkv"]

    x = query * scale
    xk = key * scale
    xv = value * scale

    residual = x
    xq_n = _layernorm(x, ln_g[0:1], ln_b[0:1])
    xk_n = _layernorm(xk, ln_g[0:1], ln_b[0:1])
    xv_n = _layernorm(xv, ln_g[0:1], ln_b[0:1])

    Q = _mm(xq_n, w_qkv[0]) + b_qkv[0]
    K = _mm(xk_n, w_qkv[1]) + b_qkv[1]
    V = _mm(xv_n, w_qkv[2]) + b_qkv[2]

    Qh = (Q * inv_sqrt_hd).reshape(B, Lq, num_heads, Hd)
    Kh = K.reshape(B, Lk, num_heads, Hd)
    Vh = V.reshape(B, Lk, num_heads, Hd)
    s = jnp.einsum("bqhd,bkhd->bhqk", Qh.astype(jnp.bfloat16), Kh.astype(jnp.bfloat16),
                   preferred_element_type=jnp.float32)
    p = jax.nn.softmax(s, axis=-1)
    a = jnp.einsum("bhqk,bkhd->bqhd", p.astype(jnp.bfloat16), Vh.astype(jnp.bfloat16),
                   preferred_element_type=jnp.float32).reshape(B, Lq, D)
    a = _mm(a, params["w_out"]) + params["b_out"]
    x = residual + a

    residual = x
    y = _layernorm(x, ln_g[1:2], ln_b[1:2])
    y = jnp.maximum(_mm(y, params["fc1_w"]) + params["fc1_b"], 0.0)
    y = _mm(y, params["fc2_w"]) + params["fc2_b"]
    x = _layernorm(residual + y, ln_g[2:3], ln_b[2:3])

    g = jnp.tanh(params["gates"])
    x = x * g[0] + query

    z = _layernorm(x, ln_g[3:4], ln_b[3:4])
    z = _mm(z, params["ff_w1"])
    z = jax.nn.gelu(z, approximate=False)
    z = _mm(z, params["ff_w2"])
    return z * g[1] + x


# ----------------------------- deterministic parameter init -------------------------------

def init_params(key, D, ff_mult=4):
    ks = jax.random.split(key, 12)
    std = 0.02
    inner = ff_mult * D
    return {
        # nn.Parameter init in the PyTorch module is 0.0; nonzero values are used here
        # so the gated paths are actually exercised by the kernel.
        "gates": jnp.array([0.5, -0.3], dtype=jnp.float32),
        # fused in_proj stored pre-split / pre-transposed as (3, D, D): [Wq, Wk, Wv] in
        # "x @ W" orientation (equivalent to PyTorch in_proj_weight.T split along columns).
        "w_qkv": std * jax.random.normal(ks[0], (3, D, D), jnp.float32),
        "b_qkv": 0.1 * jax.random.normal(ks[1], (3, 1, D), jnp.float32),
        "w_out": std * jax.random.normal(ks[2], (D, D), jnp.float32),
        "b_out": 0.1 * jax.random.normal(ks[3], (1, D), jnp.float32),
        "ln_g": 1.0 + 0.1 * jax.random.normal(ks[4], (4, D), jnp.float32),
        "ln_b": 0.1 * jax.random.normal(ks[5], (4, D), jnp.float32),
        "fc1_w": std * jax.random.normal(ks[6], (D, inner), jnp.float32),
        "fc1_b": 0.1 * jax.random.normal(ks[7], (1, inner), jnp.float32),
        "fc2_w": std * jax.random.normal(ks[8], (inner, D), jnp.float32),
        "fc2_b": 0.1 * jax.random.normal(ks[9], (1, D), jnp.float32),
        "ff_w1": std * jax.random.normal(ks[10], (D, inner), jnp.float32),
        "ff_w2": std * jax.random.normal(ks[11], (inner, D), jnp.float32),
    }


# ----------------------------- main --------------------------------------------------------

if __name__ == "__main__":
    B, Lq, Lk, D, H = 2, 8, 8, 32, 4

    root = jax.random.PRNGKey(0)
    kq, kk, kv, kp = jax.random.split(root, 4)
    query = jax.random.normal(kq, (B, Lq, D), jnp.float32)
    key_in = jax.random.normal(kk, (B, Lk, D), jnp.float32)
    value_in = jax.random.normal(kv, (B, Lk, D), jnp.float32)
    params = init_params(kp, D)

    fn = jax.jit(partial(gated_cross_attention_block, num_heads=H))
    try:
        out = jax.block_until_ready(fn(query, key_in, value_in, params))
    except Exception:
        # Fallback for jax versions where pipeline_mode=pl.Buffered(1) is not accepted by
        # the top-level pallas_call pipeline: rerun with default (double-buffered) weights.
        fn = jax.jit(partial(gated_cross_attention_block, num_heads=H,
                             single_buffer_weights=False))
        out = jax.block_until_ready(fn(query, key_in, value_in, params))

    ref = gated_cross_attention_ref(query, key_in, value_in, params, num_heads=H)
    assert out.shape == query.shape and out.dtype == query.dtype
    # Tolerance covers bf16 MXU operands + approximate-reciprocal softmax normalization.
    if not bool(jnp.allclose(out, ref, rtol=5e-3, atol=5e-3)):
        raise AssertionError(
            f"Pallas kernel mismatch vs reference: max abs err = {float(jnp.max(jnp.abs(out - ref)))}"
        )
    print("KERNEL_OK")
</pallas_src>

<mosaic_0001>
module attributes {stable_mosaic.version = 11 : i64} {
  func.func @_gated_xattn_kernel(%arg0: i32, %arg1: memref<8x32xf32, #tpu.memory_space<vmem>>, %arg2: memref<8x32xf32, #tpu.memory_space<vmem>>, %arg3: memref<8x32xf32, #tpu.memory_space<vmem>>, %arg4: memref<2xf32, #tpu.memory_space<smem>>, %arg5: memref<3x32x32xbf16, #tpu.memory_space<vmem>>, %arg6: memref<3x1x32xf32, #tpu.memory_space<vmem>>, %arg7: memref<32x32xbf16, #tpu.memory_space<vmem>>, %arg8: memref<1x32xf32, #tpu.memory_space<vmem>>, %arg9: memref<4x32xf32, #tpu.memory_space<vmem>>, %arg10: memref<4x32xf32, #tpu.memory_space<vmem>>, %arg11: memref<32x128xbf16, #tpu.memory_space<vmem>>, %arg12: memref<1x128xf32, #tpu.memory_space<vmem>>, %arg13: memref<128x32xbf16, #tpu.memory_space<vmem>>, %arg14: memref<1x32xf32, #tpu.memory_space<vmem>>, %arg15: memref<32x128xbf16, #tpu.memory_space<vmem>>, %arg16: memref<128x32xbf16, #tpu.memory_space<vmem>>, %arg17: memref<8x32xf32, #tpu.memory_space<vmem>>, %arg18: memref<8x32xbf16, #tpu.memory_space<vmem>>, %arg19: memref<4x8x32xbf16, #tpu.memory_space<vmem>>, %arg20: memref<4x8x32xbf16, #tpu.memory_space<vmem>>, %arg21: memref<8x32xbf16, #tpu.memory_space<vmem>>) attributes {dimension_semantics = [#tpu.dimension_semantics<parallel>], iteration_bounds = array<i64: 2>, scalar_prefetch = 0 : i64, scratch_operands = 4 : i64, tpu.core_type = #tpu.core_type<tc>, window_params = [{transform_indices = @transform_0, window_bounds = array<i64: 8, 32>}, {transform_indices = @transform_1, window_bounds = array<i64: 8, 32>}, {transform_indices = @transform_2, window_bounds = array<i64: 8, 32>}, {transform_indices = @transform_3, window_bounds = array<i64: 2>}, {pipeline_mode = #tpu.pipeline_mode<synchronous>, transform_indices = @transform_4, window_bounds = array<i64: 3, 32, 32>}, {pipeline_mode = #tpu.pipeline_mode<synchronous>, transform_indices = @transform_5, window_bounds = array<i64: 3, 1, 32>}, {pipeline_mode = #tpu.pipeline_mode<synchronous>, transform_indices = @transform_6, window_bounds = array<i64: 32, 32>}, {pipeline_mode = #tpu.pipeline_mode<synchronous>, transform_indices = @transform_7, window_bounds = array<i64: 1, 32>}, {pipeline_mode = #tpu.pipeline_mode<synchronous>, transform_indices = @transform_8, window_bounds = array<i64: 4, 32>}, {pipeline_mode = #tpu.pipeline_mode<synchronous>, transform_indices = @transform_9, window_bounds = array<i64: 4, 32>}, {pipeline_mode = #tpu.pipeline_mode<synchronous>, transform_indices = @transform_10, window_bounds = array<i64: 32, 128>}, {pipeline_mode = #tpu.pipeline_mode<synchronous>, transform_indices = @transform_11, window_bounds = array<i64: 1, 128>}, {pipeline_mode = #tpu.pipeline_mode<synchronous>, transform_indices = @transform_12, window_bounds = array<i64: 128, 32>}, {pipeline_mode = #tpu.pipeline_mode<synchronous>, transform_indices = @transform_13, window_bounds = array<i64: 1, 32>}, {pipeline_mode = #tpu.pipeline_mode<synchronous>, transform_indices = @transform_14, window_bounds = array<i64: 32, 128>}, {pipeline_mode = #tpu.pipeline_mode<synchronous>, transform_indices = @transform_15, window_bounds = array<i64: 128, 32>}, {transform_indices = @transform_16, window_bounds = array<i64: 8, 32>}]} {
    %c0 = arith.constant 0 : index
    %c0_0 = arith.constant 0 : index
    %0 = vector.load %arg9[%c0, %c0_0] : memref<4x32xf32, #tpu.memory_space<vmem>>, vector<4x32xf32>
    %c0_1 = arith.constant 0 : index
    %c0_2 = arith.constant 0 : index
    %1 = vector.load %arg10[%c0_1, %c0_2] : memref<4x32xf32, #tpu.memory_space<vmem>>, vector<4x32xf32>
    %c0_3 = arith.constant 0 : index
    %c0_4 = arith.constant 0 : index
    %2 = vector.load %arg1[%c0_3, %c0_4] : memref<8x32xf32, #tpu.memory_space<vmem>>, vector<8x32xf32>
    %cst = arith.constant 5.65685415 : f32
    %3 = vector.broadcast %cst : f32 to vector<8x32xf32>
    %4 = arith.mulf %2, %3 : vector<8x32xf32>
    %c0_5 = arith.constant 0 : index
    %c0_6 = arith.constant 0 : index
    %5 = vector.load %arg2[%c0_5, %c0_6] : memref<8x32xf32, #tpu.memory_space<vmem>>, vector<8x32xf32>
    %cst_7 = arith.constant 5.65685415 : f32
    %6 = vector.broadcast %cst_7 : f32 to vector<8x32xf32>
    %7 = arith.mulf %5, %6 : vector<8x32xf32>
    %c0_8 = arith.constant 0 : index
    %c0_9 = arith.constant 0 : index
    %8 = vector.load %arg3[%c0_8, %c0_9] : memref<8x32xf32, #tpu.memory_space<vmem>>, vector<8x32xf32>
    %cst_10 = arith.constant 5.65685415 : f32
    %9 = vector.broadcast %cst_10 : f32 to vector<8x32xf32>
    %10 = arith.mulf %8, %9 : vector<8x32xf32>
    %11 = vector.extract_strided_slice %0 {offsets = [0, 0], sizes = [1, 32], strides = [1, 1]} : vector<4x32xf32> to vector<1x32xf32>
    %12 = vector.extract_strided_slice %1 {offsets = [0, 0], sizes = [1, 32], strides = [1, 1]} : vector<4x32xf32> to vector<1x32xf32>
    %cst_11 = arith.constant dense<0.000000e+00> : vector<8xf32>
    %13 = vector.multi_reduction <add>, %4, %cst_11 [1] : vector<8x32xf32> to vector<8xf32>
    %14 = vector.shape_cast %13 : vector<8xf32> to vector<8x1xf32>
    %cst_12 = arith.constant 3.200000e+01 : f32
    %15 = vector.broadcast %cst_12 : f32 to vector<8x1xf32>
    %16 = arith.divf %14, %15 : vector<8x1xf32>
    %17 = vector.broadcast %16 : vector<8x1xf32> to vector<8x32xf32>
    %18 = arith.subf %4, %17 : vector<8x32xf32>
    %19 = arith.mulf %18, %18 : vector<8x32xf32>
    %cst_13 = arith.constant dense<0.000000e+00> : vector<8xf32>
    %20 = vector.multi_reduction <add>, %19, %cst_13 [1] : vector<8x32xf32> to vector<8xf32>
    %21 = vector.shape_cast %20 : vector<8xf32> to vector<8x1xf32>
    %cst_14 = arith.constant 3.200000e+01 : f32
    %22 = vector.broadcast %cst_14 : f32 to vector<8x1xf32>
    %23 = arith.divf %21, %22 : vector<8x1xf32>
    %24 = vector.broadcast %16 : vector<8x1xf32> to vector<8x32xf32>
    %25 = arith.subf %4, %24 : vector<8x32xf32>
    %cst_15 = arith.constant 9.99999974E-6 : f32
    %26 = vector.broadcast %cst_15 : f32 to vector<8x1xf32>
    %27 = arith.addf %23, %26 : vector<8x1xf32>
    %28 = math.rsqrt %27 : vector<8x1xf32>
    %29 = vector.broadcast %28 : vector<8x1xf32> to vector<8x32xf32>
    %30 = arith.mulf %25, %29 : vector<8x32xf32>
    %31 = vector.broadcast %11 : vector<1x32xf32> to vector<8x32xf32>
    %32 = arith.mulf %30, %31 : vector<8x32xf32>
    %33 = vector.broadcast %12 : vector<1x32xf32> to vector<8x32xf32>
    %34 = arith.addf %32, %33 : vector<8x32xf32>
    %35 = vector.extract_strided_slice %0 {offsets = [0, 0], sizes = [1, 32], strides = [1, 1]} : vector<4x32xf32> to vector<1x32xf32>
    %36 = vector.extract_strided_slice %1 {offsets = [0, 0], sizes = [1, 32], strides = [1, 1]} : vector<4x32xf32> to vector<1x32xf32>
    %cst_16 = arith.constant dense<0.000000e+00> : vector<8xf32>
    %37 = vector.multi_reduction <add>, %7, %cst_16 [1] : vector<8x32xf32> to vector<8xf32>
    %38 = vector.shape_cast %37 : vector<8xf32> to vector<8x1xf32>
    %cst_17 = arith.constant 3.200000e+01 : f32
    %39 = vector.broadcast %cst_17 : f32 to vector<8x1xf32>
    %40 = arith.divf %38, %39 : vector<8x1xf32>
    %41 = vector.broadcast %40 : vector<8x1xf32> to vector<8x32xf32>
    %42 = arith.subf %7, %41 : vector<8x32xf32>
    %43 = arith.mulf %42, %42 : vector<8x32xf32>
    %cst_18 = arith.constant dense<0.000000e+00> : vector<8xf32>
    %44 = vector.multi_reduction <add>, %43, %cst_18 [1] : vector<8x32xf32> to vector<8xf32>
    %45 = vector.shape_cast %44 : vector<8xf32> to vector<8x1xf32>
    %cst_19 = arith.constant 3.200000e+01 : f32
    %46 = vector.broadcast %cst_19 : f32 to vector<8x1xf32>
    %47 = arith.divf %45, %46 : vector<8x1xf32>
    %48 = vector.broadcast %40 : vector<8x1xf32> to vector<8x32xf32>
    %49 = arith.subf %7, %48 : vector<8x32xf32>
    %cst_20 = arith.constant 9.99999974E-6 : f32
    %50 = vector.broadcast %cst_20 : f32 to vector<8x1xf32>
    %51 = arith.addf %47, %50 : vector<8x1xf32>
    %52 = math.rsqrt %51 : vector<8x1xf32>
    %53 = vector.broadcast %52 : vector<8x1xf32> to vector<8x32xf32>
    %54 = arith.mulf %49, %53 : vector<8x32xf32>
    %55 = vector.broadcast %35 : vector<1x32xf32> to vector<8x32xf32>
    %56 = arith.mulf %54, %55 : vector<8x32xf32>
    %57 = vector.broadcast %36 : vector<1x32xf32> to vector<8x32xf32>
    %58 = arith.addf %56, %57 : vector<8x32xf32>
    %59 = vector.extract_strided_slice %0 {offsets = [0, 0], sizes = [1, 32], strides = [1, 1]} : vector<4x32xf32> to vector<1x32xf32>
    %60 = vector.extract_strided_slice %1 {offsets = [0, 0], sizes = [1, 32], strides = [1, 1]} : vector<4x32xf32> to vector<1x32xf32>
    %cst_21 = arith.constant dense<0.000000e+00> : vector<8xf32>
    %61 = vector.multi_reduction <add>, %10, %cst_21 [1] : vector<8x32xf32> to vector<8xf32>
    %62 = vector.shape_cast %61 : vector<8xf32> to vector<8x1xf32>
    %cst_22 = arith.constant 3.200000e+01 : f32
    %63 = vector.broadcast %cst_22 : f32 to vector<8x1xf32>
    %64 = arith.divf %62, %63 : vector<8x1xf32>
    %65 = vector.broadcast %64 : vector<8x1xf32> to vector<8x32xf32>
    %66 = arith.subf %10, %65 : vector<8x32xf32>
    %67 = arith.mulf %66, %66 : vector<8x32xf32>
    %cst_23 = arith.constant dense<0.000000e+00> : vector<8xf32>
    %68 = vector.multi_reduction <add>, %67, %cst_23 [1] : vector<8x32xf32> to vector<8xf32>
    %69 = vector.shape_cast %68 : vector<8xf32> to vector<8x1xf32>
    %cst_24 = arith.constant 3.200000e+01 : f32
    %70 = vector.broadcast %cst_24 : f32 to vector<8x1xf32>
    %71 = arith.divf %69, %70 : vector<8x1xf32>
    %72 = vector.broadcast %64 : vector<8x1xf32> to vector<8x32xf32>
    %73 = arith.subf %10, %72 : vector<8x32xf32>
    %cst_25 = arith.constant 9.99999974E-6 : f32
    %74 = vector.broadcast %cst_25 : f32 to vector<8x1xf32>
    %75 = arith.addf %71, %74 : vector<8x1xf32>
    %76 = math.rsqrt %75 : vector<8x1xf32>
    %77 = vector.broadcast %76 : vector<8x1xf32> to vector<8x32xf32>
    %78 = arith.mulf %73, %77 : vector<8x32xf32>
    %79 = vector.broadcast %59 : vector<1x32xf32> to vector<8x32xf32>
    %80 = arith.mulf %78, %79 : vector<8x32xf32>
    %81 = vector.broadcast %60 : vector<1x32xf32> to vector<8x32xf32>
    %82 = arith.addf %80, %81 : vector<8x32xf32>
    %c0_26 = arith.constant 0 : index
    %c0_27 = arith.constant 0 : index
    %c0_28 = arith.constant 0 : index
    %83 = vector.load %arg5[%c0_26, %c0_27, %c0_28] : memref<3x32x32xbf16, #tpu.memory_space<vmem>>, vector<1x32x32xbf16>
    %84 = vector.shape_cast %83 : vector<1x32x32xbf16> to vector<32x32xbf16>
    %85 = arith.truncf %34 : vector<8x32xf32> to vector<8x32xbf16>
    %cst_29 = arith.constant dense<0.000000e+00> : vector<8x32xf32>
    %86 = tpu.matmul %85, %84, %cst_29 {dimension_numbers = #tpu.dot_dimension_numbers<[1], [0], [0], [1], [0, 0, 1, 1], [], []>} : vector<8x32xbf16>, vector<32x32xbf16>, vector<8x32xf32> -> vector<8x32xf32>
    %c0_30 = arith.constant 0 : index
    %c0_31 = arith.constant 0 : index
    %c0_32 = arith.constant 0 : index
    %87 = vector.load %arg6[%c0_30, %c0_31, %c0_32] : memref<3x1x32xf32, #tpu.memory_space<vmem>>, vector<1x1x32xf32>
    %88 = vector.shape_cast %87 : vector<1x1x32xf32> to vector<1x32xf32>
    %89 = vector.broadcast %88 : vector<1x32xf32> to vector<8x32xf32>
    %90 = arith.addf %86, %89 : vector<8x32xf32>
    %c1 = arith.constant 1 : index
    %c0_33 = arith.constant 0 : index
    %c0_34 = arith.constant 0 : index
    %91 = vector.load %arg5[%c1, %c0_33, %c0_34] : memref<3x32x32xbf16, #tpu.memory_space<vmem>>, vector<1x32x32xbf16>
    %92 = vector.shape_cast %91 : vector<1x32x32xbf16> to vector<32x32xbf16>
    %93 = arith.truncf %58 : vector<8x32xf32> to vector<8x32xbf16>
    %cst_35 = arith.constant dense<0.000000e+00> : vector<8x32xf32>
    %94 = tpu.matmul %93, %92, %cst_35 {dimension_numbers = #tpu.dot_dimension_numbers<[1], [0], [0], [1], [0, 0, 1, 1], [], []>} : vector<8x32xbf16>, vector<32x32xbf16>, vector<8x32xf32> -> vector<8x32xf32>
    %c1_36 = arith.constant 1 : index
    %c0_37 = arith.constant 0 : index
    %c0_38 = arith.constant 0 : index
    %95 = vector.load %arg6[%c1_36, %c0_37, %c0_38] : memref<3x1x32xf32, #tpu.memory_space<vmem>>, vector<1x1x32xf32>
    %96 = vector.shape_cast %95 : vector<1x1x32xf32> to vector<1x32xf32>
    %97 = vector.broadcast %96 : vector<1x32xf32> to vector<8x32xf32>
    %98 = arith.addf %94, %97 : vector<8x32xf32>
    %c2 = arith.constant 2 : index
    %c0_39 = arith.constant 0 : index
    %c0_40 = arith.constant 0 : index
    %99 = vector.load %arg5[%c2, %c0_39, %c0_40] : memref<3x32x32xbf16, #tpu.memory_space<vmem>>, vector<1x32x32xbf16>
    %100 = vector.shape_cast %99 : vector<1x32x32xbf16> to vector<32x32xbf16>
    %101 = arith.truncf %82 : vector<8x32xf32> to vector<8x32xbf16>
    %cst_41 = arith.constant dense<0.000000e+00> : vector<8x32xf32>
    %102 = tpu.matmul %101, %100, %cst_41 {dimension_numbers = #tpu.dot_dimension_numbers<[1], [0], [0], [1], [0, 0, 1, 1], [], []>} : vector<8x32xbf16>, vector<32x32xbf16>, vector<8x32xf32> -> vector<8x32xf32>
    %c2_42 = arith.constant 2 : index
    %c0_43 = arith.constant 0 : index
    %c0_44 = arith.constant 0 : index
    %103 = vector.load %arg6[%c2_42, %c0_43, %c0_44] : memref<3x1x32xf32, #tpu.memory_space<vmem>>, vector<1x1x32xf32>
    %104 = vector.shape_cast %103 : vector<1x1x32xf32> to vector<1x32xf32>
    %105 = vector.broadcast %104 : vector<1x32xf32> to vector<8x32xf32>
    %106 = arith.addf %102, %105 : vector<8x32xf32>
    %107 = arith.truncf %98 : vector<8x32xf32> to vector<8x32xbf16>
    %c0_45 = arith.constant 0 : index
    %c0_46 = arith.constant 0 : index
    %108 = vector.load %arg18[%c0_45, %c0_46] : memref<8x32xbf16, #tpu.memory_space<vmem>>, vector<8x32xbf16>
    tpu.vector_store %arg18[%c0_45, %c0_46], %107 {strides = array<i32>} : memref<8x32xbf16, #tpu.memory_space<vmem>>, vector<8x32xbf16>,
    %109 = tpu.iota {dimensions = array<i32: 1>} : vector<1x32xi32>
    %c0_i32 = arith.constant 0 : i32
    %110 = vector.broadcast %c0_i32 : i32 to vector<1x32xi32>
    %111 = arith.cmpi sge, %109, %110 : vector<1x32xi32>
    %c8_i32 = arith.constant 8 : i32
    %112 = vector.broadcast %c8_i32 : i32 to vector<1x32xi32>
    %113 = arith.cmpi slt, %109, %112 : vector<1x32xi32>
    %114 = arith.andi %111, %113 : vector<1x32xi1>
    %115 = arith.extui %114 : vector<1x32xi1> to vector<1x32xi32>
    %116 = arith.sitofp %115 : vector<1x32xi32> to vector<1x32xf32>
    %cst_47 = arith.constant 0.353553385 : f32
    %117 = vector.broadcast %cst_47 : f32 to vector<1x32xf32>
    %118 = arith.mulf %116, %117 : vector<1x32xf32>
    %119 = vector.broadcast %118 : vector<1x32xf32> to vector<8x32xf32>
    %120 = arith.mulf %90, %119 : vector<8x32xf32>
    %121 = arith.truncf %120 : vector<8x32xf32> to vector<8x32xbf16>
    %c0_48 = arith.constant 0 : index
    %c0_49 = arith.constant 0 : index
    %c0_50 = arith.constant 0 : index
    %122 = vector.load %arg19[%c0_48, %c0_49, %c0_50] : memref<4x8x32xbf16, #tpu.memory_space<vmem>>, vector<1x8x32xbf16>
    %123 = vector.shape_cast %122 : vector<1x8x32xbf16> to vector<8x32xbf16>
    %124 = vector.shape_cast %121 : vector<8x32xbf16> to vector<1x8x32xbf16>
    tpu.vector_store %arg19[%c0_48, %c0_49, %c0_50], %124 {strides = array<i32>} : memref<4x8x32xbf16, #tpu.memory_space<vmem>>, vector<1x8x32xbf16>,
    %125 = vector.broadcast %116 : vector<1x32xf32> to vector<8x32xf32>
    %126 = arith.mulf %106, %125 : vector<8x32xf32>
    %127 = arith.truncf %126 : vector<8x32xf32> to vector<8x32xbf16>
    %c0_51 = arith.constant 0 : index
    %c0_52 = arith.constant 0 : index
    %c0_53 = arith.constant 0 : index
    %128 = vector.load %arg20[%c0_51, %c0_52, %c0_53] : memref<4x8x32xbf16, #tpu.memory_space<vmem>>, vector<1x8x32xbf16>
    %129 = vector.shape_cast %128 : vector<1x8x32xbf16> to vector<8x32xbf16>
    %130 = vector.shape_cast %127 : vector<8x32xbf16> to vector<1x8x32xbf16>
    tpu.vector_store %arg20[%c0_51, %c0_52, %c0_53], %130 {strides = array<i32>} : memref<4x8x32xbf16, #tpu.memory_space<vmem>>, vector<1x8x32xbf16>,
    %c8_i32_54 = arith.constant 8 : i32
    %131 = vector.broadcast %c8_i32_54 : i32 to vector<1x32xi32>
    %132 = arith.cmpi sge, %109, %131 : vector<1x32xi32>
    %c16_i32 = arith.constant 16 : i32
    %133 = vector.broadcast %c16_i32 : i32 to vector<1x32xi32>
    %134 = arith.cmpi slt, %109, %133 : vector<1x32xi32>
    %135 = arith.andi %132, %134 : vector<1x32xi1>
    %136 = arith.extui %135 : vector<1x32xi1> to vector<1x32xi32>
    %137 = arith.sitofp %136 : vector<1x32xi32> to vector<1x32xf32>
    %cst_55 = arith.constant 0.353553385 : f32
    %138 = vector.broadcast %cst_55 : f32 to vector<1x32xf32>
    %139 = arith.mulf %137, %138 : vector<1x32xf32>
    %140 = vector.broadcast %139 : vector<1x32xf32> to vector<8x32xf32>
    %141 = arith.mulf %90, %140 : vector<8x32xf32>
    %142 = arith.truncf %141 : vector<8x32xf32> to vector<8x32xbf16>
    %c1_56 = arith.constant 1 : index
    %c0_57 = arith.constant 0 : index
    %c0_58 = arith.constant 0 : index
    %143 = vector.load %arg19[%c1_56, %c0_57, %c0_58] : memref<4x8x32xbf16, #tpu.memory_space<vmem>>, vector<1x8x32xbf16>
    %144 = vector.shape_cast %143 : vector<1x8x32xbf16> to vector<8x32xbf16>
    %145 = vector.shape_cast %142 : vector<8x32xbf16> to vector<1x8x32xbf16>
    tpu.vector_store %arg19[%c1_56, %c0_57, %c0_58], %145 {strides = array<i32>} : memref<4x8x32xbf16, #tpu.memory_space<vmem>>, vector<1x8x32xbf16>,
    %146 = vector.broadcast %137 : vector<1x32xf32> to vector<8x32xf32>
    %147 = arith.mulf %106, %146 : vector<8x32xf32>
    %148 = arith.truncf %147 : vector<8x32xf32> to vector<8x32xbf16>
    %c1_59 = arith.constant 1 : index
    %c0_60 = arith.constant 0 : index
    %c0_61 = arith.constant 0 : index
    %149 = vector.load %arg20[%c1_59, %c0_60, %c0_61] : memref<4x8x32xbf16, #tpu.memory_space<vmem>>, vector<1x8x32xbf16>
    %150 = vector.shape_cast %149 : vector<1x8x32xbf16> to vector<8x32xbf16>
    %151 = vector.shape_cast %148 : vector<8x32xbf16> to vector<1x8x32xbf16>
    tpu.vector_store %arg20[%c1_59, %c0_60, %c0_61], %151 {strides = array<i32>} : memref<4x8x32xbf16, #tpu.memory_space<vmem>>, vector<1x8x32xbf16>,
    %c16_i32_62 = arith.constant 16 : i32
    %152 = vector.broadcast %c16_i32_62 : i32 to vector<1x32xi32>
    %153 = arith.cmpi sge, %109, %152 : vector<1x32xi32>
    %c24_i32 = arith.constant 24 : i32
    %154 = vector.broadcast %c24_i32 : i32 to vector<1x32xi32>
    %155 = arith.cmpi slt, %109, %154 : vector<1x32xi32>
    %156 = arith.andi %153, %155 : vector<1x32xi1>
    %157 = arith.extui %156 : vector<1x32xi1> to vector<1x32xi32>
    %158 = arith.sitofp %157 : vector<1x32xi32> to vector<1x32xf32>
    %cst_63 = arith.constant 0.353553385 : f32
    %159 = vector.broadcast %cst_63 : f32 to vector<1x32xf32>
    %160 = arith.mulf %158, %159 : vector<1x32xf32>
    %161 = vector.broadcast %160 : vector<1x32xf32> to vector<8x32xf32>
    %162 = arith.mulf %90, %161 : vector<8x32xf32>
    %163 = arith.truncf %162 : vector<8x32xf32> to vector<8x32xbf16>
    %c2_64 = arith.constant 2 : index
    %c0_65 = arith.constant 0 : index
    %c0_66 = arith.constant 0 : index
    %164 = vector.load %arg19[%c2_64, %c0_65, %c0_66] : memref<4x8x32xbf16, #tpu.memory_space<vmem>>, vector<1x8x32xbf16>
    %165 = vector.shape_cast %164 : vector<1x8x32xbf16> to vector<8x32xbf16>
    %166 = vector.shape_cast %163 : vector<8x32xbf16> to vector<1x8x32xbf16>
    tpu.vector_store %arg19[%c2_64, %c0_65, %c0_66], %166 {strides = array<i32>} : memref<4x8x32xbf16, #tpu.memory_space<vmem>>, vector<1x8x32xbf16>,
    %167 = vector.broadcast %158 : vector<1x32xf32> to vector<8x32xf32>
    %168 = arith.mulf %106, %167 : vector<8x32xf32>
    %169 = arith.truncf %168 : vector<8x32xf32> to vector<8x32xbf16>
    %c2_67 = arith.constant 2 : index
    %c0_68 = arith.constant 0 : index
    %c0_69 = arith.constant 0 : index
    %170 = vector.load %arg20[%c2_67, %c0_68, %c0_69] : memref<4x8x32xbf16, #tpu.memory_space<vmem>>, vector<1x8x32xbf16>
    %171 = vector.shape_cast %170 : vector<1x8x32xbf16> to vector<8x32xbf16>
    %172 = vector.shape_cast %169 : vector<8x32xbf16> to vector<1x8x32xbf16>
    tpu.vector_store %arg20[%c2_67, %c0_68, %c0_69], %172 {strides = array<i32>} : memref<4x8x32xbf16, #tpu.memory_space<vmem>>, vector<1x8x32xbf16>,
    %c24_i32_70 = arith.constant 24 : i32
    %173 = vector.broadcast %c24_i32_70 : i32 to vector<1x32xi32>
    %174 = arith.cmpi sge, %109, %173 : vector<1x32xi32>
    %c32_i32 = arith.constant 32 : i32
    %175 = vector.broadcast %c32_i32 : i32 to vector<1x32xi32>
    %176 = arith.cmpi slt, %109, %175 : vector<1x32xi32>
    %177 = arith.andi %174, %176 : vector<1x32xi1>
    %178 = arith.extui %177 : vector<1x32xi1> to vector<1x32xi32>
    %179 = arith.sitofp %178 : vector<1x32xi32> to vector<1x32xf32>
    %cst_71 = arith.constant 0.353553385 : f32
    %180 = vector.broadcast %cst_71 : f32 to vector<1x32xf32>
    %181 = arith.mulf %179, %180 : vector<1x32xf32>
    %182 = vector.broadcast %181 : vector<1x32xf32> to vector<8x32xf32>
    %183 = arith.mulf %90, %182 : vector<8x32xf32>
    %184 = arith.truncf %183 : vector<8x32xf32> to vector<8x32xbf16>
    %c3 = arith.constant 3 : index
    %c0_72 = arith.constant 0 : index
    %c0_73 = arith.constant 0 : index
    %185 = vector.load %arg19[%c3, %c0_72, %c0_73] : memref<4x8x32xbf16, #tpu.memory_space<vmem>>, vector<1x8x32xbf16>
    %186 = vector.shape_cast %185 : vector<1x8x32xbf16> to vector<8x32xbf16>
    %187 = vector.shape_cast %184 : vector<8x32xbf16> to vector<1x8x32xbf16>
    tpu.vector_store %arg19[%c3, %c0_72, %c0_73], %187 {strides = array<i32>} : memref<4x8x32xbf16, #tpu.memory_space<vmem>>, vector<1x8x32xbf16>,
    %188 = vector.broadcast %179 : vector<1x32xf32> to vector<8x32xf32>
    %189 = arith.mulf %106, %188 : vector<8x32xf32>
    %190 = arith.truncf %189 : vector<8x32xf32> to vector<8x32xbf16>
    %c3_74 = arith.constant 3 : index
    %c0_75 = arith.constant 0 : index
    %c0_76 = arith.constant 0 : index
    %191 = vector.load %arg20[%c3_74, %c0_75, %c0_76] : memref<4x8x32xbf16, #tpu.memory_space<vmem>>, vector<1x8x32xbf16>
    %192 = vector.shape_cast %191 : vector<1x8x32xbf16> to vector<8x32xbf16>
    %193 = vector.shape_cast %190 : vector<8x32xbf16> to vector<1x8x32xbf16>
    tpu.vector_store %arg20[%c3_74, %c0_75, %c0_76], %193 {strides = array<i32>} : memref<4x8x32xbf16, #tpu.memory_space<vmem>>, vector<1x8x32xbf16>,
    %c0_i32_77 = arith.constant 0 : i32
    %c8_i32_78 = arith.constant 8 : i32
    %194 = arith.muli %c0_i32_77, %c8_i32_78 : i32
    %c8_i32_79 = arith.constant 8 : i32
    %195 = arith.muli %c0_i32_77, %c8_i32_79 : i32
    %196 = tpu.assume_multiple %194, 8 : i32
    %197 = tpu.assume_multiple %195, 8 : i32
    %198 = arith.index_cast %197 : i32 to index
    %c0_80 = arith.constant 0 : index
    %199 = vector.load %arg18[%198, %c0_80] : memref<8x32xbf16, #tpu.memory_space<vmem>>, vector<8x32xbf16>
    %cst_81 = arith.constant 0.000000e+00 : f32
    %200 = vector.broadcast %cst_81 : f32 to vector<8x32xf32>
    %c0_82 = arith.constant 0 : index
    %201 = arith.index_cast %196 : i32 to index
    %c0_83 = arith.constant 0 : index
    %202 = vector.load %arg19[%c0_82, %201, %c0_83] : memref<4x8x32xbf16, #tpu.memory_space<vmem>>, vector<1x8x32xbf16>
    %203 = vector.shape_cast %202 : vector<1x8x32xbf16> to vector<8x32xbf16>
    "tpu.trace_start"() <{level = 10 : i32, message = "qd,kd->qk"}> : () -> ()
    %cst_84 = arith.constant dense<0.000000e+00> : vector<8x8xf32>
    %204 = tpu.matmul %203, %199, %cst_84 {dimension_numbers = #tpu.dot_dimension_numbers<[1], [1], [0], [0], [0, 0, 1, 0], [], []>} : vector<8x32xbf16>, vector<8x32xbf16>, vector<8x8xf32> -> vector<8x8xf32>
    "tpu.trace_stop"() : () -> ()
    %cst_85 = arith.constant dense<0xFF800000> : vector<8xf32>
    %205 = vector.multi_reduction <maximumf>, %204, %cst_85 [1] : vector<8x8xf32> to vector<8xf32>
    %206 = vector.shape_cast %205 : vector<8xf32> to vector<8x1xf32>
    %207 = vector.broadcast %206 : vector<8x1xf32> to vector<8x8xf32>
    %208 = arith.subf %204, %207 : vector<8x8xf32>
    %209 = math.exp %208 : vector<8x8xf32>
    %cst_86 = arith.constant dense<0.000000e+00> : vector<8xf32>
    %210 = vector.multi_reduction <add>, %209, %cst_86 [1] : vector<8x8xf32> to vector<8xf32>
    %211 = vector.shape_cast %210 : vector<8xf32> to vector<8x1xf32>
    %212 = tpu.reciprocal %211 {approx = true} : vector<8x1xf32> -> vector<8x1xf32>
    %213 = vector.broadcast %212 : vector<8x1xf32> to vector<8x8xf32>
    %214 = arith.mulf %209, %213 : vector<8x8xf32>
    %215 = arith.truncf %214 : vector<8x8xf32> to vector<8x8xbf16>
    %c0_87 = arith.constant 0 : index
    %216 = arith.index_cast %197 : i32 to index
    %c0_88 = arith.constant 0 : index
    %217 = vector.load %arg20[%c0_87, %216, %c0_88] : memref<4x8x32xbf16, #tpu.memory_space<vmem>>, vector<1x8x32xbf16>
    %218 = vector.shape_cast %217 : vector<1x8x32xbf16> to vector<8x32xbf16>
    %cst_89 = arith.constant dense<0.000000e+00> : vector<8x32xf32>
    %219 = tpu.matmul %215, %218, %cst_89 {dimension_numbers = #tpu.dot_dimension_numbers<[1], [0], [0], [1], [0, 0, 1, 1], [], []>} : vector<8x8xbf16>, vector<8x32xbf16>, vector<8x32xf32> -> vector<8x32xf32>
    %220 = arith.addf %200, %219 : vector<8x32xf32>
    %c1_90 = arith.constant 1 : index
    %221 = arith.index_cast %196 : i32 to index
    %c0_91 = arith.constant 0 : index
    %222 = vector.load %arg19[%c1_90, %221, %c0_91] : memref<4x8x32xbf16, #tpu.memory_space<vmem>>, vector<1x8x32xbf16>
    %223 = vector.shape_cast %222 : vector<1x8x32xbf16> to vector<8x32xbf16>
    "tpu.trace_start"() <{level = 10 : i32, message = "qd,kd->qk"}> : () -> ()
    %cst_92 = arith.constant dense<0.000000e+00> : vector<8x8xf32>
    %224 = tpu.matmul %223, %199, %cst_92 {dimension_numbers = #tpu.dot_dimension_numbers<[1], [1], [0], [0], [0, 0, 1, 0], [], []>} : vector<8x32xbf16>, vector<8x32xbf16>, vector<8x8xf32> -> vector<8x8xf32>
    "tpu.trace_stop"() : () -> ()
    %cst_93 = arith.constant dense<0xFF800000> : vector<8xf32>
    %225 = vector.multi_reduction <maximumf>, %224, %cst_93 [1] : vector<8x8xf32> to vector<8xf32>
    %226 = vector.shape_cast %225 : vector<8xf32> to vector<8x1xf32>
    %227 = vector.broadcast %226 : vector<8x1xf32> to vector<8x8xf32>
    %228 = arith.subf %224, %227 : vector<8x8xf32>
    %229 = math.exp %228 : vector<8x8xf32>
    %cst_94 = arith.constant dense<0.000000e+00> : vector<8xf32>
    %230 = vector.multi_reduction <add>, %229, %cst_94 [1] : vector<8x8xf32> to vector<8xf32>
    %231 = vector.shape_cast %230 : vector<8xf32> to vector<8x1xf32>
    %232 = tpu.reciprocal %231 {approx = true} : vector<8x1xf32> -> vector<8x1xf32>
    %233 = vector.broadcast %232 : vector<8x1xf32> to vector<8x8xf32>
    %234 = arith.mulf %229, %233 : vector<8x8xf32>
    %235 = arith.truncf %234 : vector<8x8xf32> to vector<8x8xbf16>
    %c1_95 = arith.constant 1 : index
    %236 = arith.index_cast %197 : i32 to index
    %c0_96 = arith.constant 0 : index
    %237 = vector.load %arg20[%c1_95, %236, %c0_96] : memref<4x8x32xbf16, #tpu.memory_space<vmem>>, vector<1x8x32xbf16>
    %238 = vector.shape_cast %237 : vector<1x8x32xbf16> to vector<8x32xbf16>
    %cst_97 = arith.constant dense<0.000000e+00> : vector<8x32xf32>
    %239 = tpu.matmul %235, %238, %cst_97 {dimension_numbers = #tpu.dot_dimension_numbers<[1], [0], [0], [1], [0, 0, 1, 1], [], []>} : vector<8x8xbf16>, vector<8x32xbf16>, vector<8x32xf32> -> vector<8x32xf32>
    %240 = arith.addf %220, %239 : vector<8x32xf32>
    %c2_98 = arith.constant 2 : index
    %241 = arith.index_cast %196 : i32 to index
    %c0_99 = arith.constant 0 : index
    %242 = vector.load %arg19[%c2_98, %241, %c0_99] : memref<4x8x32xbf16, #tpu.memory_space<vmem>>, vector<1x8x32xbf16>
    %243 = vector.shape_cast %242 : vector<1x8x32xbf16> to vector<8x32xbf16>
    "tpu.trace_start"() <{level = 10 : i32, message = "qd,kd->qk"}> : () -> ()
    %cst_100 = arith.constant dense<0.000000e+00> : vector<8x8xf32>
    %244 = tpu.matmul %243, %199, %cst_100 {dimension_numbers = #tpu.dot_dimension_numbers<[1], [1], [0], [0], [0, 0, 1, 0], [], []>} : vector<8x32xbf16>, vector<8x32xbf16>, vector<8x8xf32> -> vector<8x8xf32>
    "tpu.trace_stop"() : () -> ()
    %cst_101 = arith.constant dense<0xFF800000> : vector<8xf32>
    %245 = vector.multi_reduction <maximumf>, %244, %cst_101 [1] : vector<8x8xf32> to vector<8xf32>
    %246 = vector.shape_cast %245 : vector<8xf32> to vector<8x1xf32>
    %247 = vector.broadcast %246 : vector<8x1xf32> to vector<8x8xf32>
    %248 = arith.subf %244, %247 : vector<8x8xf32>
    %249 = math.exp %248 : vector<8x8xf32>
    %cst_102 = arith.constant dense<0.000000e+00> : vector<8xf32>
    %250 = vector.multi_reduction <add>, %249, %cst_102 [1] : vector<8x8xf32> to vector<8xf32>
    %251 = vector.shape_cast %250 : vector<8xf32> to vector<8x1xf32>
    %252 = tpu.reciprocal %251 {approx = true} : vector<8x1xf32> -> vector<8x1xf32>
    %253 = vector.broadcast %252 : vector<8x1xf32> to vector<8x8xf32>
    %254 = arith.mulf %249, %253 : vector<8x8xf32>
    %255 = arith.truncf %254 : vector<8x8xf32> to vector<8x8xbf16>
    %c2_103 = arith.constant 2 : index
    %256 = arith.index_cast %197 : i32 to index
    %c0_104 = arith.constant 0 : index
    %257 = vector.load %arg20[%c2_103, %256, %c0_104] : memref<4x8x32xbf16, #tpu.memory_space<vmem>>, vector<1x8x32xbf16>
    %258 = vector.shape_cast %257 : vector<1x8x32xbf16> to vector<8x32xbf16>
    %cst_105 = arith.constant dense<0.000000e+00> : vector<8x32xf32>
    %259 = tpu.matmul %255, %258, %cst_105 {dimension_numbers = #tpu.dot_dimension_numbers<[1], [0], [0], [1], [0, 0, 1, 1], [], []>} : vector<8x8xbf16>, vector<8x32xbf16>, vector<8x32xf32> -> vector<8x32xf32>
    %260 = arith.addf %240, %259 : vector<8x32xf32>
    %c3_106 = arith.constant 3 : index
    %261 = arith.index_cast %196 : i32 to index
    %c0_107 = arith.constant 0 : index
    %262 = vector.load %arg19[%c3_106, %261, %c0_107] : memref<4x8x32xbf16, #tpu.memory_space<vmem>>, vector<1x8x32xbf16>
    %263 = vector.shape_cast %262 : vector<1x8x32xbf16> to vector<8x32xbf16>
    "tpu.trace_start"() <{level = 10 : i32, message = "qd,kd->qk"}> : () -> ()
    %cst_108 = arith.constant dense<0.000000e+00> : vector<8x8xf32>
    %264 = tpu.matmul %263, %199, %cst_108 {dimension_numbers = #tpu.dot_dimension_numbers<[1], [1], [0], [0], [0, 0, 1, 0], [], []>} : vector<8x32xbf16>, vector<8x32xbf16>, vector<8x8xf32> -> vector<8x8xf32>
    "tpu.trace_stop"() : () -> ()
    %cst_109 = arith.constant dense<0xFF800000> : vector<8xf32>
    %265 = vector.multi_reduction <maximumf>, %264, %cst_109 [1] : vector<8x8xf32> to vector<8xf32>
    %266 = vector.shape_cast %265 : vector<8xf32> to vector<8x1xf32>
    %267 = vector.broadcast %266 : vector<8x1xf32> to vector<8x8xf32>
    %268 = arith.subf %264, %267 : vector<8x8xf32>
    %269 = math.exp %268 : vector<8x8xf32>
    %cst_110 = arith.constant dense<0.000000e+00> : vector<8xf32>
    %270 = vector.multi_reduction <add>, %269, %cst_110 [1] : vector<8x8xf32> to vector<8xf32>
    %271 = vector.shape_cast %270 : vector<8xf32> to vector<8x1xf32>
    %272 = tpu.reciprocal %271 {approx = true} : vector<8x1xf32> -> vector<8x1xf32>
    %273 = vector.broadcast %272 : vector<8x1xf32> to vector<8x8xf32>
    %274 = arith.mulf %269, %273 : vector<8x8xf32>
    %275 = arith.truncf %274 : vector<8x8xf32> to vector<8x8xbf16>
    %c3_111 = arith.constant 3 : index
    %276 = arith.index_cast %197 : i32 to index
    %c0_112 = arith.constant 0 : index
    %277 = vector.load %arg20[%c3_111, %276, %c0_112] : memref<4x8x32xbf16, #tpu.memory_space<vmem>>, vector<1x8x32xbf16>
    %278 = vector.shape_cast %277 : vector<1x8x32xbf16> to vector<8x32xbf16>
    %cst_113 = arith.constant dense<0.000000e+00> : vector<8x32xf32>
    %279 = tpu.matmul %275, %278, %cst_113 {dimension_numbers = #tpu.dot_dimension_numbers<[1], [0], [0], [1], [0, 0, 1, 1], [], []>} : vector<8x8xbf16>, vector<8x32xbf16>, vector<8x32xf32> -> vector<8x32xf32>
    %280 = arith.addf %260, %279 : vector<8x32xf32>
    %281 = arith.truncf %280 : vector<8x32xf32> to vector<8x32xbf16>
    %282 = arith.index_cast %196 : i32 to index
    %c0_114 = arith.constant 0 : index
    %283 = vector.load %arg21[%282, %c0_114] : memref<8x32xbf16, #tpu.memory_space<vmem>>, vector<8x32xbf16>
    tpu.vector_store %arg21[%282, %c0_114], %281 {strides = array<i32>} : memref<8x32xbf16, #tpu.memory_space<vmem>>, vector<8x32xbf16>,
    %c1_i32 = arith.constant 1 : i32
    %c0_115 = arith.constant 0 : index
    %c0_116 = arith.constant 0 : index
    %284 = vector.load %arg21[%c0_115, %c0_116] : memref<8x32xbf16, #tpu.memory_space<vmem>>, vector<8x32xbf16>
    %c0_117 = arith.constant 0 : index
    %c0_118 = arith.constant 0 : index
    %285 = vector.load %arg7[%c0_117, %c0_118] : memref<32x32xbf16, #tpu.memory_space<vmem>>, vector<32x32xbf16>
    %cst_119 = arith.constant dense<0.000000e+00> : vector<8x32xf32>
    %286 = tpu.matmul %284, %285, %cst_119 {dimension_numbers = #tpu.dot_dimension_numbers<[1], [0], [0], [1], [0, 0, 1, 1], [], []>} : vector<8x32xbf16>, vector<32x32xbf16>, vector<8x32xf32> -> vector<8x32xf32>
    %c0_120 = arith.constant 0 : index
    %c0_121 = arith.constant 0 : index
    %287 = vector.load %arg8[%c0_120, %c0_121] : memref<1x32xf32, #tpu.memory_space<vmem>>, vector<1x32xf32>
    %288 = vector.broadcast %287 : vector<1x32xf32> to vector<8x32xf32>
    %289 = arith.addf %286, %288 : vector<8x32xf32>
    %290 = arith.addf %4, %289 : vector<8x32xf32>
    %291 = vector.extract_strided_slice %0 {offsets = [1, 0], sizes = [1, 32], strides = [1, 1]} : vector<4x32xf32> to vector<1x32xf32>
    %292 = vector.extract_strided_slice %1 {offsets = [1, 0], sizes = [1, 32], strides = [1, 1]} : vector<4x32xf32> to vector<1x32xf32>
    %cst_122 = arith.constant dense<0.000000e+00> : vector<8xf32>
    %293 = vector.multi_reduction <add>, %290, %cst_122 [1] : vector<8x32xf32> to vector<8xf32>
    %294 = vector.shape_cast %293 : vector<8xf32> to vector<8x1xf32>
    %cst_123 = arith.constant 3.200000e+01 : f32
    %295 = vector.broadcast %cst_123 : f32 to vector<8x1xf32>
    %296 = arith.divf %294, %295 : vector<8x1xf32>
    %297 = vector.broadcast %296 : vector<8x1xf32> to vector<8x32xf32>
    %298 = arith.subf %290, %297 : vector<8x32xf32>
    %299 = arith.mulf %298, %298 : vector<8x32xf32>
    %cst_124 = arith.constant dense<0.000000e+00> : vector<8xf32>
    %300 = vector.multi_reduction <add>, %299, %cst_124 [1] : vector<8x32xf32> to vector<8xf32>
    %301 = vector.shape_cast %300 : vector<8xf32> to vector<8x1xf32>
    %cst_125 = arith.constant 3.200000e+01 : f32
    %302 = vector.broadcast %cst_125 : f32 to vector<8x1xf32>
    %303 = arith.divf %301, %302 : vector<8x1xf32>
    %304 = vector.broadcast %296 : vector<8x1xf32> to vector<8x32xf32>
    %305 = arith.subf %290, %304 : vector<8x32xf32>
    %cst_126 = arith.constant 9.99999974E-6 : f32
    %306 = vector.broadcast %cst_126 : f32 to vector<8x1xf32>
    %307 = arith.addf %303, %306 : vector<8x1xf32>
    %308 = math.rsqrt %307 : vector<8x1xf32>
    %309 = vector.broadcast %308 : vector<8x1xf32> to vector<8x32xf32>
    %310 = arith.mulf %305, %309 : vector<8x32xf32>
    %311 = vector.broadcast %291 : vector<1x32xf32> to vector<8x32xf32>
    %312 = arith.mulf %310, %311 : vector<8x32xf32>
    %313 = vector.broadcast %292 : vector<1x32xf32> to vector<8x32xf32>
    %314 = arith.addf %312, %313 : vector<8x32xf32>
    %c0_127 = arith.constant 0 : index
    %c0_128 = arith.constant 0 : index
    %315 = vector.load %arg11[%c0_127, %c0_128] : memref<32x128xbf16, #tpu.memory_space<vmem>>, vector<32x128xbf16>
    %316 = arith.truncf %314 : vector<8x32xf32> to vector<8x32xbf16>
    %cst_129 = arith.constant dense<0.000000e+00> : vector<8x128xf32>
    %317 = tpu.matmul %316, %315, %cst_129 {dimension_numbers = #tpu.dot_dimension_numbers<[1], [0], [0], [1], [0, 0, 1, 1], [], []>} : vector<8x32xbf16>, vector<32x128xbf16>, vector<8x128xf32> -> vector<8x128xf32>
    %c0_130 = arith.constant 0 : index
    %c0_131 = arith.constant 0 : index
    %318 = vector.load %arg12[%c0_130, %c0_131] : memref<1x128xf32, #tpu.memory_space<vmem>>, vector<1x128xf32>
    %319 = vector.broadcast %318 : vector<1x128xf32> to vector<8x128xf32>
    %320 = arith.addf %317, %319 : vector<8x128xf32>
    %cst_132 = arith.constant 0.000000e+00 : f32
    %321 = vector.broadcast %cst_132 : f32 to vector<8x128xf32>
    %322 = arith.maximumf %320, %321 : vector<8x128xf32>
    %c0_133 = arith.constant 0 : index
    %c0_134 = arith.constant 0 : index
    %323 = vector.load %arg13[%c0_133, %c0_134] : memref<128x32xbf16, #tpu.memory_space<vmem>>, vector<128x32xbf16>
    %324 = arith.truncf %322 : vector<8x128xf32> to vector<8x128xbf16>
    %cst_135 = arith.constant dense<0.000000e+00> : vector<8x32xf32>
    %325 = tpu.matmul %324, %323, %cst_135 {dimension_numbers = #tpu.dot_dimension_numbers<[1], [0], [0], [1], [0, 0, 1, 1], [], []>} : vector<8x128xbf16>, vector<128x32xbf16>, vector<8x32xf32> -> vector<8x32xf32>
    %c0_136 = arith.constant 0 : index
    %c0_137 = arith.constant 0 : index
    %326 = vector.load %arg14[%c0_136, %c0_137] : memref<1x32xf32, #tpu.memory_space<vmem>>, vector<1x32xf32>
    %327 = vector.broadcast %326 : vector<1x32xf32> to vector<8x32xf32>
    %328 = arith.addf %325, %327 : vector<8x32xf32>
    %329 = arith.addf %290, %328 : vector<8x32xf32>
    %330 = vector.extract_strided_slice %0 {offsets = [2, 0], sizes = [1, 32], strides = [1, 1]} : vector<4x32xf32> to vector<1x32xf32>
    %331 = vector.extract_strided_slice %1 {offsets = [2, 0], sizes = [1, 32], strides = [1, 1]} : vector<4x32xf32> to vector<1x32xf32>
    %cst_138 = arith.constant dense<0.000000e+00> : vector<8xf32>
    %332 = vector.multi_reduction <add>, %329, %cst_138 [1] : vector<8x32xf32> to vector<8xf32>
    %333 = vector.shape_cast %332 : vector<8xf32> to vector<8x1xf32>
    %cst_139 = arith.constant 3.200000e+01 : f32
    %334 = vector.broadcast %cst_139 : f32 to vector<8x1xf32>
    %335 = arith.divf %333, %334 : vector<8x1xf32>
    %336 = vector.broadcast %335 : vector<8x1xf32> to vector<8x32xf32>
    %337 = arith.subf %329, %336 : vector<8x32xf32>
    %338 = arith.mulf %337, %337 : vector<8x32xf32>
    %cst_140 = arith.constant dense<0.000000e+00> : vector<8xf32>
    %339 = vector.multi_reduction <add>, %338, %cst_140 [1] : vector<8x32xf32> to vector<8xf32>
    %340 = vector.shape_cast %339 : vector<8xf32> to vector<8x1xf32>
    %cst_141 = arith.constant 3.200000e+01 : f32
    %341 = vector.broadcast %cst_141 : f32 to vector<8x1xf32>
    %342 = arith.divf %340, %341 : vector<8x1xf32>
    %343 = vector.broadcast %335 : vector<8x1xf32> to vector<8x32xf32>
    %344 = arith.subf %329, %343 : vector<8x32xf32>
    %cst_142 = arith.constant 9.99999974E-6 : f32
    %345 = vector.broadcast %cst_142 : f32 to vector<8x1xf32>
    %346 = arith.addf %342, %345 : vector<8x1xf32>
    %347 = math.rsqrt %346 : vector<8x1xf32>
    %348 = vector.broadcast %347 : vector<8x1xf32> to vector<8x32xf32>
    %349 = arith.mulf %344, %348 : vector<8x32xf32>
    %350 = vector.broadcast %330 : vector<1x32xf32> to vector<8x32xf32>
    %351 = arith.mulf %349, %350 : vector<8x32xf32>
    %352 = vector.broadcast %331 : vector<1x32xf32> to vector<8x32xf32>
    %353 = arith.addf %351, %352 : vector<8x32xf32>
    %c0_143 = arith.constant 0 : index
    %354 = memref.load %arg4[%c0_143] : memref<2xf32, #tpu.memory_space<smem>>
    %c1_144 = arith.constant 1 : index
    %355 = memref.load %arg4[%c1_144] : memref<2xf32, #tpu.memory_space<smem>>
    %356 = vector.broadcast %354 : f32 to vector<8x32xf32>
    %357 = arith.mulf %353, %356 : vector<8x32xf32>
    %358 = arith.addf %357, %2 : vector<8x32xf32>
    %359 = vector.extract_strided_slice %0 {offsets = [3, 0], sizes = [1, 32], strides = [1, 1]} : vector<4x32xf32> to vector<1x32xf32>
    %360 = vector.extract_strided_slice %1 {offsets = [3, 0], sizes = [1, 32], strides = [1, 1]} : vector<4x32xf32> to vector<1x32xf32>
    %cst_145 = arith.constant dense<0.000000e+00> : vector<8xf32>
    %361 = vector.multi_reduction <add>, %358, %cst_145 [1] : vector<8x32xf32> to vector<8xf32>
    %362 = vector.shape_cast %361 : vector<8xf32> to vector<8x1xf32>
    %cst_146 = arith.constant 3.200000e+01 : f32
    %363 = vector.broadcast %cst_146 : f32 to vector<8x1xf32>
    %364 = arith.divf %362, %363 : vector<8x1xf32>
    %365 = vector.broadcast %364 : vector<8x1xf32> to vector<8x32xf32>
    %366 = arith.subf %358, %365 : vector<8x32xf32>
    %367 = arith.mulf %366, %366 : vector<8x32xf32>
    %cst_147 = arith.constant dense<0.000000e+00> : vector<8xf32>
    %368 = vector.multi_reduction <add>, %367, %cst_147 [1] : vector<8x32xf32> to vector<8xf32>
    %369 = vector.shape_cast %368 : vector<8xf32> to vector<8x1xf32>
    %cst_148 = arith.constant 3.200000e+01 : f32
    %370 = vector.broadcast %cst_148 : f32 to vector<8x1xf32>
    %371 = arith.divf %369, %370 : vector<8x1xf32>
    %372 = vector.broadcast %364 : vector<8x1xf32> to vector<8x32xf32>
    %373 = arith.subf %358, %372 : vector<8x32xf32>
    %cst_149 = arith.constant 9.99999974E-6 : f32
    %374 = vector.broadcast %cst_149 : f32 to vector<8x1xf32>
    %375 = arith.addf %371, %374 : vector<8x1xf32>
    %376 = math.rsqrt %375 : vector<8x1xf32>
    %377 = vector.broadcast %376 : vector<8x1xf32> to vector<8x32xf32>
    %378 = arith.mulf %373, %377 : vector<8x32xf32>
    %379 = vector.broadcast %359 : vector<1x32xf32> to vector<8x32xf32>
    %380 = arith.mulf %378, %379 : vector<8x32xf32>
    %381 = vector.broadcast %360 : vector<1x32xf32> to vector<8x32xf32>
    %382 = arith.addf %380, %381 : vector<8x32xf32>
    %c0_150 = arith.constant 0 : index
    %c0_151 = arith.constant 0 : index
    %383 = vector.load %arg15[%c0_150, %c0_151] : memref<32x128xbf16, #tpu.memory_space<vmem>>, vector<32x128xbf16>
    %384 = arith.truncf %382 : vector<8x32xf32> to vector<8x32xbf16>
    %cst_152 = arith.constant dense<0.000000e+00> : vector<8x128xf32>
    %385 = tpu.matmul %384, %383, %cst_152 {dimension_numbers = #tpu.dot_dimension_numbers<[1], [0], [0], [1], [0, 0, 1, 1], [], []>} : vector<8x32xbf16>, vector<32x128xbf16>, vector<8x128xf32> -> vector<8x128xf32>
    %cst_153 = arith.constant 5.000000e-01 : f32
    %386 = vector.broadcast %cst_153 : f32 to vector<8x128xf32>
    %387 = arith.mulf %386, %385 : vector<8x128xf32>
    %cst_154 = arith.constant 0.707106769 : f32
    %388 = vector.broadcast %cst_154 : f32 to vector<8x128xf32>
    %389 = arith.mulf %385, %388 : vector<8x128xf32>
    %cst_155 = arith.constant 0.000000e+00 : f32
    %390 = vector.broadcast %cst_155 : f32 to vector<8x128xf32>
    %391 = arith.cmpf oge, %389, %390 : vector<8x128xf32>
    %cst_156 = arith.constant 1.000000e+00 : f32
    %cst_157 = arith.constant -1.000000e+00 : f32
    %392 = vector.broadcast %cst_156 : f32 to vector<8x128xf32>
    %393 = vector.broadcast %cst_157 : f32 to vector<8x128xf32>
    %394 = arith.select %391, %392, %393 : vector<8x128xi1>, vector<8x128xf32>
    %395 = math.absf %389 : vector<8x128xf32>
    %cst_158 = arith.constant 0.327591091 : f32
    %396 = vector.broadcast %cst_158 : f32 to vector<8x128xf32>
    %397 = arith.mulf %396, %395 : vector<8x128xf32>
    %cst_159 = arith.constant 1.000000e+00 : f32
    %398 = vector.broadcast %cst_159 : f32 to vector<8x128xf32>
    %399 = arith.addf %398, %397 : vector<8x128xf32>
    %cst_160 = arith.constant 1.000000e+00 : f32
    %400 = vector.broadcast %cst_160 : f32 to vector<8x128xf32>
    %401 = arith.divf %400, %399 : vector<8x128xf32>
    %cst_161 = arith.constant 1.06140542 : f32
    %402 = vector.broadcast %cst_161 : f32 to vector<8x128xf32>
    %403 = arith.mulf %402, %401 : vector<8x128xf32>
    %cst_162 = arith.constant -1.45315206 : f32
    %404 = vector.broadcast %cst_162 : f32 to vector<8x128xf32>
    %405 = arith.addf %403, %404 : vector<8x128xf32>
    %406 = arith.mulf %405, %401 : vector<8x128xf32>
    %cst_163 = arith.constant 1.42141378 : f32
    %407 = vector.broadcast %cst_163 : f32 to vector<8x128xf32>
    %408 = arith.addf %406, %407 : vector<8x128xf32>
    %409 = arith.mulf %408, %401 : vector<8x128xf32>
    %cst_164 = arith.constant -0.284496725 : f32
    %410 = vector.broadcast %cst_164 : f32 to vector<8x128xf32>
    %411 = arith.addf %409, %410 : vector<8x128xf32>
    %412 = arith.mulf %411, %401 : vector<8x128xf32>
    %cst_165 = arith.constant 0.254829586 : f32
    %413 = vector.broadcast %cst_165 : f32 to vector<8x128xf32>
    %414 = arith.addf %412, %413 : vector<8x128xf32>
    %415 = arith.mulf %414, %401 : vector<8x128xf32>
    %cst_166 = arith.constant 0.000000e+00 : f32
    %416 = vector.broadcast %cst_166 : f32 to vector<8x128xf32>
    %417 = arith.subf %416, %395 : vector<8x128xf32>
    %418 = arith.mulf %417, %395 : vector<8x128xf32>
    %419 = math.exp %418 : vector<8x128xf32>
    %420 = arith.mulf %415, %419 : vector<8x128xf32>
    %cst_167 = arith.constant 1.000000e+00 : f32
    %421 = vector.broadcast %cst_167 : f32 to vector<8x128xf32>
    %422 = arith.subf %421, %420 : vector<8x128xf32>
    %423 = arith.mulf %394, %422 : vector<8x128xf32>
    %cst_168 = arith.constant 1.000000e+00 : f32
    %424 = vector.broadcast %cst_168 : f32 to vector<8x128xf32>
    %425 = arith.addf %424, %423 : vector<8x128xf32>
    %426 = arith.mulf %387, %425 : vector<8x128xf32>
    %c0_169 = arith.constant 0 : index
    %c0_170 = arith.constant 0 : index
    %427 = vector.load %arg16[%c0_169, %c0_170] : memref<128x32xbf16, #tpu.memory_space<vmem>>, vector<128x32xbf16>
    %428 = arith.truncf %426 : vector<8x128xf32> to vector<8x128xbf16>
    %cst_171 = arith.constant dense<0.000000e+00> : vector<8x32xf32>
    %429 = tpu.matmul %428, %427, %cst_171 {dimension_numbers = #tpu.dot_dimension_numbers<[1], [0], [0], [1], [0, 0, 1, 1], [], []>} : vector<8x128xbf16>, vector<128x32xbf16>, vector<8x32xf32> -> vector<8x32xf32>
    %430 = vector.broadcast %355 : f32 to vector<8x32xf32>
    %431 = arith.mulf %429, %430 : vector<8x32xf32>
    %432 = arith.addf %431, %358 : vector<8x32xf32>
    %c0_172 = arith.constant 0 : index
    %c0_173 = arith.constant 0 : index
    %433 = vector.load %arg17[%c0_172, %c0_173] : memref<8x32xf32, #tpu.memory_space<vmem>>, vector<8x32xf32>
    tpu.vector_store %arg17[%c0_172, %c0_173], %432 {strides = array<i32>} : memref<8x32xf32, #tpu.memory_space<vmem>>, vector<8x32xf32>,
    return
  }
  func.func @transform_0(%arg0: i32) -> (i32, i32) {
    %c0_i32 = arith.constant 0 : i32
    %c0_i32_0 = arith.constant 0 : i32
    return %arg0, %c0_i32 : i32, i32
  }
  func.func @transform_1(%arg0: i32) -> (i32, i32) {
    %c0_i32 = arith.constant 0 : i32
    %c0_i32_0 = arith.constant 0 : i32
    return %arg0, %c0_i32 : i32, i32
  }
  func.func @transform_2(%arg0: i32) -> (i32, i32) {
    %c0_i32 = arith.constant 0 : i32
    %c0_i32_0 = arith.constant 0 : i32
    return %arg0, %c0_i32 : i32, i32
  }
  func.func @transform_3(%arg0: i32) -> i32 {
    %c0_i32 = arith.constant 0 : i32
    %c0_i32_0 = arith.constant 0 : i32
    return %c0_i32 : i32
  }
  func.func @transform_4(%arg0: i32) -> (i32, i32, i32) {
    %c0_i32 = arith.constant 0 : i32
    %c0_i32_0 = arith.constant 0 : i32
    %c0_i32_1 = arith.constant 0 : i32
    %c0_i32_2 = arith.constant 0 : i32
    return %c0_i32, %c0_i32_0, %c0_i32_1 : i32, i32, i32
  }
  func.func @transform_5(%arg0: i32) -> (i32, i32, i32) {
    %c0_i32 = arith.constant 0 : i32
    %c0_i32_0 = arith.constant 0 : i32
    %c0_i32_1 = arith.constant 0 : i32
    %c0_i32_2 = arith.constant 0 : i32
    return %c0_i32, %c0_i32_0, %c0_i32_1 : i32, i32, i32
  }
  func.func @transform_6(%arg0: i32) -> (i32, i32) {
    %c0_i32 = arith.constant 0 : i32
    %c0_i32_0 = arith.constant 0 : i32
    %c0_i32_1 = arith.constant 0 : i32
    return %c0_i32, %c0_i32_0 : i32, i32
  }
  func.func @transform_7(%arg0: i32) -> (i32, i32) {
    %c0_i32 = arith.constant 0 : i32
    %c0_i32_0 = arith.constant 0 : i32
    %c0_i32_1 = arith.constant 0 : i32
    return %c0_i32, %c0_i32_0 : i32, i32
  }
  func.func @transform_8(%arg0: i32) -> (i32, i32) {
    %c0_i32 = arith.constant 0 : i32
    %c0_i32_0 = arith.constant 0 : i32
    %c0_i32_1 = arith.constant 0 : i32
    return %c0_i32, %c0_i32_0 : i32, i32
  }
  func.func @transform_9(%arg0: i32) -> (i32, i32) {
    %c0_i32 = arith.constant 0 : i32
    %c0_i32_0 = arith.constant 0 : i32
    %c0_i32_1 = arith.constant 0 : i32
    return %c0_i32, %c0_i32_0 : i32, i32
  }
  func.func @transform_10(%arg0: i32) -> (i32, i32) {
    %c0_i32 = arith.constant 0 : i32
    %c0_i32_0 = arith.constant 0 : i32
    %c0_i32_1 = arith.constant 0 : i32
    return %c0_i32, %c0_i32_0 : i32, i32
  }
  func.func @transform_11(%arg0: i32) -> (i32, i32) {
    %c0_i32 = arith.constant 0 : i32
    %c0_i32_0 = arith.constant 0 : i32
    %c0_i32_1 = arith.constant 0 : i32
    return %c0_i32, %c0_i32_0 : i32, i32
  }
  func.func @transform_12(%arg0: i32) -> (i32, i32) {
    %c0_i32 = arith.constant 0 : i32
    %c0_i32_0 = arith.constant 0 : i32
    %c0_i32_1 = arith.constant 0 : i32
    return %c0_i32, %c0_i32_0 : i32, i32
  }
  func.func @transform_13(%arg0: i32) -> (i32, i32) {
    %c0_i32 = arith.constant 0 : i32
    %c0_i32_0 = arith.constant 0 : i32
    %c0_i32_1 = arith.constant 0 : i32
    return %c0_i32, %c0_i32_0 : i32, i32
  }
  func.func @transform_14(%arg0: i32) -> (i32, i32) {
    %c0_i32 = arith.constant 0 : i32
    %c0_i32_0 = arith.constant 0 : i32
    %c0_i32_1 = arith.constant 0 : i32
    return %c0_i32, %c0_i32_0 : i32, i32
  }
  func.func @transform_15(%arg0: i32) -> (i32, i32) {
    %c0_i32 = arith.constant 0 : i32
    %c0_i32_0 = arith.constant 0 : i32
    %c0_i32_1 = arith.constant 0 : i32
    return %c0_i32, %c0_i32_0 : i32, i32
  }
  func.func @transform_16(%arg0: i32) -> (i32, i32) {
    %c0_i32 = arith.constant 0 : i32
    %c0_i32_0 = arith.constant 0 : i32
    return %arg0, %c0_i32 : i32, i32
  }
}

module attributes {stable_mosaic.version = 11 : i64} {
  func.func @_gated_xattn_kernel(%arg0: i32, %arg1: memref<8x32xf32, #tpu.memory_space<vmem>>, %arg2: memref<8x32xf32, #tpu.memory_space<vmem>>, %arg3: memref<8x32xf32, #tpu.memory_space<vmem>>, %arg4: memref<2xf32, #tpu.memory_space<smem>>, %arg5: memref<3x32x32xbf16, #tpu.memory_space<vmem>>, %arg6: memref<3x1x32xf32, #tpu.memory_space<vmem>>, %arg7: memref<32x32xbf16, #tpu.memory_space<vmem>>, %arg8: memref<1x32xf32, #tpu.memory_space<vmem>>, %arg9: memref<4x32xf32, #tpu.memory_space<vmem>>, %arg10: memref<4x32xf32, #tpu.memory_space<vmem>>, %arg11: memref<32x128xbf16, #tpu.memory_space<vmem>>, %arg12: memref<1x128xf32, #tpu.memory_space<vmem>>, %arg13: memref<128x32xbf16, #tpu.memory_space<vmem>>, %arg14: memref<1x32xf32, #tpu.memory_space<vmem>>, %arg15: memref<32x128xbf16, #tpu.memory_space<vmem>>, %arg16: memref<128x32xbf16, #tpu.memory_space<vmem>>, %arg17: memref<8x32xf32, #tpu.memory_space<vmem>>, %arg18: memref<8x32xbf16, #tpu.memory_space<vmem>>, %arg19: memref<4x8x32xbf16, #tpu.memory_space<vmem>>, %arg20: memref<4x8x32xbf16, #tpu.memory_space<vmem>>, %arg21: memref<8x32xbf16, #tpu.memory_space<vmem>>) attributes {dimension_semantics = [#tpu.dimension_semantics<parallel>], iteration_bounds = array<i64: 2>, scalar_prefetch = 0 : i64, scratch_operands = 4 : i64, tpu.core_type = #tpu.core_type<tc>, window_params = [{transform_indices = @transform_0, window_bounds = array<i64: 8, 32>}, {transform_indices = @transform_1, window_bounds = array<i64: 8, 32>}, {transform_indices = @transform_2, window_bounds = array<i64: 8, 32>}, {transform_indices = @transform_3, window_bounds = array<i64: 2>}, {pipeline_mode = #tpu.pipeline_mode<synchronous>, transform_indices = @transform_4, window_bounds = array<i64: 3, 32, 32>}, {pipeline_mode = #tpu.pipeline_mode<synchronous>, transform_indices = @transform_5, window_bounds = array<i64: 3, 1, 32>}, {pipeline_mode = #tpu.pipeline_mode<synchronous>, transform_indices = @transform_6, window_bounds = array<i64: 32, 32>}, {pipeline_mode = #tpu.pipeline_mode<synchronous>, transform_indices = @transform_7, window_bounds = array<i64: 1, 32>}, {pipeline_mode = #tpu.pipeline_mode<synchronous>, transform_indices = @transform_8, window_bounds = array<i64: 4, 32>}, {pipeline_mode = #tpu.pipeline_mode<synchronous>, transform_indices = @transform_9, window_bounds = array<i64: 4, 32>}, {pipeline_mode = #tpu.pipeline_mode<synchronous>, transform_indices = @transform_10, window_bounds = array<i64: 32, 128>}, {pipeline_mode = #tpu.pipeline_mode<synchronous>, transform_indices = @transform_11, window_bounds = array<i64: 1, 128>}, {pipeline_mode = #tpu.pipeline_mode<synchronous>, transform_indices = @transform_12, window_bounds = array<i64: 128, 32>}, {pipeline_mode = #tpu.pipeline_mode<synchronous>, transform_indices = @transform_13, window_bounds = array<i64: 1, 32>}, {pipeline_mode = #tpu.pipeline_mode<synchronous>, transform_indices = @transform_14, window_bounds = array<i64: 32, 128>}, {pipeline_mode = #tpu.pipeline_mode<synchronous>, transform_indices = @transform_15, window_bounds = array<i64: 128, 32>}, {transform_indices = @transform_16, window_bounds = array<i64: 8, 32>}]} {
    %c0 = arith.constant 0 : index
    %c0_0 = arith.constant 0 : index
    %0 = vector.load %arg9[%c0, %c0_0] : memref<4x32xf32, #tpu.memory_space<vmem>>, vector<4x32xf32>
    %c0_1 = arith.constant 0 : index
    %c0_2 = arith.constant 0 : index
    %1 = vector.load %arg10[%c0_1, %c0_2] : memref<4x32xf32, #tpu.memory_space<vmem>>, vector<4x32xf32>
    %c0_3 = arith.constant 0 : index
    %c0_4 = arith.constant 0 : index
    %2 = vector.load %arg1[%c0_3, %c0_4] : memref<8x32xf32, #tpu.memory_space<vmem>>, vector<8x32xf32>
    %cst = arith.constant 5.65685415 : f32
    %3 = vector.broadcast %cst : f32 to vector<8x32xf32>
    %4 = arith.mulf %2, %3 : vector<8x32xf32>
    %c0_5 = arith.constant 0 : index
    %c0_6 = arith.constant 0 : index
    %5 = vector.load %arg2[%c0_5, %c0_6] : memref<8x32xf32, #tpu.memory_space<vmem>>, vector<8x32xf32>
    %cst_7 = arith.constant 5.65685415 : f32
    %6 = vector.broadcast %cst_7 : f32 to vector<8x32xf32>
    %7 = arith.mulf %5, %6 : vector<8x32xf32>
    %c0_8 = arith.constant 0 : index
    %c0_9 = arith.constant 0 : index
    %8 = vector.load %arg3[%c0_8, %c0_9] : memref<8x32xf32, #tpu.memory_space<vmem>>, vector<8x32xf32>
    %cst_10 = arith.constant 5.65685415 : f32
    %9 = vector.broadcast %cst_10 : f32 to vector<8x32xf32>
    %10 = arith.mulf %8, %9 : vector<8x32xf32>
    %11 = vector.extract_strided_slice %0 {offsets = [0, 0], sizes = [1, 32], strides = [1, 1]} : vector<4x32xf32> to vector<1x32xf32>
    %12 = vector.extract_strided_slice %1 {offsets = [0, 0], sizes = [1, 32], strides = [1, 1]} : vector<4x32xf32> to vector<1x32xf32>
    %cst_11 = arith.constant dense<0.000000e+00> : vector<8xf32>
    %13 = vector.multi_reduction <add>, %4, %cst_11 [1] : vector<8x32xf32> to vector<8xf32>
    %14 = vector.shape_cast %13 : vector<8xf32> to vector<8x1xf32>
    %cst_12 = arith.constant 3.200000e+01 : f32
    %15 = vector.broadcast %cst_12 : f32 to vector<8x1xf32>
    %16 = arith.divf %14, %15 : vector<8x1xf32>
    %17 = vector.broadcast %16 : vector<8x1xf32> to vector<8x32xf32>
    %18 = arith.subf %4, %17 : vector<8x32xf32>
    %19 = arith.mulf %18, %18 : vector<8x32xf32>
    %cst_13 = arith.constant dense<0.000000e+00> : vector<8xf32>
    %20 = vector.multi_reduction <add>, %19, %cst_13 [1] : vector<8x32xf32> to vector<8xf32>
    %21 = vector.shape_cast %20 : vector<8xf32> to vector<8x1xf32>
    %cst_14 = arith.constant 3.200000e+01 : f32
    %22 = vector.broadcast %cst_14 : f32 to vector<8x1xf32>
    %23 = arith.divf %21, %22 : vector<8x1xf32>
    %24 = vector.broadcast %16 : vector<8x1xf32> to vector<8x32xf32>
    %25 = arith.subf %4, %24 : vector<8x32xf32>
    %cst_15 = arith.constant 9.99999974E-6 : f32
    %26 = vector.broadcast %cst_15 : f32 to vector<8x1xf32>
    %27 = arith.addf %23, %26 : vector<8x1xf32>
    %28 = math.rsqrt %27 : vector<8x1xf32>
    %29 = vector.broadcast %28 : vector<8x1xf32> to vector<8x32xf32>
    %30 = arith.mulf %25, %29 : vector<8x32xf32>
    %31 = vector.broadcast %11 : vector<1x32xf32> to vector<8x32xf32>
    %32 = arith.mulf %30, %31 : vector<8x32xf32>
    %33 = vector.broadcast %12 : vector<1x32xf32> to vector<8x32xf32>
    %34 = arith.addf %32, %33 : vector<8x32xf32>
    %35 = vector.extract_strided_slice %0 {offsets = [0, 0], sizes = [1, 32], strides = [1, 1]} : vector<4x32xf32> to vector<1x32xf32>
    %36 = vector.extract_strided_slice %1 {offsets = [0, 0], sizes = [1, 32], strides = [1, 1]} : vector<4x32xf32> to vector<1x32xf32>
    %cst_16 = arith.constant dense<0.000000e+00> : vector<8xf32>
    %37 = vector.multi_reduction <add>, %7, %cst_16 [1] : vector<8x32xf32> to vector<8xf32>
    %38 = vector.shape_cast %37 : vector<8xf32> to vector<8x1xf32>
    %cst_17 = arith.constant 3.200000e+01 : f32
    %39 = vector.broadcast %cst_17 : f32 to vector<8x1xf32>
    %40 = arith.divf %38, %39 : vector<8x1xf32>
    %41 = vector.broadcast %40 : vector<8x1xf32> to vector<8x32xf32>
    %42 = arith.subf %7, %41 : vector<8x32xf32>
    %43 = arith.mulf %42, %42 : vector<8x32xf32>
    %cst_18 = arith.constant dense<0.000000e+00> : vector<8xf32>
    %44 = vector.multi_reduction <add>, %43, %cst_18 [1] : vector<8x32xf32> to vector<8xf32>
    %45 = vector.shape_cast %44 : vector<8xf32> to vector<8x1xf32>
    %cst_19 = arith.constant 3.200000e+01 : f32
    %46 = vector.broadcast %cst_19 : f32 to vector<8x1xf32>
    %47 = arith.divf %45, %46 : vector<8x1xf32>
    %48 = vector.broadcast %40 : vector<8x1xf32> to vector<8x32xf32>
    %49 = arith.subf %7, %48 : vector<8x32xf32>
    %cst_20 = arith.constant 9.99999974E-6 : f32
    %50 = vector.broadcast %cst_20 : f32 to vector<8x1xf32>
    %51 = arith.addf %47, %50 : vector<8x1xf32>
    %52 = math.rsqrt %51 : vector<8x1xf32>
    %53 = vector.broadcast %52 : vector<8x1xf32> to vector<8x32xf32>
    %54 = arith.mulf %49, %53 : vector<8x32xf32>
    %55 = vector.broadcast %35 : vector<1x32xf32> to vector<8x32xf32>
    %56 = arith.mulf %54, %55 : vector<8x32xf32>
    %57 = vector.broadcast %36 : vector<1x32xf32> to vector<8x32xf32>
    %58 = arith.addf %56, %57 : vector<8x32xf32>
    %59 = vector.extract_strided_slice %0 {offsets = [0, 0], sizes = [1, 32], strides = [1, 1]} : vector<4x32xf32> to vector<1x32xf32>
    %60 = vector.extract_strided_slice %1 {offsets = [0, 0], sizes = [1, 32], strides = [1, 1]} : vector<4x32xf32> to vector<1x32xf32>
    %cst_21 = arith.constant dense<0.000000e+00> : vector<8xf32>
    %61 = vector.multi_reduction <add>, %10, %cst_21 [1] : vector<8x32xf32> to vector<8xf32>
    %62 = vector.shape_cast %61 : vector<8xf32> to vector<8x1xf32>
    %cst_22 = arith.constant 3.200000e+01 : f32
    %63 = vector.broadcast %cst_22 : f32 to vector<8x1xf32>
    %64 = arith.divf %62, %63 : vector<8x1xf32>
    %65 = vector.broadcast %64 : vector<8x1xf32> to vector<8x32xf32>
    %66 = arith.subf %10, %65 : vector<8x32xf32>
    %67 = arith.mulf %66, %66 : vector<8x32xf32>
    %cst_23 = arith.constant dense<0.000000e+00> : vector<8xf32>
    %68 = vector.multi_reduction <add>, %67, %cst_23 [1] : vector<8x32xf32> to vector<8xf32>
    %69 = vector.shape_cast %68 : vector<8xf32> to vector<8x1xf32>
    %cst_24 = arith.constant 3.200000e+01 : f32
    %70 = vector.broadcast %cst_24 : f32 to vector<8x1xf32>
    %71 = arith.divf %69, %70 : vector<8x1xf32>
    %72 = vector.broadcast %64 : vector<8x1xf32> to vector<8x32xf32>
    %73 = arith.subf %10, %72 : vector<8x32xf32>
    %cst_25 = arith.constant 9.99999974E-6 : f32
    %74 = vector.broadcast %cst_25 : f32 to vector<8x1xf32>
    %75 = arith.addf %71, %74 : vector<8x1xf32>
    %76 = math.rsqrt %75 : vector<8x1xf32>
    %77 = vector.broadcast %76 : vector<8x1xf32> to vector<8x32xf32>
    %78 = arith.mulf %73, %77 : vector<8x32xf32>
    %79 = vector.broadcast %59 : vector<1x32xf32> to vector<8x32xf32>
    %80 = arith.mulf %78, %79 : vector<8x32xf32>
    %81 = vector.broadcast %60 : vector<1x32xf32> to vector<8x32xf32>
    %82 = arith.addf %80, %81 : vector<8x32xf32>
    %c0_26 = arith.constant 0 : index
    %c0_27 = arith.constant 0 : index
    %c0_28 = arith.constant 0 : index
    %83 = vector.load %arg5[%c0_26, %c0_27, %c0_28] : memref<3x32x32xbf16, #tpu.memory_space<vmem>>, vector<1x32x32xbf16>
    %84 = vector.shape_cast %83 : vector<1x32x32xbf16> to vector<32x32xbf16>
    %85 = arith.truncf %34 : vector<8x32xf32> to vector<8x32xbf16>
    %cst_29 = arith.constant dense<0.000000e+00> : vector<8x32xf32>
    %86 = tpu.matmul %85, %84, %cst_29 {dimension_numbers = #tpu.dot_dimension_numbers<[1], [0], [0], [1], [0, 0, 1, 1], [], []>} : vector<8x32xbf16>, vector<32x32xbf16>, vector<8x32xf32> -> vector<8x32xf32>
    %c0_30 = arith.constant 0 : index
    %c0_31 = arith.constant 0 : index
    %c0_32 = arith.constant 0 : index
    %87 = vector.load %arg6[%c0_30, %c0_31, %c0_32] : memref<3x1x32xf32, #tpu.memory_space<vmem>>, vector<1x1x32xf32>
    %88 = vector.shape_cast %87 : vector<1x1x32xf32> to vector<1x32xf32>
    %89 = vector.broadcast %88 : vector<1x32xf32> to vector<8x32xf32>
    %90 = arith.addf %86, %89 : vector<8x32xf32>
    %c1 = arith.constant 1 : index
    %c0_33 = arith.constant 0 : index
    %c0_34 = arith.constant 0 : index
    %91 = vector.load %arg5[%c1, %c0_33, %c0_34] : memref<3x32x32xbf16, #tpu.memory_space<vmem>>, vector<1x32x32xbf16>
    %92 = vector.shape_cast %91 : vector<1x32x32xbf16> to vector<32x32xbf16>
    %93 = arith.truncf %58 : vector<8x32xf32> to vector<8x32xbf16>
    %cst_35 = arith.constant dense<0.000000e+00> : vector<8x32xf32>
    %94 = tpu.matmul %93, %92, %cst_35 {dimension_numbers = #tpu.dot_dimension_numbers<[1], [0], [0], [1], [0, 0, 1, 1], [], []>} : vector<8x32xbf16>, vector<32x32xbf16>, vector<8x32xf32> -> vector<8x32xf32>
    %c1_36 = arith.constant 1 : index
    %c0_37 = arith.constant 0 : index
    %c0_38 = arith.constant 0 : index
    %95 = vector.load %arg6[%c1_36, %c0_37, %c0_38] : memref<3x1x32xf32, #tpu.memory_space<vmem>>, vector<1x1x32xf32>
    %96 = vector.shape_cast %95 : vector<1x1x32xf32> to vector<1x32xf32>
    %97 = vector.broadcast %96 : vector<1x32xf32> to vector<8x32xf32>
    %98 = arith.addf %94, %97 : vector<8x32xf32>
    %c2 = arith.constant 2 : index
    %c0_39 = arith.constant 0 : index
    %c0_40 = arith.constant 0 : index
    %99 = vector.load %arg5[%c2, %c0_39, %c0_40] : memref<3x32x32xbf16, #tpu.memory_space<vmem>>, vector<1x32x32xbf16>
    %100 = vector.shape_cast %99 : vector<1x32x32xbf16> to vector<32x32xbf16>
    %101 = arith.truncf %82 : vector<8x32xf32> to vector<8x32xbf16>
    %cst_41 = arith.constant dense<0.000000e+00> : vector<8x32xf32>
    %102 = tpu.matmul %101, %100, %cst_41 {dimension_numbers = #tpu.dot_dimension_numbers<[1], [0], [0], [1], [0, 0, 1, 1], [], []>} : vector<8x32xbf16>, vector<32x32xbf16>, vector<8x32xf32> -> vector<8x32xf32>
    %c2_42 = arith.constant 2 : index
    %c0_43 = arith.constant 0 : index
    %c0_44 = arith.constant 0 : index
    %103 = vector.load %arg6[%c2_42, %c0_43, %c0_44] : memref<3x1x32xf32, #tpu.memory_space<vmem>>, vector<1x1x32xf32>
    %104 = vector.shape_cast %103 : vector<1x1x32xf32> to vector<1x32xf32>
    %105 = vector.broadcast %104 : vector<1x32xf32> to vector<8x32xf32>
    %106 = arith.addf %102, %105 : vector<8x32xf32>
    %107 = arith.truncf %98 : vector<8x32xf32> to vector<8x32xbf16>
    %c0_45 = arith.constant 0 : index
    %c0_46 = arith.constant 0 : index
    %108 = vector.load %arg18[%c0_45, %c0_46] : memref<8x32xbf16, #tpu.memory_space<vmem>>, vector<8x32xbf16>
    tpu.vector_store %arg18[%c0_45, %c0_46], %107 {strides = array<i32>} : memref<8x32xbf16, #tpu.memory_space<vmem>>, vector<8x32xbf16>,
    %109 = tpu.iota {dimensions = array<i32: 1>} : vector<1x32xi32>
    %c0_i32 = arith.constant 0 : i32
    %110 = vector.broadcast %c0_i32 : i32 to vector<1x32xi32>
    %111 = arith.cmpi sge, %109, %110 : vector<1x32xi32>
    %c8_i32 = arith.constant 8 : i32
    %112 = vector.broadcast %c8_i32 : i32 to vector<1x32xi32>
    %113 = arith.cmpi slt, %109, %112 : vector<1x32xi32>
    %114 = arith.andi %111, %113 : vector<1x32xi1>
    %115 = arith.extui %114 : vector<1x32xi1> to vector<1x32xi32>
    %116 = arith.sitofp %115 : vector<1x32xi32> to vector<1x32xf32>
    %cst_47 = arith.constant 0.353553385 : f32
    %117 = vector.broadcast %cst_47 : f32 to vector<1x32xf32>
    %118 = arith.mulf %116, %117 : vector<1x32xf32>
    %119 = vector.broadcast %118 : vector<1x32xf32> to vector<8x32xf32>
    %120 = arith.mulf %90, %119 : vector<8x32xf32>
    %121 = arith.truncf %120 : vector<8x32xf32> to vector<8x32xbf16>
    %c0_48 = arith.constant 0 : index
    %c0_49 = arith.constant 0 : index
    %c0_50 = arith.constant 0 : index
    %122 = vector.load %arg19[%c0_48, %c0_49, %c0_50] : memref<4x8x32xbf16, #tpu.memory_space<vmem>>, vector<1x8x32xbf16>
    %123 = vector.shape_cast %122 : vector<1x8x32xbf16> to vector<8x32xbf16>
    %124 = vector.shape_cast %121 : vector<8x32xbf16> to vector<1x8x32xbf16>
    tpu.vector_store %arg19[%c0_48, %c0_49, %c0_50], %124 {strides = array<i32>} : memref<4x8x32xbf16, #tpu.memory_space<vmem>>, vector<1x8x32xbf16>,
    %125 = vector.broadcast %116 : vector<1x32xf32> to vector<8x32xf32>
    %126 = arith.mulf %106, %125 : vector<8x32xf32>
    %127 = arith.truncf %126 : vector<8x32xf32> to vector<8x32xbf16>
    %c0_51 = arith.constant 0 : index
    %c0_52 = arith.constant 0 : index
    %c0_53 = arith.constant 0 : index
    %128 = vector.load %arg20[%c0_51, %c0_52, %c0_53] : memref<4x8x32xbf16, #tpu.memory_space<vmem>>, vector<1x8x32xbf16>
    %129 = vector.shape_cast %128 : vector<1x8x32xbf16> to vector<8x32xbf16>
    %130 = vector.shape_cast %127 : vector<8x32xbf16> to vector<1x8x32xbf16>
    tpu.vector_store %arg20[%c0_51, %c0_52, %c0_53], %130 {strides = array<i32>} : memref<4x8x32xbf16, #tpu.memory_space<vmem>>, vector<1x8x32xbf16>,
    %c8_i32_54 = arith.constant 8 : i32
    %131 = vector.broadcast %c8_i32_54 : i32 to vector<1x32xi32>
    %132 = arith.cmpi sge, %109, %131 : vector<1x32xi32>
    %c16_i32 = arith.constant 16 : i32
    %133 = vector.broadcast %c16_i32 : i32 to vector<1x32xi32>
    %134 = arith.cmpi slt, %109, %133 : vector<1x32xi32>
    %135 = arith.andi %132, %134 : vector<1x32xi1>
    %136 = arith.extui %135 : vector<1x32xi1> to vector<1x32xi32>
    %137 = arith.sitofp %136 : vector<1x32xi32> to vector<1x32xf32>
    %cst_55 = arith.constant 0.353553385 : f32
    %138 = vector.broadcast %cst_55 : f32 to vector<1x32xf32>
    %139 = arith.mulf %137, %138 : vector<1x32xf32>
    %140 = vector.broadcast %139 : vector<1x32xf32> to vector<8x32xf32>
    %141 = arith.mulf %90, %140 : vector<8x32xf32>
    %142 = arith.truncf %141 : vector<8x32xf32> to vector<8x32xbf16>
    %c1_56 = arith.constant 1 : index
    %c0_57 = arith.constant 0 : index
    %c0_58 = arith.constant 0 : index
    %143 = vector.load %arg19[%c1_56, %c0_57, %c0_58] : memref<4x8x32xbf16, #tpu.memory_space<vmem>>, vector<1x8x32xbf16>
    %144 = vector.shape_cast %143 : vector<1x8x32xbf16> to vector<8x32xbf16>
    %145 = vector.shape_cast %142 : vector<8x32xbf16> to vector<1x8x32xbf16>
    tpu.vector_store %arg19[%c1_56, %c0_57, %c0_58], %145 {strides = array<i32>} : memref<4x8x32xbf16, #tpu.memory_space<vmem>>, vector<1x8x32xbf16>,
    %146 = vector.broadcast %137 : vector<1x32xf32> to vector<8x32xf32>
    %147 = arith.mulf %106, %146 : vector<8x32xf32>
    %148 = arith.truncf %147 : vector<8x32xf32> to vector<8x32xbf16>
    %c1_59 = arith.constant 1 : index
    %c0_60 = arith.constant 0 : index
    %c0_61 = arith.constant 0 : index
    %149 = vector.load %arg20[%c1_59, %c0_60, %c0_61] : memref<4x8x32xbf16, #tpu.memory_space<vmem>>, vector<1x8x32xbf16>
    %150 = vector.shape_cast %149 : vector<1x8x32xbf16> to vector<8x32xbf16>
    %151 = vector.shape_cast %148 : vector<8x32xbf16> to vector<1x8x32xbf16>
    tpu.vector_store %arg20[%c1_59, %c0_60, %c0_61], %151 {strides = array<i32>} : memref<4x8x32xbf16, #tpu.memory_space<vmem>>, vector<1x8x32xbf16>,
    %c16_i32_62 = arith.constant 16 : i32
    %152 = vector.broadcast %c16_i32_62 : i32 to vector<1x32xi32>
    %153 = arith.cmpi sge, %109, %152 : vector<1x32xi32>
    %c24_i32 = arith.constant 24 : i32
    %154 = vector.broadcast %c24_i32 : i32 to vector<1x32xi32>
    %155 = arith.cmpi slt, %109, %154 : vector<1x32xi32>
    %156 = arith.andi %153, %155 : vector<1x32xi1>
    %157 = arith.extui %156 : vector<1x32xi1> to vector<1x32xi32>
    %158 = arith.sitofp %157 : vector<1x32xi32> to vector<1x32xf32>
    %cst_63 = arith.constant 0.353553385 : f32
    %159 = vector.broadcast %cst_63 : f32 to vector<1x32xf32>
    %160 = arith.mulf %158, %159 : vector<1x32xf32>
    %161 = vector.broadcast %160 : vector<1x32xf32> to vector<8x32xf32>
    %162 = arith.mulf %90, %161 : vector<8x32xf32>
    %163 = arith.truncf %162 : vector<8x32xf32> to vector<8x32xbf16>
    %c2_64 = arith.constant 2 : index
    %c0_65 = arith.constant 0 : index
    %c0_66 = arith.constant 0 : index
    %164 = vector.load %arg19[%c2_64, %c0_65, %c0_66] : memref<4x8x32xbf16, #tpu.memory_space<vmem>>, vector<1x8x32xbf16>
    %165 = vector.shape_cast %164 : vector<1x8x32xbf16> to vector<8x32xbf16>
    %166 = vector.shape_cast %163 : vector<8x32xbf16> to vector<1x8x32xbf16>
    tpu.vector_store %arg19[%c2_64, %c0_65, %c0_66], %166 {strides = array<i32>} : memref<4x8x32xbf16, #tpu.memory_space<vmem>>, vector<1x8x32xbf16>,
    %167 = vector.broadcast %158 : vector<1x32xf32> to vector<8x32xf32>
    %168 = arith.mulf %106, %167 : vector<8x32xf32>
    %169 = arith.truncf %168 : vector<8x32xf32> to vector<8x32xbf16>
    %c2_67 = arith.constant 2 : index
    %c0_68 = arith.constant 0 : index
    %c0_69 = arith.constant 0 : index
    %170 = vector.load %arg20[%c2_67, %c0_68, %c0_69] : memref<4x8x32xbf16, #tpu.memory_space<vmem>>, vector<1x8x32xbf16>
    %171 = vector.shape_cast %170 : vector<1x8x32xbf16> to vector<8x32xbf16>
    %172 = vector.shape_cast %169 : vector<8x32xbf16> to vector<1x8x32xbf16>
    tpu.vector_store %arg20[%c2_67, %c0_68, %c0_69], %172 {strides = array<i32>} : memref<4x8x32xbf16, #tpu.memory_space<vmem>>, vector<1x8x32xbf16>,
    %c24_i32_70 = arith.constant 24 : i32
    %173 = vector.broadcast %c24_i32_70 : i32 to vector<1x32xi32>
    %174 = arith.cmpi sge, %109, %173 : vector<1x32xi32>
    %c32_i32 = arith.constant 32 : i32
    %175 = vector.broadcast %c32_i32 : i32 to vector<1x32xi32>
    %176 = arith.cmpi slt, %109, %175 : vector<1x32xi32>
    %177 = arith.andi %174, %176 : vector<1x32xi1>
    %178 = arith.extui %177 : vector<1x32xi1> to vector<1x32xi32>
    %179 = arith.sitofp %178 : vector<1x32xi32> to vector<1x32xf32>
    %cst_71 = arith.constant 0.353553385 : f32
    %180 = vector.broadcast %cst_71 : f32 to vector<1x32xf32>
    %181 = arith.mulf %179, %180 : vector<1x32xf32>
    %182 = vector.broadcast %181 : vector<1x32xf32> to vector<8x32xf32>
    %183 = arith.mulf %90, %182 : vector<8x32xf32>
    %184 = arith.truncf %183 : vector<8x32xf32> to vector<8x32xbf16>
    %c3 = arith.constant 3 : index
    %c0_72 = arith.constant 0 : index
    %c0_73 = arith.constant 0 : index
    %185 = vector.load %arg19[%c3, %c0_72, %c0_73] : memref<4x8x32xbf16, #tpu.memory_space<vmem>>, vector<1x8x32xbf16>
    %186 = vector.shape_cast %185 : vector<1x8x32xbf16> to vector<8x32xbf16>
    %187 = vector.shape_cast %184 : vector<8x32xbf16> to vector<1x8x32xbf16>
    tpu.vector_store %arg19[%c3, %c0_72, %c0_73], %187 {strides = array<i32>} : memref<4x8x32xbf16, #tpu.memory_space<vmem>>, vector<1x8x32xbf16>,
    %188 = vector.broadcast %179 : vector<1x32xf32> to vector<8x32xf32>
    %189 = arith.mulf %106, %188 : vector<8x32xf32>
    %190 = arith.truncf %189 : vector<8x32xf32> to vector<8x32xbf16>
    %c3_74 = arith.constant 3 : index
    %c0_75 = arith.constant 0 : index
    %c0_76 = arith.constant 0 : index
    %191 = vector.load %arg20[%c3_74, %c0_75, %c0_76] : memref<4x8x32xbf16, #tpu.memory_space<vmem>>, vector<1x8x32xbf16>
    %192 = vector.shape_cast %191 : vector<1x8x32xbf16> to vector<8x32xbf16>
    %193 = vector.shape_cast %190 : vector<8x32xbf16> to vector<1x8x32xbf16>
    tpu.vector_store %arg20[%c3_74, %c0_75, %c0_76], %193 {strides = array<i32>} : memref<4x8x32xbf16, #tpu.memory_space<vmem>>, vector<1x8x32xbf16>,
    %c0_i32_77 = arith.constant 0 : i32
    %c8_i32_78 = arith.constant 8 : i32
    %194 = arith.muli %c0_i32_77, %c8_i32_78 : i32
    %c8_i32_79 = arith.constant 8 : i32
    %195 = arith.muli %c0_i32_77, %c8_i32_79 : i32
    %196 = tpu.assume_multiple %194, 8 : i32
    %197 = tpu.assume_multiple %195, 8 : i32
    %198 = arith.index_cast %197 : i32 to index
    %c0_80 = arith.constant 0 : index
    %199 = vector.load %arg18[%198, %c0_80] : memref<8x32xbf16, #tpu.memory_space<vmem>>, vector<8x32xbf16>
    %cst_81 = arith.constant 0.000000e+00 : f32
    %200 = vector.broadcast %cst_81 : f32 to vector<8x32xf32>
    %c0_82 = arith.constant 0 : index
    %201 = arith.index_cast %196 : i32 to index
    %c0_83 = arith.constant 0 : index
    %202 = vector.load %arg19[%c0_82, %201, %c0_83] : memref<4x8x32xbf16, #tpu.memory_space<vmem>>, vector<1x8x32xbf16>
    %203 = vector.shape_cast %202 : vector<1x8x32xbf16> to vector<8x32xbf16>
    "tpu.trace_start"() <{level = 10 : i32, message = "qd,kd->qk"}> : () -> ()
    %cst_84 = arith.constant dense<0.000000e+00> : vector<8x8xf32>
    %204 = tpu.matmul %203, %199, %cst_84 {dimension_numbers = #tpu.dot_dimension_numbers<[1], [1], [0], [0], [0, 0, 1, 0], [], []>} : vector<8x32xbf16>, vector<8x32xbf16>, vector<8x8xf32> -> vector<8x8xf32>
    "tpu.trace_stop"() : () -> ()
    %cst_85 = arith.constant dense<0xFF800000> : vector<8xf32>
    %205 = vector.multi_reduction <maximumf>, %204, %cst_85 [1] : vector<8x8xf32> to vector<8xf32>
    %206 = vector.shape_cast %205 : vector<8xf32> to vector<8x1xf32>
    %207 = vector.broadcast %206 : vector<8x1xf32> to vector<8x8xf32>
    %208 = arith.subf %204, %207 : vector<8x8xf32>
    %209 = math.exp %208 : vector<8x8xf32>
    %cst_86 = arith.constant dense<0.000000e+00> : vector<8xf32>
    %210 = vector.multi_reduction <add>, %209, %cst_86 [1] : vector<8x8xf32> to vector<8xf32>
    %211 = vector.shape_cast %210 : vector<8xf32> to vector<8x1xf32>
    %212 = tpu.reciprocal %211 {approx = true} : vector<8x1xf32> -> vector<8x1xf32>
    %213 = vector.broadcast %212 : vector<8x1xf32> to vector<8x8xf32>
    %214 = arith.mulf %209, %213 : vector<8x8xf32>
    %215 = arith.truncf %214 : vector<8x8xf32> to vector<8x8xbf16>
    %c0_87 = arith.constant 0 : index
    %216 = arith.index_cast %197 : i32 to index
    %c0_88 = arith.constant 0 : index
    %217 = vector.load %arg20[%c0_87, %216, %c0_88] : memref<4x8x32xbf16, #tpu.memory_space<vmem>>, vector<1x8x32xbf16>
    %218 = vector.shape_cast %217 : vector<1x8x32xbf16> to vector<8x32xbf16>
    %cst_89 = arith.constant dense<0.000000e+00> : vector<8x32xf32>
    %219 = tpu.matmul %215, %218, %cst_89 {dimension_numbers = #tpu.dot_dimension_numbers<[1], [0], [0], [1], [0, 0, 1, 1], [], []>} : vector<8x8xbf16>, vector<8x32xbf16>, vector<8x32xf32> -> vector<8x32xf32>
    %220 = arith.addf %200, %219 : vector<8x32xf32>
    %c1_90 = arith.constant 1 : index
    %221 = arith.index_cast %196 : i32 to index
    %c0_91 = arith.constant 0 : index
    %222 = vector.load %arg19[%c1_90, %221, %c0_91] : memref<4x8x32xbf16, #tpu.memory_space<vmem>>, vector<1x8x32xbf16>
    %223 = vector.shape_cast %222 : vector<1x8x32xbf16> to vector<8x32xbf16>
    "tpu.trace_start"() <{level = 10 : i32, message = "qd,kd->qk"}> : () -> ()
    %cst_92 = arith.constant dense<0.000000e+00> : vector<8x8xf32>
    %224 = tpu.matmul %223, %199, %cst_92 {dimension_numbers = #tpu.dot_dimension_numbers<[1], [1], [0], [0], [0, 0, 1, 0], [], []>} : vector<8x32xbf16>, vector<8x32xbf16>, vector<8x8xf32> -> vector<8x8xf32>
    "tpu.trace_stop"() : () -> ()
    %cst_93 = arith.constant dense<0xFF800000> : vector<8xf32>
    %225 = vector.multi_reduction <maximumf>, %224, %cst_93 [1] : vector<8x8xf32> to vector<8xf32>
    %226 = vector.shape_cast %225 : vector<8xf32> to vector<8x1xf32>
    %227 = vector.broadcast %226 : vector<8x1xf32> to vector<8x8xf32>
    %228 = arith.subf %224, %227 : vector<8x8xf32>
    %229 = math.exp %228 : vector<8x8xf32>
    %cst_94 = arith.constant dense<0.000000e+00> : vector<8xf32>
    %230 = vector.multi_reduction <add>, %229, %cst_94 [1] : vector<8x8xf32> to vector<8xf32>
    %231 = vector.shape_cast %230 : vector<8xf32> to vector<8x1xf32>
    %232 = tpu.reciprocal %231 {approx = true} : vector<8x1xf32> -> vector<8x1xf32>
    %233 = vector.broadcast %232 : vector<8x1xf32> to vector<8x8xf32>
    %234 = arith.mulf %229, %233 : vector<8x8xf32>
    %235 = arith.truncf %234 : vector<8x8xf32> to vector<8x8xbf16>
    %c1_95 = arith.constant 1 : index
    %236 = arith.index_cast %197 : i32 to index
    %c0_96 = arith.constant 0 : index
    %237 = vector.load %arg20[%c1_95, %236, %c0_96] : memref<4x8x32xbf16, #tpu.memory_space<vmem>>, vector<1x8x32xbf16>
    %238 = vector.shape_cast %237 : vector<1x8x32xbf16> to vector<8x32xbf16>
    %cst_97 = arith.constant dense<0.000000e+00> : vector<8x32xf32>
    %239 = tpu.matmul %235, %238, %cst_97 {dimension_numbers = #tpu.dot_dimension_numbers<[1], [0], [0], [1], [0, 0, 1, 1], [], []>} : vector<8x8xbf16>, vector<8x32xbf16>, vector<8x32xf32> -> vector<8x32xf32>
    %240 = arith.addf %220, %239 : vector<8x32xf32>
    %c2_98 = arith.constant 2 : index
    %241 = arith.index_cast %196 : i32 to index
    %c0_99 = arith.constant 0 : index
    %242 = vector.load %arg19[%c2_98, %241, %c0_99] : memref<4x8x32xbf16, #tpu.memory_space<vmem>>, vector<1x8x32xbf16>
    %243 = vector.shape_cast %242 : vector<1x8x32xbf16> to vector<8x32xbf16>
    "tpu.trace_start"() <{level = 10 : i32, message = "qd,kd->qk"}> : () -> ()
    %cst_100 = arith.constant dense<0.000000e+00> : vector<8x8xf32>
    %244 = tpu.matmul %243, %199, %cst_100 {dimension_numbers = #tpu.dot_dimension_numbers<[1], [1], [0], [0], [0, 0, 1, 0], [], []>} : vector<8x32xbf16>, vector<8x32xbf16>, vector<8x8xf32> -> vector<8x8xf32>
    "tpu.trace_stop"() : () -> ()
    %cst_101 = arith.constant dense<0xFF800000> : vector<8xf32>
    %245 = vector.multi_reduction <maximumf>, %244, %cst_101 [1] : vector<8x8xf32> to vector<8xf32>
    %246 = vector.shape_cast %245 : vector<8xf32> to vector<8x1xf32>
    %247 = vector.broadcast %246 : vector<8x1xf32> to vector<8x8xf32>
    %248 = arith.subf %244, %247 : vector<8x8xf32>
    %249 = math.exp %248 : vector<8x8xf32>
    %cst_102 = arith.constant dense<0.000000e+00> : vector<8xf32>
    %250 = vector.multi_reduction <add>, %249, %cst_102 [1] : vector<8x8xf32> to vector<8xf32>
    %251 = vector.shape_cast %250 : vector<8xf32> to vector<8x1xf32>
    %252 = tpu.reciprocal %251 {approx = true} : vector<8x1xf32> -> vector<8x1xf32>
    %253 = vector.broadcast %252 : vector<8x1xf32> to vector<8x8xf32>
    %254 = arith.mulf %249, %253 : vector<8x8xf32>
    %255 = arith.truncf %254 : vector<8x8xf32> to vector<8x8xbf16>
    %c2_103 = arith.constant 2 : index
    %256 = arith.index_cast %197 : i32 to index
    %c0_104 = arith.constant 0 : index
    %257 = vector.load %arg20[%c2_103, %256, %c0_104] : memref<4x8x32xbf16, #tpu.memory_space<vmem>>, vector<1x8x32xbf16>
    %258 = vector.shape_cast %257 : vector<1x8x32xbf16> to vector<8x32xbf16>
    %cst_105 = arith.constant dense<0.000000e+00> : vector<8x32xf32>
    %259 = tpu.matmul %255, %258, %cst_105 {dimension_numbers = #tpu.dot_dimension_numbers<[1], [0], [0], [1], [0, 0, 1, 1], [], []>} : vector<8x8xbf16>, vector<8x32xbf16>, vector<8x32xf32> -> vector<8x32xf32>
    %260 = arith.addf %240, %259 : vector<8x32xf32>
    %c3_106 = arith.constant 3 : index
    %261 = arith.index_cast %196 : i32 to index
    %c0_107 = arith.constant 0 : index
    %262 = vector.load %arg19[%c3_106, %261, %c0_107] : memref<4x8x32xbf16, #tpu.memory_space<vmem>>, vector<1x8x32xbf16>
    %263 = vector.shape_cast %262 : vector<1x8x32xbf16> to vector<8x32xbf16>
    "tpu.trace_start"() <{level = 10 : i32, message = "qd,kd->qk"}> : () -> ()
    %cst_108 = arith.constant dense<0.000000e+00> : vector<8x8xf32>
    %264 = tpu.matmul %263, %199, %cst_108 {dimension_numbers = #tpu.dot_dimension_numbers<[1], [1], [0], [0], [0, 0, 1, 0], [], []>} : vector<8x32xbf16>, vector<8x32xbf16>, vector<8x8xf32> -> vector<8x8xf32>
    "tpu.trace_stop"() : () -> ()
    %cst_109 = arith.constant dense<0xFF800000> : vector<8xf32>
    %265 = vector.multi_reduction <maximumf>, %264, %cst_109 [1] : vector<8x8xf32> to vector<8xf32>
    %266 = vector.shape_cast %265 : vector<8xf32> to vector<8x1xf32>
    %267 = vector.broadcast %266 : vector<8x1xf32> to vector<8x8xf32>
    %268 = arith.subf %264, %267 : vector<8x8xf32>
    %269 = math.exp %268 : vector<8x8xf32>
    %cst_110 = arith.constant dense<0.000000e+00> : vector<8xf32>
    %270 = vector.multi_reduction <add>, %269, %cst_110 [1] : vector<8x8xf32> to vector<8xf32>
    %271 = vector.shape_cast %270 : vector<8xf32> to vector<8x1xf32>
    %272 = tpu.reciprocal %271 {approx = true} : vector<8x1xf32> -> vector<8x1xf32>
    %273 = vector.broadcast %272 : vector<8x1xf32> to vector<8x8xf32>
    %274 = arith.mulf %269, %273 : vector<8x8xf32>
    %275 = arith.truncf %274 : vector<8x8xf32> to vector<8x8xbf16>
    %c3_111 = arith.constant 3 : index
    %276 = arith.index_cast %197 : i32 to index
    %c0_112 = arith.constant 0 : index
    %277 = vector.load %arg20[%c3_111, %276, %c0_112] : memref<4x8x32xbf16, #tpu.memory_space<vmem>>, vector<1x8x32xbf16>
    %278 = vector.shape_cast %277 : vector<1x8x32xbf16> to vector<8x32xbf16>
    %cst_113 = arith.constant dense<0.000000e+00> : vector<8x32xf32>
    %279 = tpu.matmul %275, %278, %cst_113 {dimension_numbers = #tpu.dot_dimension_numbers<[1], [0], [0], [1], [0, 0, 1, 1], [], []>} : vector<8x8xbf16>, vector<8x32xbf16>, vector<8x32xf32> -> vector<8x32xf32>
    %280 = arith.addf %260, %279 : vector<8x32xf32>
    %281 = arith.truncf %280 : vector<8x32xf32> to vector<8x32xbf16>
    %282 = arith.index_cast %196 : i32 to index
    %c0_114 = arith.constant 0 : index
    %283 = vector.load %arg21[%282, %c0_114] : memref<8x32xbf16, #tpu.memory_space<vmem>>, vector<8x32xbf16>
    tpu.vector_store %arg21[%282, %c0_114], %281 {strides = array<i32>} : memref<8x32xbf16, #tpu.memory_space<vmem>>, vector<8x32xbf16>,
    %c1_i32 = arith.constant 1 : i32
    %c0_115 = arith.constant 0 : index
    %c0_116 = arith.constant 0 : index
    %284 = vector.load %arg21[%c0_115, %c0_116] : memref<8x32xbf16, #tpu.memory_space<vmem>>, vector<8x32xbf16>
    %c0_117 = arith.constant 0 : index
    %c0_118 = arith.constant 0 : index
    %285 = vector.load %arg7[%c0_117, %c0_118] : memref<32x32xbf16, #tpu.memory_space<vmem>>, vector<32x32xbf16>
    %cst_119 = arith.constant dense<0.000000e+00> : vector<8x32xf32>
    %286 = tpu.matmul %284, %285, %cst_119 {dimension_numbers = #tpu.dot_dimension_numbers<[1], [0], [0], [1], [0, 0, 1, 1], [], []>} : vector<8x32xbf16>, vector<32x32xbf16>, vector<8x32xf32> -> vector<8x32xf32>
    %c0_120 = arith.constant 0 : index
    %c0_121 = arith.constant 0 : index
    %287 = vector.load %arg8[%c0_120, %c0_121] : memref<1x32xf32, #tpu.memory_space<vmem>>, vector<1x32xf32>
    %288 = vector.broadcast %287 : vector<1x32xf32> to vector<8x32xf32>
    %289 = arith.addf %286, %288 : vector<8x32xf32>
    %290 = arith.addf %4, %289 : vector<8x32xf32>
    %291 = vector.extract_strided_slice %0 {offsets = [1, 0], sizes = [1, 32], strides = [1, 1]} : vector<4x32xf32> to vector<1x32xf32>
    %292 = vector.extract_strided_slice %1 {offsets = [1, 0], sizes = [1, 32], strides = [1, 1]} : vector<4x32xf32> to vector<1x32xf32>
    %cst_122 = arith.constant dense<0.000000e+00> : vector<8xf32>
    %293 = vector.multi_reduction <add>, %290, %cst_122 [1] : vector<8x32xf32> to vector<8xf32>
    %294 = vector.shape_cast %293 : vector<8xf32> to vector<8x1xf32>
    %cst_123 = arith.constant 3.200000e+01 : f32
    %295 = vector.broadcast %cst_123 : f32 to vector<8x1xf32>
    %296 = arith.divf %294, %295 : vector<8x1xf32>
    %297 = vector.broadcast %296 : vector<8x1xf32> to vector<8x32xf32>
    %298 = arith.subf %290, %297 : vector<8x32xf32>
    %299 = arith.mulf %298, %298 : vector<8x32xf32>
    %cst_124 = arith.constant dense<0.000000e+00> : vector<8xf32>
    %300 = vector.multi_reduction <add>, %299, %cst_124 [1] : vector<8x32xf32> to vector<8xf32>
    %301 = vector.shape_cast %300 : vector<8xf32> to vector<8x1xf32>
    %cst_125 = arith.constant 3.200000e+01 : f32
    %302 = vector.broadcast %cst_125 : f32 to vector<8x1xf32>
    %303 = arith.divf %301, %302 : vector<8x1xf32>
    %304 = vector.broadcast %296 : vector<8x1xf32> to vector<8x32xf32>
    %305 = arith.subf %290, %304 : vector<8x32xf32>
    %cst_126 = arith.constant 9.99999974E-6 : f32
    %306 = vector.broadcast %cst_126 : f32 to vector<8x1xf32>
    %307 = arith.addf %303, %306 : vector<8x1xf32>
    %308 = math.rsqrt %307 : vector<8x1xf32>
    %309 = vector.broadcast %308 : vector<8x1xf32> to vector<8x32xf32>
    %310 = arith.mulf %305, %309 : vector<8x32xf32>
    %311 = vector.broadcast %291 : vector<1x32xf32> to vector<8x32xf32>
    %312 = arith.mulf %310, %311 : vector<8x32xf32>
    %313 = vector.broadcast %292 : vector<1x32xf32> to vector<8x32xf32>
    %314 = arith.addf %312, %313 : vector<8x32xf32>
    %c0_127 = arith.constant 0 : index
    %c0_128 = arith.constant 0 : index
    %315 = vector.load %arg11[%c0_127, %c0_128] : memref<32x128xbf16, #tpu.memory_space<vmem>>, vector<32x128xbf16>
    %316 = arith.truncf %314 : vector<8x32xf32> to vector<8x32xbf16>
    %cst_129 = arith.constant dense<0.000000e+00> : vector<8x128xf32>
    %317 = tpu.matmul %316, %315, %cst_129 {dimension_numbers = #tpu.dot_dimension_numbers<[1], [0], [0], [1], [0, 0, 1, 1], [], []>} : vector<8x32xbf16>, vector<32x128xbf16>, vector<8x128xf32> -> vector<8x128xf32>
    %c0_130 = arith.constant 0 : index
    %c0_131 = arith.constant 0 : index
    %318 = vector.load %arg12[%c0_130, %c0_131] : memref<1x128xf32, #tpu.memory_space<vmem>>, vector<1x128xf32>
    %319 = vector.broadcast %318 : vector<1x128xf32> to vector<8x128xf32>
    %320 = arith.addf %317, %319 : vector<8x128xf32>
    %cst_132 = arith.constant 0.000000e+00 : f32
    %321 = vector.broadcast %cst_132 : f32 to vector<8x128xf32>
    %322 = arith.maximumf %320, %321 : vector<8x128xf32>
    %c0_133 = arith.constant 0 : index
    %c0_134 = arith.constant 0 : index
    %323 = vector.load %arg13[%c0_133, %c0_134] : memref<128x32xbf16, #tpu.memory_space<vmem>>, vector<128x32xbf16>
    %324 = arith.truncf %322 : vector<8x128xf32> to vector<8x128xbf16>
    %cst_135 = arith.constant dense<0.000000e+00> : vector<8x32xf32>
    %325 = tpu.matmul %324, %323, %cst_135 {dimension_numbers = #tpu.dot_dimension_numbers<[1], [0], [0], [1], [0, 0, 1, 1], [], []>} : vector<8x128xbf16>, vector<128x32xbf16>, vector<8x32xf32> -> vector<8x32xf32>
    %c0_136 = arith.constant 0 : index
    %c0_137 = arith.constant 0 : index
    %326 = vector.load %arg14[%c0_136, %c0_137] : memref<1x32xf32, #tpu.memory_space<vmem>>, vector<1x32xf32>
    %327 = vector.broadcast %326 : vector<1x32xf32> to vector<8x32xf32>
    %328 = arith.addf %325, %327 : vector<8x32xf32>
    %329 = arith.addf %290, %328 : vector<8x32xf32>
    %330 = vector.extract_strided_slice %0 {offsets = [2, 0], sizes = [1, 32], strides = [1, 1]} : vector<4x32xf32> to vector<1x32xf32>
    %331 = vector.extract_strided_slice %1 {offsets = [2, 0], sizes = [1, 32], strides = [1, 1]} : vector<4x32xf32> to vector<1x32xf32>
    %cst_138 = arith.constant dense<0.000000e+00> : vector<8xf32>
    %332 = vector.multi_reduction <add>, %329, %cst_138 [1] : vector<8x32xf32> to vector<8xf32>
    %333 = vector.shape_cast %332 : vector<8xf32> to vector<8x1xf32>
    %cst_139 = arith.constant 3.200000e+01 : f32
    %334 = vector.broadcast %cst_139 : f32 to vector<8x1xf32>
    %335 = arith.divf %333, %334 : vector<8x1xf32>
    %336 = vector.broadcast %335 : vector<8x1xf32> to vector<8x32xf32>
    %337 = arith.subf %329, %336 : vector<8x32xf32>
    %338 = arith.mulf %337, %337 : vector<8x32xf32>
    %cst_140 = arith.constant dense<0.000000e+00> : vector<8xf32>
    %339 = vector.multi_reduction <add>, %338, %cst_140 [1] : vector<8x32xf32> to vector<8xf32>
    %340 = vector.shape_cast %339 : vector<8xf32> to vector<8x1xf32>
    %cst_141 = arith.constant 3.200000e+01 : f32
    %341 = vector.broadcast %cst_141 : f32 to vector<8x1xf32>
    %342 = arith.divf %340, %341 : vector<8x1xf32>
    %343 = vector.broadcast %335 : vector<8x1xf32> to vector<8x32xf32>
    %344 = arith.subf %329, %343 : vector<8x32xf32>
    %cst_142 = arith.constant 9.99999974E-6 : f32
    %345 = vector.broadcast %cst_142 : f32 to vector<8x1xf32>
    %346 = arith.addf %342, %345 : vector<8x1xf32>
    %347 = math.rsqrt %346 : vector<8x1xf32>
    %348 = vector.broadcast %347 : vector<8x1xf32> to vector<8x32xf32>
    %349 = arith.mulf %344, %348 : vector<8x32xf32>
    %350 = vector.broadcast %330 : vector<1x32xf32> to vector<8x32xf32>
    %351 = arith.mulf %349, %350 : vector<8x32xf32>
    %352 = vector.broadcast %331 : vector<1x32xf32> to vector<8x32xf32>
    %353 = arith.addf %351, %352 : vector<8x32xf32>
    %c0_143 = arith.constant 0 : index
    %354 = memref.load %arg4[%c0_143] : memref<2xf32, #tpu.memory_space<smem>>
    %c1_144 = arith.constant 1 : index
    %355 = memref.load %arg4[%c1_144] : memref<2xf32, #tpu.memory_space<smem>>
    %356 = vector.broadcast %354 : f32 to vector<8x32xf32>
    %357 = arith.mulf %353, %356 : vector<8x32xf32>
    %358 = arith.addf %357, %2 : vector<8x32xf32>
    %359 = vector.extract_strided_slice %0 {offsets = [3, 0], sizes = [1, 32], strides = [1, 1]} : vector<4x32xf32> to vector<1x32xf32>
    %360 = vector.extract_strided_slice %1 {offsets = [3, 0], sizes = [1, 32], strides = [1, 1]} : vector<4x32xf32> to vector<1x32xf32>
    %cst_145 = arith.constant dense<0.000000e+00> : vector<8xf32>
    %361 = vector.multi_reduction <add>, %358, %cst_145 [1] : vector<8x32xf32> to vector<8xf32>
    %362 = vector.shape_cast %361 : vector<8xf32> to vector<8x1xf32>
    %cst_146 = arith.constant 3.200000e+01 : f32
    %363 = vector.broadcast %cst_146 : f32 to vector<8x1xf32>
    %364 = arith.divf %362, %363 : vector<8x1xf32>
    %365 = vector.broadcast %364 : vector<8x1xf32> to vector<8x32xf32>
    %366 = arith.subf %358, %365 : vector<8x32xf32>
    %367 = arith.mulf %366, %366 : vector<8x32xf32>
    %cst_147 = arith.constant dense<0.000000e+00> : vector<8xf32>
    %368 = vector.multi_reduction <add>, %367, %cst_147 [1] : vector<8x32xf32> to vector<8xf32>
    %369 = vector.shape_cast %368 : vector<8xf32> to vector<8x1xf32>
    %cst_148 = arith.constant 3.200000e+01 : f32
    %370 = vector.broadcast %cst_148 : f32 to vector<8x1xf32>
    %371 = arith.divf %369, %370 : vector<8x1xf32>
    %372 = vector.broadcast %364 : vector<8x1xf32> to vector<8x32xf32>
    %373 = arith.subf %358, %372 : vector<8x32xf32>
    %cst_149 = arith.constant 9.99999974E-6 : f32
    %374 = vector.broadcast %cst_149 : f32 to vector<8x1xf32>
    %375 = arith.addf %371, %374 : vector<8x1xf32>
    %376 = math.rsqrt %375 : vector<8x1xf32>
    %377 = vector.broadcast %376 : vector<8x1xf32> to vector<8x32xf32>
    %378 = arith.mulf %373, %377 : vector<8x32xf32>
    %379 = vector.broadcast %359 : vector<1x32xf32> to vector<8x32xf32>
    %380 = arith.mulf %378, %379 : vector<8x32xf32>
    %381 = vector.broadcast %360 : vector<1x32xf32> to vector<8x32xf32>
    %382 = arith.addf %380, %381 : vector<8x32xf32>
    %c0_150 = arith.constant 0 : index
    %c0_151 = arith.constant 0 : index
    %383 = vector.load %arg15[%c0_150, %c0_151] : memref<32x128xbf16, #tpu.memory_space<vmem>>, vector<32x128xbf16>
    %384 = arith.truncf %382 : vector<8x32xf32> to vector<8x32xbf16>
    %cst_152 = arith.constant dense<0.000000e+00> : vector<8x128xf32>
    %385 = tpu.matmul %384, %383, %cst_152 {dimension_numbers = #tpu.dot_dimension_numbers<[1], [0], [0], [1], [0, 0, 1, 1], [], []>} : vector<8x32xbf16>, vector<32x128xbf16>, vector<8x128xf32> -> vector<8x128xf32>
    %cst_153 = arith.constant 5.000000e-01 : f32
    %386 = vector.broadcast %cst_153 : f32 to vector<8x128xf32>
    %387 = arith.mulf %386, %385 : vector<8x128xf32>
    %cst_154 = arith.constant 0.707106769 : f32
    %388 = vector.broadcast %cst_154 : f32 to vector<8x128xf32>
    %389 = arith.mulf %385, %388 : vector<8x128xf32>
    %cst_155 = arith.constant 0.000000e+00 : f32
    %390 = vector.broadcast %cst_155 : f32 to vector<8x128xf32>
    %391 = arith.cmpf oge, %389, %390 : vector<8x128xf32>
    %cst_156 = arith.constant 1.000000e+00 : f32
    %cst_157 = arith.constant -1.000000e+00 : f32
    %392 = vector.broadcast %cst_156 : f32 to vector<8x128xf32>
    %393 = vector.broadcast %cst_157 : f32 to vector<8x128xf32>
    %394 = arith.select %391, %392, %393 : vector<8x128xi1>, vector<8x128xf32>
    %395 = math.absf %389 : vector<8x128xf32>
    %cst_158 = arith.constant 0.327591091 : f32
    %396 = vector.broadcast %cst_158 : f32 to vector<8x128xf32>
    %397 = arith.mulf %396, %395 : vector<8x128xf32>
    %cst_159 = arith.constant 1.000000e+00 : f32
    %398 = vector.broadcast %cst_159 : f32 to vector<8x128xf32>
    %399 = arith.addf %398, %397 : vector<8x128xf32>
    %cst_160 = arith.constant 1.000000e+00 : f32
    %400 = vector.broadcast %cst_160 : f32 to vector<8x128xf32>
    %401 = arith.divf %400, %399 : vector<8x128xf32>
    %cst_161 = arith.constant 1.06140542 : f32
    %402 = vector.broadcast %cst_161 : f32 to vector<8x128xf32>
    %403 = arith.mulf %402, %401 : vector<8x128xf32>
    %cst_162 = arith.constant -1.45315206 : f32
    %404 = vector.broadcast %cst_162 : f32 to vector<8x128xf32>
    %405 = arith.addf %403, %404 : vector<8x128xf32>
    %406 = arith.mulf %405, %401 : vector<8x128xf32>
    %cst_163 = arith.constant 1.42141378 : f32
    %407 = vector.broadcast %cst_163 : f32 to vector<8x128xf32>
    %408 = arith.addf %406, %407 : vector<8x128xf32>
    %409 = arith.mulf %408, %401 : vector<8x128xf32>
    %cst_164 = arith.constant -0.284496725 : f32
    %410 = vector.broadcast %cst_164 : f32 to vector<8x128xf32>
    %411 = arith.addf %409, %410 : vector<8x128xf32>
    %412 = arith.mulf %411, %401 : vector<8x128xf32>
    %cst_165 = arith.constant 0.254829586 : f32
    %413 = vector.broadcast %cst_165 : f32 to vector<8x128xf32>
    %414 = arith.addf %412, %413 : vector<8x128xf32>
    %415 = arith.mulf %414, %401 : vector<8x128xf32>
    %cst_166 = arith.constant 0.000000e+00 : f32
    %416 = vector.broadcast %cst_166 : f32 to vector<8x128xf32>
    %417 = arith.subf %416, %395 : vector<8x128xf32>
    %418 = arith.mulf %417, %395 : vector<8x128xf32>
    %419 = math.exp %418 : vector<8x128xf32>
    %420 = arith.mulf %415, %419 : vector<8x128xf32>
    %cst_167 = arith.constant 1.000000e+00 : f32
    %421 = vector.broadcast %cst_167 : f32 to vector<8x128xf32>
    %422 = arith.subf %421, %420 : vector<8x128xf32>
    %423 = arith.mulf %394, %422 : vector<8x128xf32>
    %cst_168 = arith.constant 1.000000e+00 : f32
    %424 = vector.broadcast %cst_168 : f32 to vector<8x128xf32>
    %425 = arith.addf %424, %423 : vector<8x128xf32>
    %426 = arith.mulf %387, %425 : vector<8x128xf32>
    %c0_169 = arith.constant 0 : index
    %c0_170 = arith.constant 0 : index
    %427 = vector.load %arg16[%c0_169, %c0_170] : memref<128x32xbf16, #tpu.memory_space<vmem>>, vector<128x32xbf16>
    %428 = arith.truncf %426 : vector<8x128xf32> to vector<8x128xbf16>
    %cst_171 = arith.constant dense<0.000000e+00> : vector<8x32xf32>
    %429 = tpu.matmul %428, %427, %cst_171 {dimension_numbers = #tpu.dot_dimension_numbers<[1], [0], [0], [1], [0, 0, 1, 1], [], []>} : vector<8x128xbf16>, vector<128x32xbf16>, vector<8x32xf32> -> vector<8x32xf32>
    %430 = vector.broadcast %355 : f32 to vector<8x32xf32>
    %431 = arith.mulf %429, %430 : vector<8x32xf32>
    %432 = arith.addf %431, %358 : vector<8x32xf32>
    %c0_172 = arith.constant 0 : index
    %c0_173 = arith.constant 0 : index
    %433 = vector.load %arg17[%c0_172, %c0_173] : memref<8x32xf32, #tpu.memory_space<vmem>>, vector<8x32xf32>
    tpu.vector_store %arg17[%c0_172, %c0_173], %432 {strides = array<i32>} : memref<8x32xf32, #tpu.memory_space<vmem>>, vector<8x32xf32>,
    return
  }
  func.func @transform_0(%arg0: i32) -> (i32, i32) {
    %c0_i32 = arith.constant 0 : i32
    %c0_i32_0 = arith.constant 0 : i32
    return %arg0, %c0_i32 : i32, i32
  }
  func.func @transform_1(%arg0: i32) -> (i32, i32) {
    %c0_i32 = arith.constant 0 : i32
    %c0_i32_0 = arith.constant 0 : i32
    return %arg0, %c0_i32 : i32, i32
  }
  func.func @transform_2(%arg0: i32) -> (i32, i32) {
    %c0_i32 = arith.constant 0 : i32
    %c0_i32_0 = arith.constant 0 : i32
    return %arg0, %c0_i32 : i32, i32
  }
  func.func @transform_3(%arg0: i32) -> i32 {
    %c0_i32 = arith.constant 0 : i32
    %c0_i32_0 = arith.constant 0 : i32
    return %c0_i32 : i32
  }
  func.func @transform_4(%arg0: i32) -> (i32, i32, i32) {
    %c0_i32 = arith.constant 0 : i32
    %c0_i32_0 = arith.constant 0 : i32
    %c0_i32_1 = arith.constant 0 : i32
    %c0_i32_2 = arith.constant 0 : i32
    return %c0_i32, %c0_i32_0, %c0_i32_1 : i32, i32, i32
  }
  func.func @transform_5(%arg0: i32) -> (i32, i32, i32) {
    %c0_i32 = arith.constant 0 : i32
    %c0_i32_0 = arith.constant 0 : i32
    %c0_i32_1 = arith.constant 0 : i32
    %c0_i32_2 = arith.constant 0 : i32
    return %c0_i32, %c0_i32_0, %c0_i32_1 : i32, i32, i32
  }
  func.func @transform_6(%arg0: i32) -> (i32, i32) {
    %c0_i32 = arith.constant 0 : i32
    %c0_i32_0 = arith.constant 0 : i32
    %c0_i32_1 = arith.constant 0 : i32
    return %c0_i32, %c0_i32_0 : i32, i32
  }
  func.func @transform_7(%arg0: i32) -> (i32, i32) {
    %c0_i32 = arith.constant 0 : i32
    %c0_i32_0 = arith.constant 0 : i32
    %c0_i32_1 = arith.constant 0 : i32
    return %c0_i32, %c0_i32_0 : i32, i32
  }
  func.func @transform_8(%arg0: i32) -> (i32, i32) {
    %c0_i32 = arith.constant 0 : i32
    %c0_i32_0 = arith.constant 0 : i32
    %c0_i32_1 = arith.constant 0 : i32
    return %c0_i32, %c0_i32_0 : i32, i32
  }
  func.func @transform_9(%arg0: i32) -> (i32, i32) {
    %c0_i32 = arith.constant 0 : i32
    %c0_i32_0 = arith.constant 0 : i32
    %c0_i32_1 = arith.constant 0 : i32
    return %c0_i32, %c0_i32_0 : i32, i32
  }
  func.func @transform_10(%arg0: i32) -> (i32, i32) {
    %c0_i32 = arith.constant 0 : i32
    %c0_i32_0 = arith.constant 0 : i32
    %c0_i32_1 = arith.constant 0 : i32
    return %c0_i32, %c0_i32_0 : i32, i32
  }
  func.func @transform_11(%arg0: i32) -> (i32, i32) {
    %c0_i32 = arith.constant 0 : i32
    %c0_i32_0 = arith.constant 0 : i32
    %c0_i32_1 = arith.constant 0 : i32
    return %c0_i32, %c0_i32_0 : i32, i32
  }
  func.func @transform_12(%arg0: i32) -> (i32, i32) {
    %c0_i32 = arith.constant 0 : i32
    %c0_i32_0 = arith.constant 0 : i32
    %c0_i32_1 = arith.constant 0 : i32
    return %c0_i32, %c0_i32_0 : i32, i32
  }
  func.func @transform_13(%arg0: i32) -> (i32, i32) {
    %c0_i32 = arith.constant 0 : i32
    %c0_i32_0 = arith.constant 0 : i32
    %c0_i32_1 = arith.constant 0 : i32
    return %c0_i32, %c0_i32_0 : i32, i32
  }
  func.func @transform_14(%arg0: i32) -> (i32, i32) {
    %c0_i32 = arith.constant 0 : i32
    %c0_i32_0 = arith.constant 0 : i32
    %c0_i32_1 = arith.constant 0 : i32
    return %c0_i32, %c0_i32_0 : i32, i32
  }
  func.func @transform_15(%arg0: i32) -> (i32, i32) {
    %c0_i32 = arith.constant 0 : i32
    %c0_i32_0 = arith.constant 0 : i32
    %c0_i32_1 = arith.constant 0 : i32
    return %c0_i32, %c0_i32_0 : i32, i32
  }
  func.func @transform_16(%arg0: i32) -> (i32, i32) {
    %c0_i32 = arith.constant 0 : i32
    %c0_i32_0 = arith.constant 0 : i32
    return %arg0, %c0_i32 : i32, i32
  }
}

</mosaic_0001>

<bundles_post_ra>
// kernel: gated_cross_attention_block.1
= control target key start
LH: loop header
LB: loop body
LE: loop exit
PB: predicated region body
PF: predicated region fallthrough
CT: control target
= control target key end

     0   :  { %s2918_s0 = inlined_call_operand.vmem [shape: f32[16,32], index: 0, kind: input, shape index: {}]   ;;  %s2919_s1 = inlined_call_operand.vmem [shape: f32[16,32], index: 1, kind: input, shape index: {}]   ;;  %s2920_s2 = inlined_call_operand.vmem [shape: f32[16,32], index: 2, kind: input, shape index: {}]   ;;  %s2921_s3 = inlined_call_operand.vmem [shape: f32[2], index: 3, kind: input, shape index: {}]   ;;  %s2922_s4 = inlined_call_operand.vmem [shape: bf16[3,32,32], index: 4, kind: input, shape index: {}]   ;;  %s2923_s5 = inlined_call_operand.vmem [shape: f32[3,1,32], index: 5, kind: input, shape index: {}]   ;;  %s2924_s6 = inlined_call_operand.vmem [shape: bf16[32,32], index: 6, kind: input, shape index: {}]   ;;  %s2925_s7 = inlined_call_operand.vmem [shape: f32[1,32], index: 7, kind: input, shape index: {}]   ;;  %s2926_s8 = inlined_call_operand.vmem [shape: f32[4,32], index: 8, kind: input, shape index: {}]   ;;  %s2927_s9 = inlined_call_operand.vmem [shape: f32[4,32], index: 9, kind: input, shape index: {}]   ;;  %s2928_s10 = inlined_call_operand.vmem [shape: bf16[32,128], index: 10, kind: input, shape index: {}]   ;;  %s2929_s11 = inlined_call_operand.vmem [shape: f32[1,128], index: 11, kind: input, shape index: {}]   ;;  %s2930_s12 = inlined_call_operand.vmem [shape: bf16[128,32], index: 12, kind: input, shape index: {}]   ;;  %s2931_s13 = inlined_call_operand.vmem [shape: f32[1,32], index: 13, kind: input, shape index: {}]   ;;  %s2932_s14 = inlined_call_operand.vmem [shape: bf16[32,128], index: 14, kind: input, shape index: {}]   ;;  %s2933_s15 = inlined_call_operand.vmem [shape: bf16[128,32], index: 15, kind: input, shape index: {}]   ;;  %s2934_s16 = inlined_call_operand.hbm [shape: f32[16,32], index: 16, kind: output, shape index: {}]  }
   0x1   :  { %2940 = sst [smem:[#allocation17_spill]] %s2918_s0 }
   0x2   :  { %2941 = sst [smem:[#allocation18_spill]] %s2921_s3 }
   0x3   :  { %21 = vsyncpa [#allocation8], 0 }
   0x4   :  { %22 = vsyncpa [#allocation7], 0 }
   0x5   :  { %24 = vsyncpa [#allocation7 + $0x1], 0  ;;  %s2527_s21 = smov 0   ;;  %s2529_s22 = smov 0  }
   0x6   :  { %s2531_s23 = smov 0   ;;  %s2533_s24 = smov 0  }
   0x7 LB: > { %2942 = sst [smem:[#allocation12_spill]] %s2423_s21  ;;  %s2548_s25 = sadd.s32 4294967295, %s2435_s24   ;;  %s2435_s24 = sphi %s2533_s24, %s2954_s24   ;;  %s2431_s23 = sphi %s2531_s23, %s2959_s23   ;;  %s2427_s22 = sphi %s2529_s22, %s2958_s22   ;;  %s2423_s21 = sphi %s2527_s21, %s2957_s21  }
   0x8   : > { %2943 = sst [smem:[#allocation13_spill]] %s2431_s23  ;;  %s1964_s26 = sadd.s32 4294967294, %s2435_s24  }
   0x9   : > { %s2552_s27 = sadd.s32 1, %s2435_s24   ;;  %s388_s28 = sadd.s32 1, %s2431_s23 }
   0xa   : > { %2944 = sst [smem:[#allocation14_spill]] %s2552_s27  ;;  %s385_s29 = ssub.s32 %s2435_s24, %s2552_s27 }
   0xb   : > { %p398_p0 = scmp.ne.s32.totalorder %s2431_s23, %s2427_s22  ;;  %p386_p1 = scmp.eq.s32.totalorder %s385_s29, 0 }
   0xc   : > { %p399_p2 = scmp.eq.s32.totalorder %s2548_s25, 1  ;;  %p404_p3 = scmp.ne.s32.totalorder %s2427_s22, %s2423_s21 }
   0xd   : > { %p405_p4 = scmp.eq.s32.totalorder %s1964_s26, 1  ;;  %p1965_p7 = scmp.ge.s32.totalorder %s2435_s24, 1 }
   0xe   : > { %s2563_s30 = scalar_select %p386_p1, %s2431_s23, %s388_s28  }
   0xf   : > { %p2565_p5 = por %p399_p2, %p398_p0  ;;  %p2569_p6 = por %p405_p4, %p404_p3 }
  0x10   : > { %2945 = sst [smem:[#allocation15_spill]] %s2563_s30  ;;  %p412_p8 = scmp.lt.s32.totalorder %s2435_s24, 3 }
  0x11   : > { %s2947_s17 = scalar_select %p2569_p6, 1, 0 }
  0x12   : > { %p2255_p9 = scmp.eq.s32.totalorder %s2548_s25, 0  ;;  %p2576_p10 = pnand %p1965_p7, %p412_p8 }
  0x13   : > { %2948 = sst [smem:[#allocation16_spill]] %s2947_s17  ;;  %s2950_s3 = sld [smem:[#allocation18_spill]] }
  0x14   : > { %p2247_p11 = pneg %p2576_p10 }
  0x16   : > { %p2248_p12 = pnand %p2255_p9, %p2247_p11 }
  0x18   : > { %p2356_p0 = pneg %p2248_p12 }
  0x19   : > { %s425_s26 = sshll.u32 %s2950_s3, 4  ;;  %s426_s26 = int_to_ptr.vmem [resolvable:$true] %s425_s26 }
  0x1a   : > { %s2354_s28 = scalar_lea.vmem %s426_s26, 16  ;;  %p2362_p3 = scmp.lt.s32.totalorder %s426_s26, %s426_s26 }
  0x1b   : > { %p2355_p13 = scmp.ne.s32.totalorder %s426_s26, %s2354_s28  ;;  %p2363_p4 = scmp.lt.s32.totalorder %s2354_s28, %s2354_s28 }
  0x1d   : > { %p2357_p1 = pnand %p2356_p0, %p2355_p13  ;;  %p2364_p7 = por %p2363_p4, %p2362_p3 }
  0x1f   : > { %p2358_p2 = pneg %p2357_p1 }
  0x21   : > { %p2365_p8 = pnand %p2364_p7, %p2358_p2 }
  0x23   : > { %2368 = shalt.err (!%p2365_p8)
}
  0x24   : > { %s2437_s29 = smov [#allocation6]   ;;  %495 = sbr.rel (%p2576_p10) target bundleno = 3485 (0xd9d), region = 84 }
  0x25   : > { %2250 = dma.vmem_to_smem (!%p2248_p12), %s426_s26, 16, %s2437_s29, [#allocation8]  }
  0x2b   : > { %2414 = dma.done.wait (%p2255_p9), [#allocation8], 16  }
  0x2c   : > { %2416 = vsyncadd (%p2255_p9), [#allocation8], 4294967280 }
  0x2d   : > { %501 = sfence }
  0x2e   : > { %p553_p11 = scmp.lt.s32.totalorder %s2548_s25, 1  ;;  %s2951_s30 = sld [smem:[#allocation17_spill]]  ;;  %vm574_vm0 = vcmask 261120   ;;  %v2294_v24 = vld [vmem:[%s2922_s4] sm:$0xff]   ;;  %v2438_v25 = vmov 0.0   ;;  %v2295_v26 = vld [vmem:[%s2922_s4 + $0x8] sm:$0xff]   ;;  %v589_v31 = vlaneseq }
  0x2f   : > { %2093 = vmatprep.subr.bf16.mxu1 %v2438_v25  ;;  %2109 = vmatprep.subr.bf16.mxu0 %v2438_v25  ;;  %vm2439_vm1 = vmmov 0   ;;  %v2298_v27 = vld [vmem:[%s2922_s4 + $0x20] sm:$0xff]   ;;  %v2299_v28 = vld [vmem:[%s2922_s4 + $0x28] sm:$0xff]   ;;  %v2296_v51 = vld [vmem:[%s2922_s4 + $0x10] sm:$0xff]   ;;  %vm835_vm12 = vcmask 257024   ;;  %vm1020_vm13 = vcmask 1043456  }
  0x30   : > { %s554_s19 = scalar_select %p553_p11, %s2548_s25, 1  ;;  %2094 = vmatpush3.bf16.msra.mxu1 %v2294_v24  ;;  %2097 = vmatprep.mubr.msk.bf16.mxu1 %vm2439_vm1, %v2438_v25  ;;  %v2639_v35 = vshrl.u32 %v589_v31, 7  ;;  %v2645_v40 = vld [vmem:[%s2926_s8] sm:$0xf]  ;;  %v2297_v56 = vld [vmem:[%s2922_s4 + $0x18] sm:$0xff]   ;;  %v838_v62 = vand.u32 127, %v589_v31 }
  0x31   : > { %2095 = vmatprep.subr.bf16.mxu1 %v2438_v25  ;;  %2113 = vmatprep.mubr.msk.bf16.mxu0 %vm2439_vm1, %v2438_v25  ;;  %v2650_v42 = vld [vmem:[%s2927_s9] sm:$0xf]  ;;  %vm941_vm14 = vcmask 64512  }
  0x32   : > { %s1971_s20 = sshll.u32 %s554_s19, 3  ;;  %2110 = vmatpush3.bf16.msra.mxu0 %v2298_v27  ;;  %v591_v39 = vsub.s32 0, %v2639_v35  ;;  %vm851_vm2 = vcmp.ge.s32.totalorder %v838_v62, 8  ;;  %vm852_vm3 = vcmp.lt.s32.totalorder %v838_v62, 16  ;;  %vm865_vm4 = vcmp.ge.s32.totalorder %v838_v62, 16 }
  0x33   : > { %s560_s18 = scalar_lea.vmem %s2919_s1, %s1971_s20  ;;  %s564_s21 = scalar_lea.vmem %s2920_s2, %s1971_s20  ;;  %2111 = vmatprep.subr.bf16.mxu0 %v2438_v25  ;;  %vm866_vm5 = vcmp.lt.s32.totalorder %v838_v62, 24  ;;  %vm879_vm6 = vcmp.ge.s32.totalorder %v838_v62, 24  ;;  %vm880_vm7 = vcmp.lt.s32.totalorder %v838_v62, 32  ;;  %vm853_vm8 = vmand %vm851_vm2, %vm852_vm3  ;;  %vm840_vm9 = vcmp.lt.s32.totalorder %v838_v62, 8  ;;  %v1992_v24 = vld [vmem:[%s2923_s5 + $0x2] ss:$0 sm:$0xff] }
  0x34   : > { %s556_s23 = scalar_lea.vmem %s2951_s30, %s1971_s20  ;;  %v570_v1 = vld [vmem:[%s560_s18] sm:$0xff]  ;;  %2096 = vmatpush3.bf16.msra.mxu1 %v2295_v26  ;;  %v592_v43 = vrot.slane %v2645_v40, %v591_v39  ;;  %v597_v46 = vrot.slane %v2650_v42, %v591_v39  ;;  %vm867_vm10 = vmand %vm865_vm4, %vm866_vm5  ;;  %v1996_v63 = vsel %vm840_vm9, 1.0, %v2438_v25  ;;  %s1625_s30 = sld [smem:[#allocation6]] }
  0x35   : > { %v2601_v0 = vld [vmem:[%s556_s23] sm:$0xff]  ;;  %v571_v3 = vmul.f32 5.656854, %v570_v1  ;;  %2101 = vmatprep.subr.bf16.mxu1 %v2438_v25  ;;  %vm881_vm11 = vmand %vm879_vm6, %vm880_vm7  ;;  %v1997_v1 = vsel %vm853_vm8, 1.0, %v2438_v25  ;;  %s550_s23 = sand.u32 1, %s2427_s22   ;;  %s2441_s18 = smov [#allocation9]  }
  0x36   : > { %v2607_v2 = vmul.f32 5.656854, %v2601_v0  ;;  %v572_v4 = vld [vmem:[%s564_s21] sm:$0xff]  ;;  %2112 = vmatpush3.bf16.msra.mxu0 %v2299_v28  ;;  %s2025_s21 = sld [smem:[#allocation6 + $0x1]]  ;;  %s1970_s27 = sshll.u32 %s550_s23, 3 }
  0x37   : > { %v573_v5 = vmul.f32 5.656854, %v572_v4  ;;  %v599_v7 = vsel %vm574_vm0, %v571_v3, 0.0  ;;  %2123 = vmatprep.subr.bf16.mxu0 %v2438_v25  ;;  %v1999_v4 = vsel %vm881_vm11, 1.0, %v2438_v25  ;;  %s552_s17 = scalar_lea.vmem [#allocation9], %s1970_s27  ;;  %s2373_s3 = sshll.u32 %s2441_s18, 4  ;;  %s2374_s3 = int_to_ptr.vmem [resolvable:$false] %s2373_s3 }
  0x38   : > { %v575_v6 = vsel %vm574_vm0, %v2607_v2, 0.0  ;;  %s1863_s19 = sshll.u32 %s552_s17, 4  ;;  %s2877_s19 = int_to_ptr.vmem [resolvable:$true] %s1863_s19 }
  0x39   : > { %576 = vadd.xlane.f32.xlu0 %v575_v6  ;;  %v614_v8 = vsel %vm574_vm0, %v573_v5, 0.0  ;;  %v844_v6 = vmul.f32 0.35355338, %v1996_v63  ;;  %s2369_s29 = scalar_lea.vmem %s2877_s19, 128  ;;  %p2376_p13 = scmp.lt.s32.totalorder %s2877_s19, %s2374_s3 }
  0x3a   : > { %p2370_p9 = scmp.ne.s32.totalorder %s2877_s19, %s2369_s29 }
  0x3c   : > { %p2371_p10 = pnand %p2370_p9, %p2565_p5 }
  0x3d   : > { %600 = vadd.xlane.f32.xlu0 %v599_v7  ;;  %v856_v7 = vmul.f32 0.35355338, %v1997_v1 }
  0x3e   : > { %p2372_p12 = pneg %p2371_p10 }
  0x41   : > { %615 = vadd.xlane.f32.xlu0 %v614_v8 }
  0xc6   : > { %v577_v9 = vpop.xlane.xlu0 %576 }
  0xc7   : > { %v579_v10 = vmul.f32 0.03125, %v577_v9  ;;  %v884_v9 = vmul.f32 0.35355338, %v1999_v4 }
  0xc9   : > { %v580_v11 = vsub.f32 %v2607_v2, %v579_v10 }
  0xca   : > { %v601_v12 = vpop.xlane.xlu0 %600 }
  0xcb   : > { %v602_v13 = vmul.f32 0.03125, %v601_v12  ;;  %v581_v14 = vmul.f32 %v580_v11, %v580_v11 }
  0xcd   : > { %v603_v15 = vsub.f32 %v571_v3, %v602_v13  ;;  %v582_v16 = vsel %vm574_vm0, %v581_v14, 0.0  ;;  %v1998_v3 = vsel %vm867_vm10, 1.0, %v2438_v25 }
  0xce   : > { %583 = vadd.xlane.f32.xlu1 %v582_v16  ;;  %v616_v17 = vpop.xlane.xlu0 %615  ;;  %v870_v8 = vmul.f32 0.35355338, %v1998_v3 }
  0xcf   : > { %v604_v18 = vmul.f32 %v603_v15, %v603_v15  ;;  %v617_v19 = vmul.f32 0.03125, %v616_v17 }
  0xd1   : > { %v605_v20 = vsel %vm574_vm0, %v604_v18, 0.0  ;;  %v618_v21 = vsub.f32 %v573_v5, %v617_v19  ;;  %v1974_v5 = vld [vmem:[%s2923_s5] ss:$0 sm:$0xff] }
  0xd2   : > { %606 = vadd.xlane.f32.xlu1 %v605_v20 }
  0xd3   : > { %v619_v22 = vmul.f32 %v618_v21, %v618_v21 }
  0xd5   : > { %v620_v23 = vsel %vm574_vm0, %v619_v22, 0.0 }
  0xd6   : > { %621 = vadd.xlane.f32.xlu1 %v620_v23  ;;  %v1983_v23 = vld [vmem:[%s2923_s5 + $0x1] ss:$0 sm:$0xff] }
 0x15b   : > { %v584_v29 = vpop.xlane.xlu1 %583 }
 0x15c   : > { %v585_v30 = vmul.f32 0.03125, %v584_v29 }
 0x15e   : > { %v586_v32 = vadd.f32 1e-05, %v585_v30 }
 0x15f   : > { %v607_v33 = vpop.xlane.xlu1 %606 }
 0x160   : > { %2322 = vrsqrt.f32 %v586_v32  ;;  %v608_v34 = vmul.f32 0.03125, %v607_v33 }
 0x162   : > { %v609_v36 = vadd.f32 1e-05, %v608_v34 }
 0x163   : > { %v622_v37 = vpop.xlane.xlu1 %621 }
 0x164   : > { %2324 = vrsqrt.f32 %v609_v36  ;;  %v623_v38 = vmul.f32 0.03125, %v622_v37 }
 0x166   : > { %v624_v41 = vadd.f32 1e-05, %v623_v38 }
 0x168   : > { %2326 = vrsqrt.f32 %v624_v41 }
 0x16a   : > { %v2323_v44 = vpop.eup %2322 }
 0x16b   : > { %v588_v45 = vmul.f32 %v2323_v44, %v580_v11 }
 0x16d   : > { %v593_v47 = vmul.f32 %v592_v43, %v588_v45 }
 0x16e   : > { %v2325_v48 = vpop.eup %2324 }
 0x16f   : > { %v611_v49 = vmul.f32 %v2325_v48, %v603_v15  ;;  %v598_v50 = vadd.f32 %v597_v46, %v593_v47 }
 0x171   : > { %v633_v52 = vpack.c.bf16 %v598_v50, %v598_v50  ;;  %v612_v53 = vmul.f32 %v611_v49, %v592_v43 }
 0x172   : > { %v2327_v54 = vpop.eup %2326 }
 0x173   : > { %2098 = vmatmul.mubr.msk.bf16.vlgmr.msra.gmra.mrb[0].mxu1 %vm574_vm0, %v633_v52  ;;  %v626_v55 = vmul.f32 %v2327_v54, %v618_v21  ;;  %v613_v57 = vadd.f32 %v612_v53, %v597_v46 }
 0x174   : > { %2102 = vmatpush3.bf16.msra.mxu1 %v2296_v51  ;;  %2105 = vmatprep.mubr.msk.bf16.mxu1 %vm2439_vm1, %v2438_v25 }
 0x175   : > { %2103 = vmatprep.subr.bf16.mxu1 %v2438_v25  ;;  %v627_v58 = vmul.f32 %v626_v55, %v592_v43  ;;  %v701_v60 = vpack.c.bf16 %v613_v57, %v613_v57 }
 0x177   : > { %v628_v59 = vadd.f32 %v627_v58, %v597_v46 }
 0x178   : > { %2104 = vmatpush3.bf16.msra.mxu1 %v2297_v56 }
 0x179   : > { %v770_v61 = vpack.c.bf16 %v628_v59, %v628_v59  ;;  %2117 = vmatprep.subr.bf16.mxu1 %v2438_v25 }
 0x17b   : > { %2106 = vmatmul.mubr.msk.bf16.vlgmr.msra.gmra.mrb[4].mxu1 %vm574_vm0, %v701_v60  ;;  %2114 = vmatmul.mubr.msk.bf16.vlgmr.msra.gmra.mrb[0].mxu0 %vm574_vm0, %v770_v61 }
 0x17c   : > { %2119 = vmatprep.mubr.msk.bf16.mxu1 %vm2439_vm1, %v2438_v25  ;;  %2125 = vmatprep.mubr.msk.bf16.mxu0 %vm2439_vm1, %v2438_v25 }
 0x246   : > { %v690_v10 = vpop.f32.mrb[0].mxu1 }
 0x247   : > { %v691_v11 = vadd.f32 %v1974_v5, %v690_v10  ;;  %v2099_v12 = vpop.f32.mrb[1].mxu1 }
 0x248   : > { %v693_v13 = vpop.f32.mrb[2].mxu1 }
 0x249   : > { %v845_v14 = vmul.f32 %v844_v6, %v691_v11  ;;  %v857_v15 = vmul.f32 %v856_v7, %v691_v11  ;;  %v871_v16 = vmul.f32 %v870_v8, %v691_v11  ;;  %v885_v17 = vmul.f32 %v884_v9, %v691_v11  ;;  %v2100_v18 = vpop.f32.mrb[3].mxu1 }
 0x24b   : > { %v846_v19 = vpack.c.bf16 %v845_v14, %v845_v14  ;;  %v858_v20 = vpack.c.bf16 %v857_v15, %v857_v15  ;;  %v872_v21 = vpack.c.bf16 %v871_v16, %v871_v16  ;;  %v886_v22 = vpack.c.bf16 %v885_v17, %v885_v17 }
 0x24d   : > { %847 = vst.msk [vmem:[#allocation3] sm:$0xf] %vm835_vm12, %v846_v19  ;;  %860 = vst.msk [vmem:[#allocation3 + $0x4] sm:$0xf] %vm835_vm12, %v858_v20 }
 0x24e   : > { %874 = vst.msk [vmem:[#allocation3 + $0x8] sm:$0xf] %vm835_vm12, %v872_v21  ;;  %888 = vst.msk [vmem:[#allocation3 + $0xc] sm:$0xf] %vm835_vm12, %v886_v22  ;;  %v759_v26 = vpop.f32.mrb[4].mxu1  ;;  %v828_v27 = vpop.f32.mrb[0].mxu0 }
 0x24f   : > { %v760_v28 = vadd.f32 %v1983_v23, %v759_v26  ;;  %v2107_v29 = vpop.f32.mrb[5].mxu1  ;;  %v829_v30 = vadd.f32 %v1992_v24, %v828_v27  ;;  %v2115_v31 = vpop.f32.mrb[1].mxu0 }
 0x250   : > { %v762_v32 = vpop.f32.mrb[6].mxu1  ;;  %v831_v33 = vpop.f32.mrb[2].mxu0 }
 0x251   : > { %v834_v34 = vpack.c.bf16 %v760_v28, %v760_v28  ;;  %v2108_v36 = vpop.f32.mrb[7].mxu1  ;;  %v848_v37 = vmul.f32 %v1996_v63, %v829_v30  ;;  %v861_v38 = vmul.f32 %v1997_v1, %v829_v30  ;;  %v875_v39 = vmul.f32 %v1998_v3, %v829_v30  ;;  %v2116_v41 = vpop.f32.mrb[3].mxu0 }
 0x252   : > { %v889_v43 = vmul.f32 %v1999_v4, %v829_v30 }
 0x253   : > { %836 = vst.msk [vmem:[#allocation2] sm:$0xf] %vm835_vm12, %v834_v34  ;;  %v849_v44 = vpack.c.bf16 %v848_v37, %v848_v37  ;;  %v862_v45 = vpack.c.bf16 %v861_v38, %v861_v38  ;;  %v876_v46 = vpack.c.bf16 %v875_v39, %v875_v39 }
 0x254   : > { %v890_v47 = vpack.c.bf16 %v889_v43, %v889_v43  ;;  %v894_v51 = vld [vmem:[#allocation3] sm:$0xf]  ;;  %v958_v52 = vld [vmem:[#allocation3 + $0x4] sm:$0xf] }
 0x255   : > { %850 = vst.msk [vmem:[#allocation4] sm:$0xf] %vm835_vm12, %v849_v44  ;;  %864 = vst.msk [vmem:[#allocation4 + $0x4] sm:$0xf] %vm835_vm12, %v862_v45  ;;  %v1113_v54 = vld [vmem:[#allocation3 + $0x8] sm:$0xf] }
 0x256   : > { %878 = vst.msk [vmem:[#allocation4 + $0x8] sm:$0xf] %vm835_vm12, %v876_v46  ;;  %892 = vst.msk [vmem:[#allocation4 + $0xc] sm:$0xf] %vm835_vm12, %v890_v47  ;;  %v1222_v55 = vld [vmem:[#allocation3 + $0xc] sm:$0xf] }
 0x25a   : > { %v893_v48 = vld [vmem:[#allocation2] sm:$0xf] }
 0x25b   : > { %v899_v49 = vsel %vm574_vm0, %v893_v48, 0 }
 0x25c   : > { %2118 = vmatpush3.bf16.xpose.msra.mxu1 %v899_v49  ;;  %2124 = vmatpush3.bf16.xpose.msra.mxu0 %v899_v49  ;;  %v1016_v50 = vld [vmem:[#allocation4 + $0x4] sm:$0xf]  ;;  %v954_v41 = vld [vmem:[#allocation4] sm:$0xf] }
 0x25d   : > { %2141 = vmatprep.subr.bf16.mxu0 %v2438_v25  ;;  %2129 = vmatprep.subr.bf16.mxu1 %v2438_v25  ;;  %v1022_v53 = vsel %vm1020_vm13, %v1016_v50, 0  ;;  %v1068_v44 = vsel %vm1020_vm13, %v954_v41, 0  ;;  %v1171_v48 = vld [vmem:[#allocation4 + $0x8] sm:$0xf] }
 0x25e   : > { %v1176_v50 = vsel %vm1020_vm13, %v1171_v48, 0  ;;  %v2311_v41 = vld [vmem:[%s2930_s12 + $0x38] sm:$0xff]  }
 0x263   : > { %2120 = vmatmul.mubr.msk.bf16.vlgmr.msra.gmra.mrb[8].mxu1 %vm574_vm0, %v894_v51  ;;  %2126 = vmatmul.mubr.msk.bf16.vlgmr.msra.gmra.mrb[4].mxu0 %vm574_vm0, %v958_v52 }
 0x264   : > { %2142 = vmatpush3.bf16.xpose.msra.mxu0 %v899_v49  ;;  %2143 = vmatprep.mubr.msk.bf16.mxu0 %vm2439_vm1, %v2438_v25 }
 0x265   : > { %2153 = vmatprep.subr.bf16.mxu0 %v2438_v25  ;;  %2130 = vmatpush3.bf16.msra.mxu1 %v1022_v53 }
 0x266   : > { %2131 = vmatprep.mubr.msk.bf16.mxu1 %vm2439_vm1, %v2438_v25  ;;  %2135 = vmatprep.subr.bf16.mxu1 %v2438_v25 }
 0x26b   : > { %2144 = vmatmul.mubr.msk.bf16.vlgmr.msra.gmra.mrb[8].mxu0 %vm574_vm0, %v1113_v54  ;;  %v1280_v54 = vld [vmem:[#allocation4 + $0xc] sm:$0xf] }
 0x26c   : > { %2154 = vmatpush3.bf16.xpose.msra.mxu0 %v899_v49  ;;  %2155 = vmatprep.mubr.msk.bf16.mxu0 %vm2439_vm1, %v2438_v25 }
 0x26d   : > { %2165 = vmatprep.subr.bf16.mxu0 %v2438_v25 }
 0x273   : > { %2156 = vmatmul.mubr.msk.bf16.vlgmr.msra.gmra.mrb[12].mxu0 %vm574_vm0, %v1222_v55 }
 0x274   : > { %2169 = vmatprep.mubr.msk.bf16.mxu0 %vm2439_vm1, %v2438_v25 }
 0x336   : > { %v935_v56 = vpop.f32.mrb[8].mxu1  ;;  %v996_v57 = vpop.f32.mrb[4].mxu0 }
 0x337   : > { %v2121_v58 = vpop.f32.mrb[9].mxu1  ;;  %v2127_v59 = vpop.f32.mrb[5].mxu0  ;;  %v942_v60 = vsel %vm941_vm14, %v935_v56, -inf  ;;  %v1002_v61 = vsel %vm941_vm14, %v996_v57, -inf }
 0x338   : > { %v938_v62 = vpop.f32.mrb[10].mxu1  ;;  %943 = vmax.xlane.f32.xlu1 %v942_v60  ;;  %1003 = vmax.xlane.f32.xlu0 %v1002_v61  ;;  %v999_v63 = vpop.f32.mrb[6].mxu0  ;;  %v2300_v60 = vld [vmem:[%s2924_s6] sm:$0xff]   ;;  %v2301_v61 = vld [vmem:[%s2924_s6 + $0x8] sm:$0xff]  }
 0x339   : > { %v2122_v1 = vpop.f32.mrb[11].mxu1  ;;  %v2128_v3 = vpop.f32.mrb[7].mxu0  ;;  %2166 = vmatpush3.bf16.msra.mxu0 %v2300_v60 }
 0x33a   : > { %2167 = vmatprep.subr.bf16.mxu0 %v2438_v25 }
 0x33d   : > { %2168 = vmatpush3.bf16.msra.mxu0 %v2301_v61 }
 0x33e   : > { %v1151_v4 = vpop.f32.mrb[8].mxu0  ;;  %2173 = vmatprep.subr.bf16.mxu0 %v2438_v25 }
 0x33f   : > { %v2145_v5 = vpop.f32.mrb[9].mxu0  ;;  %v1157_v6 = vsel %vm941_vm14, %v1151_v4, -inf }
 0x340   : > { %1158 = vmax.xlane.f32.xlu0 %v1157_v6  ;;  %v1154_v7 = vpop.f32.mrb[10].mxu0  ;;  %v2008_v6 = vld [vmem:[%s2925_s7] ss:$0 sm:$0xff] }
 0x341   : > { %v2146_v8 = vpop.f32.mrb[11].mxu0 }
 0x346   : > { %v1260_v9 = vpop.f32.mrb[12].mxu0 }
 0x347   : > { %v2157_v10 = vpop.f32.mrb[13].mxu0  ;;  %v1266_v11 = vsel %vm941_vm14, %v1260_v9, -inf }
 0x348   : > { %1267 = vmax.xlane.f32.xlu1 %v1266_v11  ;;  %v1263_v12 = vpop.f32.mrb[14].mxu0 }
 0x349   : > { %v2158_v13 = vpop.f32.mrb[15].mxu0 }
 0x3c5   : > { %v1004_v14 = vpop.xlane.xlu0 %1003  ;;  %v944_v15 = vpop.xlane.xlu1 %943 }
 0x3c6   : > { %v1005_v16 = vsub.f32 %v996_v57, %v1004_v14  ;;  %v945_v17 = vsub.f32 %v935_v56, %v944_v15  ;;  %v1285_v56 = vsel %vm1020_vm13, %v1280_v54, 0 }
 0x3c8   : > { %v1006_v18 = vmul.f32 1.442695, %v1005_v16  ;;  %v946_v19 = vmul.f32 1.442695, %v945_v17 }
 0x3ca   : > { %2328 = vpow2.f32 %v1006_v18 }
 0x3cb   : > { %2330 = vpow2.f32 %v946_v19  ;;  %v2302_v19 = vld [vmem:[%s2928_s10] sm:$0xff]  }
 0x3cd   : > { %v1159_v20 = vpop.xlane.xlu0 %1158 }
 0x3ce   : > { %v1160_v21 = vsub.f32 %v1151_v4, %v1159_v20  ;;  %v2304_v20 = vld [vmem:[%s2930_s12] sm:$0xff]  }
 0x3d0   : > { %v1161_v22 = vmul.f32 1.442695, %v1160_v21  ;;  %v2305_v21 = vld [vmem:[%s2930_s12 + $0x8] sm:$0xff]  }
 0x3d2   : > { %2332 = vpow2.f32 %v1161_v22  ;;  %v2306_v22 = vld [vmem:[%s2930_s12 + $0x10] sm:$0xff]  }
 0x3d4   : > { %v2329_v23 = vpop.eup %2328 }
 0x3d5   : > { %v2331_v24 = vpop.eup %2330  ;;  %v1268_v26 = vpop.xlane.xlu1 %1267  ;;  %v1008_v27 = vsel %vm941_vm14, %v2329_v23, 0.0 }
 0x3d6   : > { %v1269_v28 = vsub.f32 %v1260_v9, %v1268_v26  ;;  %1009 = vadd.xlane.f32.xlu0 %v1008_v27  ;;  %v948_v29 = vsel %vm941_vm14, %v2331_v24, 0.0  ;;  %v2309_v26 = vld [vmem:[%s2930_s12 + $0x28] sm:$0xff]  }
 0x3d7   : > { %949 = vadd.xlane.f32.xlu1 %v948_v29 }
 0x3d8   : > { %v1270_v30 = vmul.f32 1.442695, %v1269_v28 }
 0x3da   : > { %2334 = vpow2.f32 %v1270_v30  ;;  %v1413_v30 = vsub.s32 1, %v2639_v35 }
 0x3dc   : > { %v2333_v31 = vpop.eup %2332 }
 0x3dd   : > { %v1163_v32 = vsel %vm941_vm14, %v2333_v31, 0.0 }
 0x3de   : > { %1164 = vadd.xlane.f32.xlu0 %v1163_v32 }
 0x3e4   : > { %v2335_v33 = vpop.eup %2334 }
 0x3e5   : > { %v1272_v34 = vsel %vm941_vm14, %v2335_v33, 0.0 }
 0x3e6   : > { %1273 = vadd.xlane.f32.xlu1 %v1272_v34  ;;  %v1419_v34 = vrot.slane %v2650_v42, %v1413_v30 }
 0x463   : > { %v1010_v36 = vpop.xlane.xlu0 %1009 }
 0x464   : > { %2336 = vrcp.f32 %v1010_v36  ;;  %v950_v37 = vpop.xlane.xlu1 %949 }
 0x465   : > { %2338 = vrcp.f32 %v950_v37 }
 0x46b   : > { %v1165_v45 = vpop.xlane.xlu0 %1164 }
 0x46c   : > { %2340 = vrcp.f32 %v1165_v45 }
 0x46e   : > { %v2337_v38 = vpop.eup %2336 }
 0x46f   : > { %v1012_v39 = vmul.f32 %v2337_v38, %v2329_v23  ;;  %v2339_v46 = vpop.eup %2338  ;;  %v2307_v23 = vld [vmem:[%s2930_s12 + $0x18] sm:$0xff]  }
 0x470   : > { %v952_v47 = vmul.f32 %v2339_v46, %v2331_v24  ;;  %v2308_v24 = vld [vmem:[%s2930_s12 + $0x20] sm:$0xff]  }
 0x471   : > { %v1013_v43 = vpack.c.bf16 %v1012_v39, %v1012_v39  ;;  %v2310_v39 = vld [vmem:[%s2930_s12 + $0x30] sm:$0xff]  }
 0x472   : > { %v953_v49 = vpack.c.bf16 %v952_v47, %v952_v47 }
 0x473   : > { %2132 = vmatmul.mubr.msk.bf16.vlgmr.msra.gmra.mrb[12].mxu1 %vm941_vm14, %v1013_v43  ;;  %v1274_v51 = vpop.xlane.xlu1 %1273  ;;  %v2012_v43 = vld [vmem:[%s2929_s11] ss:$0 sm:$0xff] }
 0x474   : > { %2136 = vmatpush3.bf16.msra.mxu1 %v1068_v44  ;;  %2137 = vmatprep.mubr.msk.bf16.mxu1 %vm2439_vm1, %v2438_v25  ;;  %2342 = vrcp.f32 %v1274_v51  ;;  %v2016_v51 = vld [vmem:[%s2931_s13] ss:$0 sm:$0xff] }
 0x475   : > { %2147 = vmatprep.subr.bf16.mxu1 %v2438_v25 }
 0x476   : > { %v2341_v52 = vpop.eup %2340 }
 0x477   : > { %v1167_v53 = vmul.f32 %v2341_v52, %v2333_v31  ;;  %v1414_v31 = vrot.slane %v2645_v40, %v1413_v30 }
 0x479   : > { %v1168_v55 = vpack.c.bf16 %v1167_v53, %v1167_v53 }
 0x47e   : > { %v2343_v57 = vpop.eup %2342 }
 0x47f   : > { %2138 = vmatmul.mubr.msk.bf16.vlgmr.msra.gmra.mrb[12].mxu1 %vm941_vm14, %v953_v49  ;;  %v1276_v58 = vmul.f32 %v2343_v57, %v2335_v33 }
 0x480   : > { %2148 = vmatpush3.bf16.msra.mxu1 %v1176_v50  ;;  %2149 = vmatprep.mubr.msk.bf16.mxu1 %vm2439_vm1, %v2438_v25 }
 0x481   : > { %2159 = vmatprep.subr.bf16.mxu1 %v2438_v25  ;;  %v1277_v59 = vpack.c.bf16 %v1276_v58, %v1276_v58 }
 0x48b   : > { %2150 = vmatmul.mubr.msk.bf16.vlgmr.msra.gmra.mrb[12].mxu1 %vm941_vm14, %v1168_v55 }
 0x48c   : > { %2160 = vmatpush3.bf16.msra.mxu1 %v1285_v56  ;;  %2161 = vmatprep.mubr.msk.bf16.mxu1 %vm2439_vm1, %v2438_v25 }
 0x48d   : > { %2181 = vmatprep.subr.bf16.mxu1 %v2438_v25 }
 0x497   : > { %2162 = vmatmul.mubr.msk.bf16.vlgmr.msra.gmra.mrb[12].mxu1 %vm941_vm14, %v1277_v59 }
 0x498   : > { %2197 = vmatprep.mubr.msk.bf16.mxu1 %vm2439_vm1, %v2438_v25  ;;  %2182 = vmatpush3.bf16.msra.mxu1 %v2304_v20  ;;  %v2312_v20 = vld [vmem:[%s2932_s14] sm:$0xff]  }
 0x499   : > { %2183 = vmatprep.subr.bf16.mxu1 %v2438_v25 }
 0x49c   : > { %2184 = vmatpush3.bf16.msra.mxu1 %v2305_v21 }
 0x49d   : > { %2185 = vmatprep.subr.bf16.mxu1 %v2438_v25 }
 0x4a0   : > { %2186 = vmatpush3.bf16.msra.mxu1 %v2306_v22 }
 0x4a1   : > { %2187 = vmatprep.subr.bf16.mxu1 %v2438_v25 }
 0x4a4   : > { %2188 = vmatpush3.bf16.msra.mxu1 %v2307_v23 }
 0x4a5   : > { %2189 = vmatprep.subr.bf16.mxu1 %v2438_v25 }
 0x4a8   : > { %2190 = vmatpush3.bf16.msra.mxu1 %v2308_v24  ;;  %v1645_v24 = vsub.s32 3, %v2639_v35 }
 0x4a9   : > { %2191 = vmatprep.subr.bf16.mxu1 %v2438_v25 }
 0x4ac   : > { %2192 = vmatpush3.bf16.msra.mxu1 %v2309_v26  ;;  %v1646_v26 = vrot.slane %v2645_v40, %v1645_v24 }
 0x4ad   : > { %2193 = vmatprep.subr.bf16.mxu1 %v2438_v25 }
 0x4b0   : > { %2194 = vmatpush3.bf16.msra.mxu1 %v2310_v39 }
 0x4b1   : > { %2195 = vmatprep.subr.bf16.mxu1 %v2438_v25 }
 0x4b4   : > { %2196 = vmatpush3.bf16.msra.mxu1 %v2311_v41 }
 0x56a   : > { %v1321_v62 = vpop.f32.mrb[12].mxu1 }
 0x56b   : > { %v1328_v63 = vpack.c.bf16 %v1321_v62, %v1321_v62  ;;  %v2163_v1 = vpop.f32.mrb[13].mxu1 }
 0x56c   : > { %v1324_v3 = vpop.f32.mrb[14].mxu1 }
 0x56d   : > { %1329 = vst.msk [vmem:[#allocation5] sm:$0xf] %vm835_vm12, %v1328_v63  ;;  %v2164_v4 = vpop.f32.mrb[15].mxu1 }
 0x574   : > { %v1330_v5 = vld [vmem:[#allocation5] sm:$0xf] }
 0x575   : > { %2170 = vmatmul.mubr.msk.bf16.vlgmr.msra.gmra.mrb[16].mxu0 %vm574_vm0, %v1330_v5  ;;  %v1617_v5 = vsub.s32 2, %v2639_v35  ;;  %v2315_v35 = vld [vmem:[%s2933_s15 + $0x8] sm:$0xff]  }
 0x576   : > { %2177 = vmatprep.mubr.msk.bf16.mxu0 %vm2439_vm1, %v2438_v25  ;;  %2174 = vmatpush3.bf16.msra.mxu0 %v2302_v19 }
 0x577   : > { %2175 = vmatprep.subr.bf16.mxu0 %v2438_v25 }
 0x648   : > { %v1391_v7 = vpop.f32.mrb[16].mxu0 }
 0x649   : > { %v1392_v8 = vadd.f32 %v2008_v6, %v1391_v7  ;;  %v2171_v9 = vpop.f32.mrb[17].mxu0  ;;  %v1618_v6 = vrot.slane %v2645_v40, %v1617_v5  ;;  %v2316_v40 = vld [vmem:[%s2933_s15 + $0x10] sm:$0xff]  }
 0x64a   : > { %v1394_v10 = vpop.f32.mrb[18].mxu0  ;;  %v1623_v9 = vrot.slane %v2650_v42, %v1617_v5 }
 0x64b   : > { %v2754_v11 = vadd.f32 %v1392_v8, %v2607_v2  ;;  %v2172_v12 = vpop.f32.mrb[19].mxu0  ;;  %v2303_v2 = vld [vmem:[%s2928_s10 + $0x8] sm:$0xff]  }
 0x64c   : > { %2176 = vmatpush3.bf16.msra.mxu0 %v2303_v2 }
 0x64d   : > { %v1398_v13 = vsel %vm574_vm0, %v2754_v11, 0.0  ;;  %2201 = vmatprep.subr.bf16.mxu0 %v2438_v25 }
 0x64e   : > { %1399 = vadd.xlane.f32.xlu0 %v1398_v13 }
 0x6db   : > { %v1400_v14 = vpop.xlane.xlu0 %1399 }
 0x6dc   : > { %v1401_v15 = vmul.f32 0.03125, %v1400_v14 }
 0x6de   : > { %v1402_v16 = vsub.f32 %v2754_v11, %v1401_v15 }
 0x6e0   : > { %v1403_v17 = vmul.f32 %v1402_v16, %v1402_v16 }
 0x6e2   : > { %v1404_v18 = vsel %vm574_vm0, %v1403_v17, 0.0 }
 0x6e3   : > { %1405 = vadd.xlane.f32.xlu1 %v1404_v18 }
 0x770   : > { %v1406_v27 = vpop.xlane.xlu1 %1405 }
 0x771   : > { %v1407_v28 = vmul.f32 0.03125, %v1406_v27 }
 0x773   : > { %v1408_v29 = vadd.f32 1e-05, %v1407_v28 }
 0x775   : > { %2344 = vrsqrt.f32 %v1408_v29  ;;  %v1651_v29 = vrot.slane %v2650_v42, %v1645_v24  ;;  %v2317_v42 = vld [vmem:[%s2933_s15 + $0x18] sm:$0xff]  }
 0x77f   : > { %v2345_v32 = vpop.eup %2344 }
 0x780   : > { %v1410_v33 = vmul.f32 %v2345_v32, %v1402_v16 }
 0x782   : > { %v1415_v36 = vmul.f32 %v1414_v31, %v1410_v33  ;;  %v2314_v33 = vld [vmem:[%s2933_s15] sm:$0xff]  }
 0x784   : > { %v1420_v37 = vadd.f32 %v1419_v34, %v1415_v36  ;;  %v2318_v34 = vld [vmem:[%s2933_s15 + $0x20] sm:$0xff]   ;;  %v2319_v36 = vld [vmem:[%s2933_s15 + $0x28] sm:$0xff]  }
 0x786   : > { %v1425_v38 = vpack.c.bf16 %v1420_v37, %v1420_v37  ;;  %v2320_v37 = vld [vmem:[%s2933_s15 + $0x30] sm:$0xff]  }
 0x788   : > { %2178 = vmatmul.mubr.msk.bf16.vlgmr.msra.gmra.mrb[20].mxu0 %vm574_vm0, %v1425_v38  ;;  %v2321_v38 = vld [vmem:[%s2933_s15 + $0x38] sm:$0xff]  }
 0x789   : > { %2205 = vmatprep.mubr.msk.bf16.mxu0 %vm2439_vm1, %v2438_v25  ;;  %2202 = vmatpush3.bf16.msra.mxu0 %v2312_v20 }
 0x78a   : > { %2203 = vmatprep.subr.bf16.mxu0 %v2438_v25 }
 0x85b   : > { %v1482_v44 = vpop.f32.mrb[20].mxu0 }
 0x85c   : > { %v1483_v45 = vadd.f32 %v2012_v43, %v1482_v44  ;;  %v2179_v46 = vpop.f32.mrb[21].mxu0 }
 0x85d   : > { %v1485_v47 = vpop.f32.mrb[22].mxu0 }
 0x85e   : > { %v1488_v48 = vmax.f32 %v1483_v45, 0.0  ;;  %v2180_v49 = vpop.f32.mrb[23].mxu0 }
 0x860   : > { %v1505_v50 = vpack.c.bf16 %v1488_v48, %v1488_v48 }
 0x862   : > { %2198 = vmatmul.mubr.bf16.vlgmr.msra.gmra.mrb[16].mxu1 %v1505_v50 }
 0x935   : > { %v1595_v52 = vpop.f32.mrb[16].mxu1 }
 0x936   : > { %v1596_v53 = vadd.f32 %v2016_v51, %v1595_v52  ;;  %v2199_v54 = vpop.f32.mrb[17].mxu1 }
 0x937   : > { %v1598_v55 = vpop.f32.mrb[18].mxu1 }
 0x938   : > { %v2200_v56 = vpop.f32.mrb[19].mxu1  ;;  %v1601_v57 = vadd.f32 %v1596_v53, %v2754_v11  ;;  %v1627_v11 = vstv %s1625_s30  ;;  %s2038_s30 = sshll.u32 %s2548_s25, 7  ;;  %s1850_s25 = scalar_lea.sflag [#allocation7], %s550_s23 }
 0x939   : > { %s2875_s26 = scalar_lea.hbm %s2934_s16, %s2038_s30 }
 0x93a   : > { %v1602_v58 = vsel %vm574_vm0, %v1601_v57, 0.0 }
 0x93b   : > { %1603 = vadd.xlane.f32.xlu0 %v1602_v58 }
 0x9c8   : > { %v1604_v59 = vpop.xlane.xlu0 %1603 }
 0x9c9   : > { %v1605_v60 = vmul.f32 0.03125, %v1604_v59 }
 0x9cb   : > { %v1606_v61 = vsub.f32 %v1601_v57, %v1605_v60 }
 0x9cd   : > { %v1607_v62 = vmul.f32 %v1606_v61, %v1606_v61 }
 0x9cf   : > { %v1608_v63 = vsel %vm574_vm0, %v1607_v62, 0.0 }
 0x9d0   : > { %1609 = vadd.xlane.f32.xlu1 %v1608_v63 }
 0xa5d   : > { %v1610_v1 = vpop.xlane.xlu1 %1609 }
 0xa5e   : > { %v1611_v3 = vmul.f32 0.03125, %v1610_v1  ;;  %v2440_v1 = vmov -1.0  }
 0xa60   : > { %v1612_v4 = vadd.f32 1e-05, %v1611_v3 }
 0xa62   : > { %2346 = vrsqrt.f32 %v1612_v4 }
 0xa6c   : > { %v2347_v7 = vpop.eup %2346 }
 0xa6d   : > { %v1614_v8 = vmul.f32 %v2347_v7, %v1606_v61 }
 0xa6f   : > { %v1619_v10 = vmul.f32 %v1618_v6, %v1614_v8 }
 0xa71   : > { %v1624_v12 = vadd.f32 %v1623_v9, %v1619_v10  ;;  %v1845_v9 = vstv %s2025_s21  ;;  %s2375_s21 = scalar_lea.vmem %s2374_s3, 256 }
 0xa72   : > { %p2377_p0 = scmp.lt.s32.totalorder %s2375_s21, %s2369_s29 }
 0xa73   : > { %v1628_v13 = vmul.f32 %v1627_v11, %v1624_v12 }
 0xa74   : > { %p2378_p1 = por %p2377_p0, %p2376_p13 }
 0xa75   : > { %v2818_v14 = vadd.f32 %v1628_v13, %v2601_v0  ;;  %v2313_v0 = vld [vmem:[%s2932_s14 + $0x8] sm:$0xff]  }
 0xa76   : > { %2204 = vmatpush3.bf16.msra.mxu0 %v2313_v0  ;;  %p2379_p2 = pnand %p2378_p1, %p2372_p12 }
 0xa77   : > { %v1630_v15 = vsel %vm574_vm0, %v2818_v14, 0.0  ;;  %2209 = vmatprep.subr.bf16.mxu0 %v2438_v25 }
 0xa78   : > { %1631 = vadd.xlane.f32.xlu0 %v1630_v15 }
 0xb05   : > { %v1632_v16 = vpop.xlane.xlu0 %1631 }
 0xb06   : > { %v1633_v17 = vmul.f32 0.03125, %v1632_v16 }
 0xb08   : > { %v1634_v18 = vsub.f32 %v2818_v14, %v1633_v17 }
 0xb0a   : > { %v1635_v19 = vmul.f32 %v1634_v18, %v1634_v18 }
 0xb0c   : > { %v1636_v2 = vsel %vm574_vm0, %v1635_v19, 0.0 }
 0xb0d   : > { %1637 = vadd.xlane.f32.xlu1 %v1636_v2 }
 0xb9a   : > { %v1638_v21 = vpop.xlane.xlu1 %1637 }
 0xb9b   : > { %v1639_v22 = vmul.f32 0.03125, %v1638_v21 }
 0xb9d   : > { %v1640_v23 = vadd.f32 1e-05, %v1639_v22 }
 0xb9f   : > { %2348 = vrsqrt.f32 %v1640_v23 }
 0xba9   : > { %v2349_v27 = vpop.eup %2348 }
 0xbaa   : > { %v1642_v28 = vmul.f32 %v2349_v27, %v1634_v18 }
 0xbac   : > { %v1647_v30 = vmul.f32 %v1646_v26, %v1642_v28 }
 0xbae   : > { %v1652_v31 = vadd.f32 %v1651_v29, %v1647_v30 }
 0xbb0   : > { %v1657_v32 = vpack.c.bf16 %v1652_v31, %v1652_v31 }
 0xbb2   : > { %2206 = vmatmul.mubr.msk.bf16.vlgmr.msra.gmra.mrb[24].mxu0 %vm574_vm0, %v1657_v32 }
 0xbb3   : > { %2225 = vmatprep.mubr.msk.bf16.mxu0 %vm2439_vm1, %v2438_v25  ;;  %2210 = vmatpush3.bf16.msra.mxu0 %v2314_v33 }
 0xbb4   : > { %2211 = vmatprep.subr.bf16.mxu0 %v2438_v25 }
 0xbb7   : > { %2212 = vmatpush3.bf16.msra.mxu0 %v2315_v35 }
 0xbb8   : > { %2213 = vmatprep.subr.bf16.mxu0 %v2438_v25 }
 0xbbb   : > { %2214 = vmatpush3.bf16.msra.mxu0 %v2316_v40 }
 0xbbc   : > { %2215 = vmatprep.subr.bf16.mxu0 %v2438_v25 }
 0xbbf   : > { %2216 = vmatpush3.bf16.msra.mxu0 %v2317_v42 }
 0xbc0   : > { %2217 = vmatprep.subr.bf16.mxu0 %v2438_v25 }
 0xbc3   : > { %2218 = vmatpush3.bf16.msra.mxu0 %v2318_v34 }
 0xbc4   : > { %2219 = vmatprep.subr.bf16.mxu0 %v2438_v25 }
 0xbc7   : > { %2220 = vmatpush3.bf16.msra.mxu0 %v2319_v36 }
 0xbc8   : > { %2221 = vmatprep.subr.bf16.mxu0 %v2438_v25 }
 0xbcb   : > { %2222 = vmatpush3.bf16.msra.mxu0 %v2320_v37 }
 0xbcc   : > { %2223 = vmatprep.subr.bf16.mxu0 %v2438_v25 }
 0xbcf   : > { %2224 = vmatpush3.bf16.msra.mxu0 %v2321_v38 }
 0xc85   : > { %v1707_v39 = vpop.f32.mrb[24].mxu0 }
 0xc86   : > { %v1714_v41 = vmul.f32 0.70710677, %v1707_v39  ;;  %v2207_v43 = vpop.f32.mrb[25].mxu0  ;;  %v1713_v5 = vmul.f32 0.5, %v1707_v39 }
 0xc87   : > { %v1710_v44 = vpop.f32.mrb[26].mxu0 }
 0xc88   : > { %v1717_v45 = vand.u32 2147483647, %v1714_v41  ;;  %v2208_v46 = vpop.f32.mrb[27].mxu0  ;;  %vm1715_vm15 = vcmp.ge.f32.partialorder %v1714_v41, 0.0 }
 0xc89   : > { %v1716_v3 = vsel %vm1715_vm15, 1.0, %v2440_v1 }
 0xc8a   : > { %v1718_v47 = vmul.f32 0.3275911, %v1717_v45  ;;  %v1731_v49 = vsub.f32 0.0, %v1717_v45 }
 0xc8c   : > { %v1719_v48 = vadd.f32 1.0, %v1718_v47  ;;  %v1732_v51 = vmul.f32 %v1731_v49, %v1717_v45 }
 0xc8e   : > { %2350 = vrcp.f32 %v1719_v48  ;;  %v1733_v25 = vmul.f32 1.442695, %v1732_v51 }
 0xc90   : > { %2352 = vpow2.f32 %v1733_v25 }
 0xc98   : > { %v2351_v50 = vpop.eup %2350 }
 0xc99   : > { %v1722_v52 = vmul.f32 1.0614054, %v2351_v50 }
 0xc9a   : > { %v2353_v61 = vpop.eup %2352 }
 0xc9b   : > { %v1723_v53 = vadd.f32 -1.4531521, %v1722_v52 }
 0xc9d   : > { %v1724_v54 = vmul.f32 %v2351_v50, %v1723_v53 }
 0xc9f   : > { %v1725_v55 = vadd.f32 1.4214138, %v1724_v54 }
 0xca1   : > { %v1726_v56 = vmul.f32 %v2351_v50, %v1725_v55 }
 0xca3   : > { %v1727_v57 = vadd.f32 -0.28449672, %v1726_v56 }
 0xca5   : > { %v1728_v58 = vmul.f32 %v2351_v50, %v1727_v57 }
 0xca7   : > { %v1729_v59 = vadd.f32 0.2548296, %v1728_v58 }
 0xca9   : > { %v1730_v60 = vmul.f32 %v2351_v50, %v1729_v59 }
 0xcab   : > { %v1735_v62 = vmul.f32 %v2353_v61, %v1730_v60 }
 0xcad   : > { %v1736_v63 = vsub.f32 1.0, %v1735_v62 }
 0xcaf   : > { %v1737_v4 = vmul.f32 %v1736_v63, %v1716_v3 }
 0xcb1   : > { %v1738_v6 = vadd.f32 1.0, %v1737_v4 }
 0xcb3   : > { %v1739_v7 = vmul.f32 %v1738_v6, %v1713_v5 }
 0xcb5   : > { %v1756_v8 = vpack.c.bf16 %v1739_v7, %v1739_v7 }
 0xcb7   : > { %2226 = vmatmul.mubr.bf16.vlgmr.msra.gmra.mrb[28].mxu0 %v1756_v8 }
 0xd8a   : > { %v1839_v10 = vpop.f32.mrb[28].mxu0 }
 0xd8b   : > { %v1846_v11 = vmul.f32 %v1845_v9, %v1839_v10  ;;  %v2227_v12 = vpop.f32.mrb[29].mxu0 }
 0xd8c   : > { %v1842_v13 = vpop.f32.mrb[30].mxu0 }
 0xd8d   : > { %v1847_v15 = vadd.f32 %v1846_v11, %v2818_v14  ;;  %v2228_v16 = vpop.f32.mrb[31].mxu0 }
 0xd8f   : > { %1848 = vst.msk [vmem:[%s552_s17] sm:$0xff] %vm574_vm0, %v1847_v15 }
 0xd90   : > { %2382 = shalt.err (!%p2379_p2)
}
 0xd91   : > { %s2383_s23 = scalar_lea.hbm %s2875_s26, 128  ;;  %s2387_s17 = scalar_lea.hbm %s2934_s16, 256 }
 0xd92   : > { %p2384_p3 = scmp.ne.s32.totalorder %s2875_s26, %s2383_s23  ;;  %p2388_p8 = scmp.lt.u32.totalorder %s2875_s26, %s2934_s16 }
 0xd93   : > { %p2389_p11 = scmp.lt.u32.totalorder %s2387_s17, %s2383_s23  ;;  %p2391_p10 = scmp.lt.u32.totalorder %s2383_s23, %s2875_s26 }
 0xd94   : > { %p2385_p4 = pnand %p2384_p3, %p2565_p5 }
 0xd95   : > { %p2390_p9 = por %p2389_p11, %p2388_p8 }
 0xd96   : > { %p2386_p7 = pneg %p2385_p4 }
 0xd97   : > { %p2392_p12 = por %p2391_p10, %p2390_p9 }
 0xd99   : > { %p2393_p13 = pnand %p2392_p12, %p2386_p7 }
 0xd9b   : > { %2396 = shalt.err (!%p2393_p13)
}
 0xd9c   : > { %2245 = dma.vmem_to_hbm [thread:$0]  (%p2565_p5), %s2877_s19, 128, %s2875_s26, %s1850_s25  }
 0xd9d PF: > { %s2952_s29 = sld [smem:[#allocation12_spill]]  ;;  %p2257_p0 = scmp.ge.s32.totalorder %s2435_s24, 2 }
 0xd9f   : > { %p2252_p1 = pnand %p2257_p0, %p2569_p6 }
 0xda3   : > { %s1875_s3 = sand.u32 1, %s2952_s29  }
 0xda4   : > { %s1876_s21 = scalar_lea.sflag [#allocation7], %s1875_s3 }
 0xda5   : > { %2418 = dma.done.wait (!%p2252_p1), %s1876_s21, 128  }
 0xda6   : > { %2420 = vsyncadd (!%p2252_p1), %s1876_s21, 4294967168  ;;  %s2954_s24 = sld [smem:[#allocation14_spill]]  ;;  %s2955_s23 = sld [smem:[#allocation13_spill]] }
 0xda7   : > { %s2956_s27 = sld [smem:[#allocation15_spill]]  ;;  %s2957_s21 = smov %s2427_s22 }
 0xdac   : > { %p27_p2 = scmp.ge.s32.totalorder %s2954_s24, 4   ;;  %s2958_s22 = smov %s2955_s23 }
 0xdad   : > { %s2959_s23 = smov %s2956_s27 }
 0xdae   :  { %29 = sbr.rel (!%p27_p2) target bundleno = 7 (0x7), region = 146 }
 0xdb5   :  { %1881 = vsyncpa [#allocation7], 1 }
 0xdb6   :  { %1883 = vsyncpa [#allocation7 + $0x1], 1 }
 0xdb7   :  { %1884 = vsyncpa [#allocation8], 1 }
 0xdb8   :  { %1886 = vsyncpa [#allocation8 + $0x1], 1 }

// kernel: gated_cross_attention_block.1
= control target key start
LH: loop header
LB: loop body
LE: loop exit
PB: predicated region body
PF: predicated region fallthrough
CT: control target
= control target key end

     0   :  { %s2918_s0 = inlined_call_operand.vmem [shape: f32[16,32], index: 0, kind: input, shape index: {}]   ;;  %s2919_s1 = inlined_call_operand.vmem [shape: f32[16,32], index: 1, kind: input, shape index: {}]   ;;  %s2920_s2 = inlined_call_operand.vmem [shape: f32[16,32], index: 2, kind: input, shape index: {}]   ;;  %s2921_s3 = inlined_call_operand.vmem [shape: f32[2], index: 3, kind: input, shape index: {}]   ;;  %s2922_s4 = inlined_call_operand.vmem [shape: bf16[3,32,32], index: 4, kind: input, shape index: {}]   ;;  %s2923_s5 = inlined_call_operand.vmem [shape: f32[3,1,32], index: 5, kind: input, shape index: {}]   ;;  %s2924_s6 = inlined_call_operand.vmem [shape: bf16[32,32], index: 6, kind: input, shape index: {}]   ;;  %s2925_s7 = inlined_call_operand.vmem [shape: f32[1,32], index: 7, kind: input, shape index: {}]   ;;  %s2926_s8 = inlined_call_operand.vmem [shape: f32[4,32], index: 8, kind: input, shape index: {}]   ;;  %s2927_s9 = inlined_call_operand.vmem [shape: f32[4,32], index: 9, kind: input, shape index: {}]   ;;  %s2928_s10 = inlined_call_operand.vmem [shape: bf16[32,128], index: 10, kind: input, shape index: {}]   ;;  %s2929_s11 = inlined_call_operand.vmem [shape: f32[1,128], index: 11, kind: input, shape index: {}]   ;;  %s2930_s12 = inlined_call_operand.vmem [shape: bf16[128,32], index: 12, kind: input, shape index: {}]   ;;  %s2931_s13 = inlined_call_operand.vmem [shape: f32[1,32], index: 13, kind: input, shape index: {}]   ;;  %s2932_s14 = inlined_call_operand.vmem [shape: bf16[32,128], index: 14, kind: input, shape index: {}]   ;;  %s2933_s15 = inlined_call_operand.vmem [shape: bf16[128,32], index: 15, kind: input, shape index: {}]   ;;  %s2934_s16 = inlined_call_operand.hbm [shape: f32[16,32], index: 16, kind: output, shape index: {}]  }
   0x1   :  { %2940 = sst [smem:[#allocation17_spill]] %s2918_s0 }
   0x2   :  { %2941 = sst [smem:[#allocation18_spill]] %s2921_s3 }
   0x3   :  { %21 = vsyncpa [#allocation8], 0 }
   0x4   :  { %22 = vsyncpa [#allocation7], 0 }
   0x5   :  { %24 = vsyncpa [#allocation7 + $0x1], 0  ;;  %s2527_s21 = smov 0   ;;  %s2529_s22 = smov 0  }
   0x6   :  { %s2531_s23 = smov 0   ;;  %s2533_s24 = smov 0  }
   0x7 LB: > { %2942 = sst [smem:[#allocation12_spill]] %s2423_s21  ;;  %s2548_s25 = sadd.s32 4294967295, %s2435_s24   ;;  %s2435_s24 = sphi %s2533_s24, %s2954_s24   ;;  %s2431_s23 = sphi %s2531_s23, %s2959_s23   ;;  %s2427_s22 = sphi %s2529_s22, %s2958_s22   ;;  %s2423_s21 = sphi %s2527_s21, %s2957_s21  }
   0x8   : > { %2943 = sst [smem:[#allocation13_spill]] %s2431_s23  ;;  %s1964_s26 = sadd.s32 4294967294, %s2435_s24  }
   0x9   : > { %s2552_s27 = sadd.s32 1, %s2435_s24   ;;  %s388_s28 = sadd.s32 1, %s2431_s23 }
   0xa   : > { %2944 = sst [smem:[#allocation14_spill]] %s2552_s27  ;;  %s385_s29 = ssub.s32 %s2435_s24, %s2552_s27 }
   0xb   : > { %p398_p0 = scmp.ne.s32.totalorder %s2431_s23, %s2427_s22  ;;  %p386_p1 = scmp.eq.s32.totalorder %s385_s29, 0 }
   0xc   : > { %p399_p2 = scmp.eq.s32.totalorder %s2548_s25, 1  ;;  %p404_p3 = scmp.ne.s32.totalorder %s2427_s22, %s2423_s21 }
   0xd   : > { %p405_p4 = scmp.eq.s32.totalorder %s1964_s26, 1  ;;  %p1965_p7 = scmp.ge.s32.totalorder %s2435_s24, 1 }
   0xe   : > { %s2563_s30 = scalar_select %p386_p1, %s2431_s23, %s388_s28  }
   0xf   : > { %p2565_p5 = por %p399_p2, %p398_p0  ;;  %p2569_p6 = por %p405_p4, %p404_p3 }
  0x10   : > { %2945 = sst [smem:[#allocation15_spill]] %s2563_s30  ;;  %p412_p8 = scmp.lt.s32.totalorder %s2435_s24, 3 }
  0x11   : > { %s2947_s17 = scalar_select %p2569_p6, 1, 0 }
  0x12   : > { %p2255_p9 = scmp.eq.s32.totalorder %s2548_s25, 0  ;;  %p2576_p10 = pnand %p1965_p7, %p412_p8 }
  0x13   : > { %2948 = sst [smem:[#allocation16_spill]] %s2947_s17  ;;  %s2950_s3 = sld [smem:[#allocation18_spill]] }
  0x14   : > { %p2247_p11 = pneg %p2576_p10 }
  0x16   : > { %p2248_p12 = pnand %p2255_p9, %p2247_p11 }
  0x18   : > { %p2356_p0 = pneg %p2248_p12 }
  0x19   : > { %s425_s26 = sshll.u32 %s2950_s3, 4  ;;  %s426_s26 = int_to_ptr.vmem [resolvable:$true] %s425_s26 }
  0x1a   : > { %s2354_s28 = scalar_lea.vmem %s426_s26, 16  ;;  %p2362_p3 = scmp.lt.s32.totalorder %s426_s26, %s426_s26 }
  0x1b   : > { %p2355_p13 = scmp.ne.s32.totalorder %s426_s26, %s2354_s28  ;;  %p2363_p4 = scmp.lt.s32.totalorder %s2354_s28, %s2354_s28 }
  0x1d   : > { %p2357_p1 = pnand %p2356_p0, %p2355_p13  ;;  %p2364_p7 = por %p2363_p4, %p2362_p3 }
  0x1f   : > { %p2358_p2 = pneg %p2357_p1 }
  0x21   : > { %p2365_p8 = pnand %p2364_p7, %p2358_p2 }
  0x23   : > { %2368 = shalt.err (!%p2365_p8)
}
  0x24   : > { %s2437_s29 = smov [#allocation6]   ;;  %495 = sbr.rel (%p2576_p10) target bundleno = 3485 (0xd9d), region = 84 }
  0x25   : > { %2250 = dma.vmem_to_smem (!%p2248_p12), %s426_s26, 16, %s2437_s29, [#allocation8]  }
  0x2b   : > { %2414 = dma.done.wait (%p2255_p9), [#allocation8], 16  }
  0x2c   : > { %2416 = vsyncadd (%p2255_p9), [#allocation8], 4294967280 }
  0x2d   : > { %501 = sfence }
  0x2e   : > { %p553_p11 = scmp.lt.s32.totalorder %s2548_s25, 1  ;;  %s2951_s30 = sld [smem:[#allocation17_spill]]  ;;  %vm574_vm0 = vcmask 261120   ;;  %v2294_v24 = vld [vmem:[%s2922_s4] sm:$0xff]   ;;  %v2438_v25 = vmov 0.0   ;;  %v2295_v26 = vld [vmem:[%s2922_s4 + $0x8] sm:$0xff]   ;;  %v589_v31 = vlaneseq }
  0x2f   : > { %2093 = vmatprep.subr.bf16.mxu1 %v2438_v25  ;;  %2109 = vmatprep.subr.bf16.mxu0 %v2438_v25  ;;  %vm2439_vm1 = vmmov 0   ;;  %v2298_v27 = vld [vmem:[%s2922_s4 + $0x20] sm:$0xff]   ;;  %v2299_v28 = vld [vmem:[%s2922_s4 + $0x28] sm:$0xff]   ;;  %v2296_v51 = vld [vmem:[%s2922_s4 + $0x10] sm:$0xff]   ;;  %vm835_vm12 = vcmask 257024   ;;  %vm1020_vm13 = vcmask 1043456  }
  0x30   : > { %s554_s19 = scalar_select %p553_p11, %s2548_s25, 1  ;;  %2094 = vmatpush3.bf16.msra.mxu1 %v2294_v24  ;;  %2097 = vmatprep.mubr.msk.bf16.mxu1 %vm2439_vm1, %v2438_v25  ;;  %v2639_v35 = vshrl.u32 %v589_v31, 7  ;;  %v2645_v40 = vld [vmem:[%s2926_s8] sm:$0xf]  ;;  %v2297_v56 = vld [vmem:[%s2922_s4 + $0x18] sm:$0xff]   ;;  %v838_v62 = vand.u32 127, %v589_v31 }
  0x31   : > { %2095 = vmatprep.subr.bf16.mxu1 %v2438_v25  ;;  %2113 = vmatprep.mubr.msk.bf16.mxu0 %vm2439_vm1, %v2438_v25  ;;  %v2650_v42 = vld [vmem:[%s2927_s9] sm:$0xf]  ;;  %vm941_vm14 = vcmask 64512  }
  0x32   : > { %s1971_s20 = sshll.u32 %s554_s19, 3  ;;  %2110 = vmatpush3.bf16.msra.mxu0 %v2298_v27  ;;  %v591_v39 = vsub.s32 0, %v2639_v35  ;;  %vm851_vm2 = vcmp.ge.s32.totalorder %v838_v62, 8  ;;  %vm852_vm3 = vcmp.lt.s32.totalorder %v838_v62, 16  ;;  %vm865_vm4 = vcmp.ge.s32.totalorder %v838_v62, 16 }
  0x33   : > { %s560_s18 = scalar_lea.vmem %s2919_s1, %s1971_s20  ;;  %s564_s21 = scalar_lea.vmem %s2920_s2, %s1971_s20  ;;  %2111 = vmatprep.subr.bf16.mxu0 %v2438_v25  ;;  %vm866_vm5 = vcmp.lt.s32.totalorder %v838_v62, 24  ;;  %vm879_vm6 = vcmp.ge.s32.totalorder %v838_v62, 24  ;;  %vm880_vm7 = vcmp.lt.s32.totalorder %v838_v62, 32  ;;  %vm853_vm8 = vmand %vm851_vm2, %vm852_vm3  ;;  %vm840_vm9 = vcmp.lt.s32.totalorder %v838_v62, 8  ;;  %v1992_v24 = vld [vmem:[%s2923_s5 + $0x2] ss:$0 sm:$0xff] }
  0x34   : > { %s556_s23 = scalar_lea.vmem %s2951_s30, %s1971_s20  ;;  %v570_v1 = vld [vmem:[%s560_s18] sm:$0xff]  ;;  %2096 = vmatpush3.bf16.msra.mxu1 %v2295_v26  ;;  %v592_v43 = vrot.slane %v2645_v40, %v591_v39  ;;  %v597_v46 = vrot.slane %v2650_v42, %v591_v39  ;;  %vm867_vm10 = vmand %vm865_vm4, %vm866_vm5  ;;  %v1996_v63 = vsel %vm840_vm9, 1.0, %v2438_v25  ;;  %s1625_s30 = sld [smem:[#allocation6]] }
  0x35   : > { %v2601_v0 = vld [vmem:[%s556_s23] sm:$0xff]  ;;  %v571_v3 = vmul.f32 5.656854, %v570_v1  ;;  %2101 = vmatprep.subr.bf16.mxu1 %v2438_v25  ;;  %vm881_vm11 = vmand %vm879_vm6, %vm880_vm7  ;;  %v1997_v1 = vsel %vm853_vm8, 1.0, %v2438_v25  ;;  %s550_s23 = sand.u32 1, %s2427_s22   ;;  %s2441_s18 = smov [#allocation9]  }
  0x36   : > { %v2607_v2 = vmul.f32 5.656854, %v2601_v0  ;;  %v572_v4 = vld [vmem:[%s564_s21] sm:$0xff]  ;;  %2112 = vmatpush3.bf16.msra.mxu0 %v2299_v28  ;;  %s2025_s21 = sld [smem:[#allocation6 + $0x1]]  ;;  %s1970_s27 = sshll.u32 %s550_s23, 3 }
  0x37   : > { %v573_v5 = vmul.f32 5.656854, %v572_v4  ;;  %v599_v7 = vsel %vm574_vm0, %v571_v3, 0.0  ;;  %2123 = vmatprep.subr.bf16.mxu0 %v2438_v25  ;;  %v1999_v4 = vsel %vm881_vm11, 1.0, %v2438_v25  ;;  %s552_s17 = scalar_lea.vmem [#allocation9], %s1970_s27  ;;  %s2373_s3 = sshll.u32 %s2441_s18, 4  ;;  %s2374_s3 = int_to_ptr.vmem [resolvable:$false] %s2373_s3 }
  0x38   : > { %v575_v6 = vsel %vm574_vm0, %v2607_v2, 0.0  ;;  %s1863_s19 = sshll.u32 %s552_s17, 4  ;;  %s2877_s19 = int_to_ptr.vmem [resolvable:$true] %s1863_s19 }
  0x39   : > { %576 = vadd.xlane.f32.xlu0 %v575_v6  ;;  %v614_v8 = vsel %vm574_vm0, %v573_v5, 0.0  ;;  %v844_v6 = vmul.f32 0.35355338, %v1996_v63  ;;  %s2369_s29 = scalar_lea.vmem %s2877_s19, 128  ;;  %p2376_p13 = scmp.lt.s32.totalorder %s2877_s19, %s2374_s3 }
  0x3a   : > { %p2370_p9 = scmp.ne.s32.totalorder %s2877_s19, %s2369_s29 }
  0x3c   : > { %p2371_p10 = pnand %p2370_p9, %p2565_p5 }
  0x3d   : > { %600 = vadd.xlane.f32.xlu0 %v599_v7  ;;  %v856_v7 = vmul.f32 0.35355338, %v1997_v1 }
  0x3e   : > { %p2372_p12 = pneg %p2371_p10 }
  0x41   : > { %615 = vadd.xlane.f32.xlu0 %v614_v8 }
  0xc6   : > { %v577_v9 = vpop.xlane.xlu0 %576 }
  0xc7   : > { %v579_v10 = vmul.f32 0.03125, %v577_v9  ;;  %v884_v9 = vmul.f32 0.35355338, %v1999_v4 }
  0xc9   : > { %v580_v11 = vsub.f32 %v2607_v2, %v579_v10 }
  0xca   : > { %v601_v12 = vpop.xlane.xlu0 %600 }
  0xcb   : > { %v602_v13 = vmul.f32 0.03125, %v601_v12  ;;  %v581_v14 = vmul.f32 %v580_v11, %v580_v11 }
  0xcd   : > { %v603_v15 = vsub.f32 %v571_v3, %v602_v13  ;;  %v582_v16 = vsel %vm574_vm0, %v581_v14, 0.0  ;;  %v1998_v3 = vsel %vm867_vm10, 1.0, %v2438_v25 }
  0xce   : > { %583 = vadd.xlane.f32.xlu1 %v582_v16  ;;  %v616_v17 = vpop.xlane.xlu0 %615  ;;  %v870_v8 = vmul.f32 0.35355338, %v1998_v3 }
  0xcf   : > { %v604_v18 = vmul.f32 %v603_v15, %v603_v15  ;;  %v617_v19 = vmul.f32 0.03125, %v616_v17 }
  0xd1   : > { %v605_v20 = vsel %vm574_vm0, %v604_v18, 0.0  ;;  %v618_v21 = vsub.f32 %v573_v5, %v617_v19  ;;  %v1974_v5 = vld [vmem:[%s2923_s5] ss:$0 sm:$0xff] }
  0xd2   : > { %606 = vadd.xlane.f32.xlu1 %v605_v20 }
  0xd3   : > { %v619_v22 = vmul.f32 %v618_v21, %v618_v21 }
  0xd5   : > { %v620_v23 = vsel %vm574_vm0, %v619_v22, 0.0 }
  0xd6   : > { %621 = vadd.xlane.f32.xlu1 %v620_v23  ;;  %v1983_v23 = vld [vmem:[%s2923_s5 + $0x1] ss:$0 sm:$0xff] }
 0x15b   : > { %v584_v29 = vpop.xlane.xlu1 %583 }
 0x15c   : > { %v585_v30 = vmul.f32 0.03125, %v584_v29 }
 0x15e   : > { %v586_v32 = vadd.f32 1e-05, %v585_v30 }
 0x15f   : > { %v607_v33 = vpop.xlane.xlu1 %606 }
 0x160   : > { %2322 = vrsqrt.f32 %v586_v32  ;;  %v608_v34 = vmul.f32 0.03125, %v607_v33 }
 0x162   : > { %v609_v36 = vadd.f32 1e-05, %v608_v34 }
 0x163   : > { %v622_v37 = vpop.xlane.xlu1 %621 }
 0x164   : > { %2324 = vrsqrt.f32 %v609_v36  ;;  %v623_v38 = vmul.f32 0.03125, %v622_v37 }
 0x166   : > { %v624_v41 = vadd.f32 1e-05, %v623_v38 }
 0x168   : > { %2326 = vrsqrt.f32 %v624_v41 }
 0x16a   : > { %v2323_v44 = vpop.eup %2322 }
 0x16b   : > { %v588_v45 = vmul.f32 %v2323_v44, %v580_v11 }
 0x16d   : > { %v593_v47 = vmul.f32 %v592_v43, %v588_v45 }
 0x16e   : > { %v2325_v48 = vpop.eup %2324 }
 0x16f   : > { %v611_v49 = vmul.f32 %v2325_v48, %v603_v15  ;;  %v598_v50 = vadd.f32 %v597_v46, %v593_v47 }
 0x171   : > { %v633_v52 = vpack.c.bf16 %v598_v50, %v598_v50  ;;  %v612_v53 = vmul.f32 %v611_v49, %v592_v43 }
 0x172   : > { %v2327_v54 = vpop.eup %2326 }
 0x173   : > { %2098 = vmatmul.mubr.msk.bf16.vlgmr.msra.gmra.mrb[0].mxu1 %vm574_vm0, %v633_v52  ;;  %v626_v55 = vmul.f32 %v2327_v54, %v618_v21  ;;  %v613_v57 = vadd.f32 %v612_v53, %v597_v46 }
 0x174   : > { %2102 = vmatpush3.bf16.msra.mxu1 %v2296_v51  ;;  %2105 = vmatprep.mubr.msk.bf16.mxu1 %vm2439_vm1, %v2438_v25 }
 0x175   : > { %2103 = vmatprep.subr.bf16.mxu1 %v2438_v25  ;;  %v627_v58 = vmul.f32 %v626_v55, %v592_v43  ;;  %v701_v60 = vpack.c.bf16 %v613_v57, %v613_v57 }
 0x177   : > { %v628_v59 = vadd.f32 %v627_v58, %v597_v46 }
 0x178   : > { %2104 = vmatpush3.bf16.msra.mxu1 %v2297_v56 }
 0x179   : > { %v770_v61 = vpack.c.bf16 %v628_v59, %v628_v59  ;;  %2117 = vmatprep.subr.bf16.mxu1 %v2438_v25 }
 0x17b   : > { %2106 = vmatmul.mubr.msk.bf16.vlgmr.msra.gmra.mrb[4].mxu1 %vm574_vm0, %v701_v60  ;;  %2114 = vmatmul.mubr.msk.bf16.vlgmr.msra.gmra.mrb[0].mxu0 %vm574_vm0, %v770_v61 }
 0x17c   : > { %2119 = vmatprep.mubr.msk.bf16.mxu1 %vm2439_vm1, %v2438_v25  ;;  %2125 = vmatprep.mubr.msk.bf16.mxu0 %vm2439_vm1, %v2438_v25 }
 0x246   : > { %v690_v10 = vpop.f32.mrb[0].mxu1 }
 0x247   : > { %v691_v11 = vadd.f32 %v1974_v5, %v690_v10  ;;  %v2099_v12 = vpop.f32.mrb[1].mxu1 }
 0x248   : > { %v693_v13 = vpop.f32.mrb[2].mxu1 }
 0x249   : > { %v845_v14 = vmul.f32 %v844_v6, %v691_v11  ;;  %v857_v15 = vmul.f32 %v856_v7, %v691_v11  ;;  %v871_v16 = vmul.f32 %v870_v8, %v691_v11  ;;  %v885_v17 = vmul.f32 %v884_v9, %v691_v11  ;;  %v2100_v18 = vpop.f32.mrb[3].mxu1 }
 0x24b   : > { %v846_v19 = vpack.c.bf16 %v845_v14, %v845_v14  ;;  %v858_v20 = vpack.c.bf16 %v857_v15, %v857_v15  ;;  %v872_v21 = vpack.c.bf16 %v871_v16, %v871_v16  ;;  %v886_v22 = vpack.c.bf16 %v885_v17, %v885_v17 }
 0x24d   : > { %847 = vst.msk [vmem:[#allocation3] sm:$0xf] %vm835_vm12, %v846_v19  ;;  %860 = vst.msk [vmem:[#allocation3 + $0x4] sm:$0xf] %vm835_vm12, %v858_v20 }
 0x24e   : > { %874 = vst.msk [vmem:[#allocation3 + $0x8] sm:$0xf] %vm835_vm12, %v872_v21  ;;  %888 = vst.msk [vmem:[#allocation3 + $0xc] sm:$0xf] %vm835_vm12, %v886_v22  ;;  %v759_v26 = vpop.f32.mrb[4].mxu1  ;;  %v828_v27 = vpop.f32.mrb[0].mxu0 }
 0x24f   : > { %v760_v28 = vadd.f32 %v1983_v23, %v759_v26  ;;  %v2107_v29 = vpop.f32.mrb[5].mxu1  ;;  %v829_v30 = vadd.f32 %v1992_v24, %v828_v27  ;;  %v2115_v31 = vpop.f32.mrb[1].mxu0 }
 0x250   : > { %v762_v32 = vpop.f32.mrb[6].mxu1  ;;  %v831_v33 = vpop.f32.mrb[2].mxu0 }
 0x251   : > { %v834_v34 = vpack.c.bf16 %v760_v28, %v760_v28  ;;  %v2108_v36 = vpop.f32.mrb[7].mxu1  ;;  %v848_v37 = vmul.f32 %v1996_v63, %v829_v30  ;;  %v861_v38 = vmul.f32 %v1997_v1, %v829_v30  ;;  %v875_v39 = vmul.f32 %v1998_v3, %v829_v30  ;;  %v2116_v41 = vpop.f32.mrb[3].mxu0 }
 0x252   : > { %v889_v43 = vmul.f32 %v1999_v4, %v829_v30 }
 0x253   : > { %836 = vst.msk [vmem:[#allocation2] sm:$0xf] %vm835_vm12, %v834_v34  ;;  %v849_v44 = vpack.c.bf16 %v848_v37, %v848_v37  ;;  %v862_v45 = vpack.c.bf16 %v861_v38, %v861_v38  ;;  %v876_v46 = vpack.c.bf16 %v875_v39, %v875_v39 }
 0x254   : > { %v890_v47 = vpack.c.bf16 %v889_v43, %v889_v43  ;;  %v894_v51 = vld [vmem:[#allocation3] sm:$0xf]  ;;  %v958_v52 = vld [vmem:[#allocation3 + $0x4] sm:$0xf] }
 0x255   : > { %850 = vst.msk [vmem:[#allocation4] sm:$0xf] %vm835_vm12, %v849_v44  ;;  %864 = vst.msk [vmem:[#allocation4 + $0x4] sm:$0xf] %vm835_vm12, %v862_v45  ;;  %v1113_v54 = vld [vmem:[#allocation3 + $0x8] sm:$0xf] }
 0x256   : > { %878 = vst.msk [vmem:[#allocation4 + $0x8] sm:$0xf] %vm835_vm12, %v876_v46  ;;  %892 = vst.msk [vmem:[#allocation4 + $0xc] sm:$0xf] %vm835_vm12, %v890_v47  ;;  %v1222_v55 = vld [vmem:[#allocation3 + $0xc] sm:$0xf] }
 0x25a   : > { %v893_v48 = vld [vmem:[#allocation2] sm:$0xf] }
 0x25b   : > { %v899_v49 = vsel %vm574_vm0, %v893_v48, 0 }
 0x25c   : > { %2118 = vmatpush3.bf16.xpose.msra.mxu1 %v899_v49  ;;  %2124 = vmatpush3.bf16.xpose.msra.mxu0 %v899_v49  ;;  %v1016_v50 = vld [vmem:[#allocation4 + $0x4] sm:$0xf]  ;;  %v954_v41 = vld [vmem:[#allocation4] sm:$0xf] }
 0x25d   : > { %2141 = vmatprep.subr.bf16.mxu0 %v2438_v25  ;;  %2129 = vmatprep.subr.bf16.mxu1 %v2438_v25  ;;  %v1022_v53 = vsel %vm1020_vm13, %v1016_v50, 0  ;;  %v1068_v44 = vsel %vm1020_vm13, %v954_v41, 0  ;;  %v1171_v48 = vld [vmem:[#allocation4 + $0x8] sm:$0xf] }
 0x25e   : > { %v1176_v50 = vsel %vm1020_vm13, %v1171_v48, 0  ;;  %v2311_v41 = vld [vmem:[%s2930_s12 + $0x38] sm:$0xff]  }
 0x263   : > { %2120 = vmatmul.mubr.msk.bf16.vlgmr.msra.gmra.mrb[8].mxu1 %vm574_vm0, %v894_v51  ;;  %2126 = vmatmul.mubr.msk.bf16.vlgmr.msra.gmra.mrb[4].mxu0 %vm574_vm0, %v958_v52 }
 0x264   : > { %2142 = vmatpush3.bf16.xpose.msra.mxu0 %v899_v49  ;;  %2143 = vmatprep.mubr.msk.bf16.mxu0 %vm2439_vm1, %v2438_v25 }
 0x265   : > { %2153 = vmatprep.subr.bf16.mxu0 %v2438_v25  ;;  %2130 = vmatpush3.bf16.msra.mxu1 %v1022_v53 }
 0x266   : > { %2131 = vmatprep.mubr.msk.bf16.mxu1 %vm2439_vm1, %v2438_v25  ;;  %2135 = vmatprep.subr.bf16.mxu1 %v2438_v25 }
 0x26b   : > { %2144 = vmatmul.mubr.msk.bf16.vlgmr.msra.gmra.mrb[8].mxu0 %vm574_vm0, %v1113_v54  ;;  %v1280_v54 = vld [vmem:[#allocation4 + $0xc] sm:$0xf] }
 0x26c   : > { %2154 = vmatpush3.bf16.xpose.msra.mxu0 %v899_v49  ;;  %2155 = vmatprep.mubr.msk.bf16.mxu0 %vm2439_vm1, %v2438_v25 }
 0x26d   : > { %2165 = vmatprep.subr.bf16.mxu0 %v2438_v25 }
 0x273   : > { %2156 = vmatmul.mubr.msk.bf16.vlgmr.msra.gmra.mrb[12].mxu0 %vm574_vm0, %v1222_v55 }
 0x274   : > { %2169 = vmatprep.mubr.msk.bf16.mxu0 %vm2439_vm1, %v2438_v25 }
 0x336   : > { %v935_v56 = vpop.f32.mrb[8].mxu1  ;;  %v996_v57 = vpop.f32.mrb[4].mxu0 }
 0x337   : > { %v2121_v58 = vpop.f32.mrb[9].mxu1  ;;  %v2127_v59 = vpop.f32.mrb[5].mxu0  ;;  %v942_v60 = vsel %vm941_vm14, %v935_v56, -inf  ;;  %v1002_v61 = vsel %vm941_vm14, %v996_v57, -inf }
 0x338   : > { %v938_v62 = vpop.f32.mrb[10].mxu1  ;;  %943 = vmax.xlane.f32.xlu1 %v942_v60  ;;  %1003 = vmax.xlane.f32.xlu0 %v1002_v61  ;;  %v999_v63 = vpop.f32.mrb[6].mxu0  ;;  %v2300_v60 = vld [vmem:[%s2924_s6] sm:$0xff]   ;;  %v2301_v61 = vld [vmem:[%s2924_s6 + $0x8] sm:$0xff]  }
 0x339   : > { %v2122_v1 = vpop.f32.mrb[11].mxu1  ;;  %v2128_v3 = vpop.f32.mrb[7].mxu0  ;;  %2166 = vmatpush3.bf16.msra.mxu0 %v2300_v60 }
 0x33a   : > { %2167 = vmatprep.subr.bf16.mxu0 %v2438_v25 }
 0x33d   : > { %2168 = vmatpush3.bf16.msra.mxu0 %v2301_v61 }
 0x33e   : > { %v1151_v4 = vpop.f32.mrb[8].mxu0  ;;  %2173 = vmatprep.subr.bf16.mxu0 %v2438_v25 }
 0x33f   : > { %v2145_v5 = vpop.f32.mrb[9].mxu0  ;;  %v1157_v6 = vsel %vm941_vm14, %v1151_v4, -inf }
 0x340   : > { %1158 = vmax.xlane.f32.xlu0 %v1157_v6  ;;  %v1154_v7 = vpop.f32.mrb[10].mxu0  ;;  %v2008_v6 = vld [vmem:[%s2925_s7] ss:$0 sm:$0xff] }
 0x341   : > { %v2146_v8 = vpop.f32.mrb[11].mxu0 }
 0x346   : > { %v1260_v9 = vpop.f32.mrb[12].mxu0 }
 0x347   : > { %v2157_v10 = vpop.f32.mrb[13].mxu0  ;;  %v1266_v11 = vsel %vm941_vm14, %v1260_v9, -inf }
 0x348   : > { %1267 = vmax.xlane.f32.xlu1 %v1266_v11  ;;  %v1263_v12 = vpop.f32.mrb[14].mxu0 }
 0x349   : > { %v2158_v13 = vpop.f32.mrb[15].mxu0 }
 0x3c5   : > { %v1004_v14 = vpop.xlane.xlu0 %1003  ;;  %v944_v15 = vpop.xlane.xlu1 %943 }
 0x3c6   : > { %v1005_v16 = vsub.f32 %v996_v57, %v1004_v14  ;;  %v945_v17 = vsub.f32 %v935_v56, %v944_v15  ;;  %v1285_v56 = vsel %vm1020_vm13, %v1280_v54, 0 }
 0x3c8   : > { %v1006_v18 = vmul.f32 1.442695, %v1005_v16  ;;  %v946_v19 = vmul.f32 1.442695, %v945_v17 }
 0x3ca   : > { %2328 = vpow2.f32 %v1006_v18 }
 0x3cb   : > { %2330 = vpow2.f32 %v946_v19  ;;  %v2302_v19 = vld [vmem:[%s2928_s10] sm:$0xff]  }
 0x3cd   : > { %v1159_v20 = vpop.xlane.xlu0 %1158 }
 0x3ce   : > { %v1160_v21 = vsub.f32 %v1151_v4, %v1159_v20  ;;  %v2304_v20 = vld [vmem:[%s2930_s12] sm:$0xff]  }
 0x3d0   : > { %v1161_v22 = vmul.f32 1.442695, %v1160_v21  ;;  %v2305_v21 = vld [vmem:[%s2930_s12 + $0x8] sm:$0xff]  }
 0x3d2   : > { %2332 = vpow2.f32 %v1161_v22  ;;  %v2306_v22 = vld [vmem:[%s2930_s12 + $0x10] sm:$0xff]  }
 0x3d4   : > { %v2329_v23 = vpop.eup %2328 }
 0x3d5   : > { %v2331_v24 = vpop.eup %2330  ;;  %v1268_v26 = vpop.xlane.xlu1 %1267  ;;  %v1008_v27 = vsel %vm941_vm14, %v2329_v23, 0.0 }
 0x3d6   : > { %v1269_v28 = vsub.f32 %v1260_v9, %v1268_v26  ;;  %1009 = vadd.xlane.f32.xlu0 %v1008_v27  ;;  %v948_v29 = vsel %vm941_vm14, %v2331_v24, 0.0  ;;  %v2309_v26 = vld [vmem:[%s2930_s12 + $0x28] sm:$0xff]  }
 0x3d7   : > { %949 = vadd.xlane.f32.xlu1 %v948_v29 }
 0x3d8   : > { %v1270_v30 = vmul.f32 1.442695, %v1269_v28 }
 0x3da   : > { %2334 = vpow2.f32 %v1270_v30  ;;  %v1413_v30 = vsub.s32 1, %v2639_v35 }
 0x3dc   : > { %v2333_v31 = vpop.eup %2332 }
 0x3dd   : > { %v1163_v32 = vsel %vm941_vm14, %v2333_v31, 0.0 }
 0x3de   : > { %1164 = vadd.xlane.f32.xlu0 %v1163_v32 }
 0x3e4   : > { %v2335_v33 = vpop.eup %2334 }
 0x3e5   : > { %v1272_v34 = vsel %vm941_vm14, %v2335_v33, 0.0 }
 0x3e6   : > { %1273 = vadd.xlane.f32.xlu1 %v1272_v34  ;;  %v1419_v34 = vrot.slane %v2650_v42, %v1413_v30 }
 0x463   : > { %v1010_v36 = vpop.xlane.xlu0 %1009 }
 0x464   : > { %2336 = vrcp.f32 %v1010_v36  ;;  %v950_v37 = vpop.xlane.xlu1 %949 }
 0x465   : > { %2338 = vrcp.f32 %v950_v37 }
 0x46b   : > { %v1165_v45 = vpop.xlane.xlu0 %1164 }
 0x46c   : > { %2340 = vrcp.f32 %v1165_v45 }
 0x46e   : > { %v2337_v38 = vpop.eup %2336 }
 0x46f   : > { %v1012_v39 = vmul.f32 %v2337_v38, %v2329_v23  ;;  %v2339_v46 = vpop.eup %2338  ;;  %v2307_v23 = vld [vmem:[%s2930_s12 + $0x18] sm:$0xff]  }
 0x470   : > { %v952_v47 = vmul.f32 %v2339_v46, %v2331_v24  ;;  %v2308_v24 = vld [vmem:[%s2930_s12 + $0x20] sm:$0xff]  }
 0x471   : > { %v1013_v43 = vpack.c.bf16 %v1012_v39, %v1012_v39  ;;  %v2310_v39 = vld [vmem:[%s2930_s12 + $0x30] sm:$0xff]  }
 0x472   : > { %v953_v49 = vpack.c.bf16 %v952_v47, %v952_v47 }
 0x473   : > { %2132 = vmatmul.mubr.msk.bf16.vlgmr.msra.gmra.mrb[12].mxu1 %vm941_vm14, %v1013_v43  ;;  %v1274_v51 = vpop.xlane.xlu1 %1273  ;;  %v2012_v43 = vld [vmem:[%s2929_s11] ss:$0 sm:$0xff] }
 0x474   : > { %2136 = vmatpush3.bf16.msra.mxu1 %v1068_v44  ;;  %2137 = vmatprep.mubr.msk.bf16.mxu1 %vm2439_vm1, %v2438_v25  ;;  %2342 = vrcp.f32 %v1274_v51  ;;  %v2016_v51 = vld [vmem:[%s2931_s13] ss:$0 sm:$0xff] }
 0x475   : > { %2147 = vmatprep.subr.bf16.mxu1 %v2438_v25 }
 0x476   : > { %v2341_v52 = vpop.eup %2340 }
 0x477   : > { %v1167_v53 = vmul.f32 %v2341_v52, %v2333_v31  ;;  %v1414_v31 = vrot.slane %v2645_v40, %v1413_v30 }
 0x479   : > { %v1168_v55 = vpack.c.bf16 %v1167_v53, %v1167_v53 }
 0x47e   : > { %v2343_v57 = vpop.eup %2342 }
 0x47f   : > { %2138 = vmatmul.mubr.msk.bf16.vlgmr.msra.gmra.mrb[12].mxu1 %vm941_vm14, %v953_v49  ;;  %v1276_v58 = vmul.f32 %v2343_v57, %v2335_v33 }
 0x480   : > { %2148 = vmatpush3.bf16.msra.mxu1 %v1176_v50  ;;  %2149 = vmatprep.mubr.msk.bf16.mxu1 %vm2439_vm1, %v2438_v25 }
 0x481   : > { %2159 = vmatprep.subr.bf16.mxu1 %v2438_v25  ;;  %v1277_v59 = vpack.c.bf16 %v1276_v58, %v1276_v58 }
 0x48b   : > { %2150 = vmatmul.mubr.msk.bf16.vlgmr.msra.gmra.mrb[12].mxu1 %vm941_vm14, %v1168_v55 }
 0x48c   : > { %2160 = vmatpush3.bf16.msra.mxu1 %v1285_v56  ;;  %2161 = vmatprep.mubr.msk.bf16.mxu1 %vm2439_vm1, %v2438_v25 }
 0x48d   : > { %2181 = vmatprep.subr.bf16.mxu1 %v2438_v25 }
 0x497   : > { %2162 = vmatmul.mubr.msk.bf16.vlgmr.msra.gmra.mrb[12].mxu1 %vm941_vm14, %v1277_v59 }
 0x498   : > { %2197 = vmatprep.mubr.msk.bf16.mxu1 %vm2439_vm1, %v2438_v25  ;;  %2182 = vmatpush3.bf16.msra.mxu1 %v2304_v20  ;;  %v2312_v20 = vld [vmem:[%s2932_s14] sm:$0xff]  }
 0x499   : > { %2183 = vmatprep.subr.bf16.mxu1 %v2438_v25 }
 0x49c   : > { %2184 = vmatpush3.bf16.msra.mxu1 %v2305_v21 }
 0x49d   : > { %2185 = vmatprep.subr.bf16.mxu1 %v2438_v25 }
 0x4a0   : > { %2186 = vmatpush3.bf16.msra.mxu1 %v2306_v22 }
 0x4a1   : > { %2187 = vmatprep.subr.bf16.mxu1 %v2438_v25 }
 0x4a4   : > { %2188 = vmatpush3.bf16.msra.mxu1 %v2307_v23 }
 0x4a5   : > { %2189 = vmatprep.subr.bf16.mxu1 %v2438_v25 }
 0x4a8   : > { %2190 = vmatpush3.bf16.msra.mxu1 %v2308_v24  ;;  %v1645_v24 = vsub.s32 3, %v2639_v35 }
 0x4a9   : > { %2191 = vmatprep.subr.bf16.mxu1 %v2438_v25 }
 0x4ac   : > { %2192 = vmatpush3.bf16.msra.mxu1 %v2309_v26  ;;  %v1646_v26 = vrot.slane %v2645_v40, %v1645_v24 }
 0x4ad   : > { %2193 = vmatprep.subr.bf16.mxu1 %v2438_v25 }
 0x4b0   : > { %2194 = vmatpush3.bf16.msra.mxu1 %v2310_v39 }
 0x4b1   : > { %2195 = vmatprep.subr.bf16.mxu1 %v2438_v25 }
 0x4b4   : > { %2196 = vmatpush3.bf16.msra.mxu1 %v2311_v41 }
 0x56a   : > { %v1321_v62 = vpop.f32.mrb[12].mxu1 }
 0x56b   : > { %v1328_v63 = vpack.c.bf16 %v1321_v62, %v1321_v62  ;;  %v2163_v1 = vpop.f32.mrb[13].mxu1 }
 0x56c   : > { %v1324_v3 = vpop.f32.mrb[14].mxu1 }
 0x56d   : > { %1329 = vst.msk [vmem:[#allocation5] sm:$0xf] %vm835_vm12, %v1328_v63  ;;  %v2164_v4 = vpop.f32.mrb[15].mxu1 }
 0x574   : > { %v1330_v5 = vld [vmem:[#allocation5] sm:$0xf] }
 0x575   : > { %2170 = vmatmul.mubr.msk.bf16.vlgmr.msra.gmra.mrb[16].mxu0 %vm574_vm0, %v1330_v5  ;;  %v1617_v5 = vsub.s32 2, %v2639_v35  ;;  %v2315_v35 = vld [vmem:[%s2933_s15 + $0x8] sm:$0xff]  }
 0x576   : > { %2177 = vmatprep.mubr.msk.bf16.mxu0 %vm2439_vm1, %v2438_v25  ;;  %2174 = vmatpush3.bf16.msra.mxu0 %v2302_v19 }
 0x577   : > { %2175 = vmatprep.subr.bf16.mxu0 %v2438_v25 }
 0x648   : > { %v1391_v7 = vpop.f32.mrb[16].mxu0 }
 0x649   : > { %v1392_v8 = vadd.f32 %v2008_v6, %v1391_v7  ;;  %v2171_v9 = vpop.f32.mrb[17].mxu0  ;;  %v1618_v6 = vrot.slane %v2645_v40, %v1617_v5  ;;  %v2316_v40 = vld [vmem:[%s2933_s15 + $0x10] sm:$0xff]  }
 0x64a   : > { %v1394_v10 = vpop.f32.mrb[18].mxu0  ;;  %v1623_v9 = vrot.slane %v2650_v42, %v1617_v5 }
 0x64b   : > { %v2754_v11 = vadd.f32 %v1392_v8, %v2607_v2  ;;  %v2172_v12 = vpop.f32.mrb[19].mxu0  ;;  %v2303_v2 = vld [vmem:[%s2928_s10 + $0x8] sm:$0xff]  }
 0x64c   : > { %2176 = vmatpush3.bf16.msra.mxu0 %v2303_v2 }
 0x64d   : > { %v1398_v13 = vsel %vm574_vm0, %v2754_v11, 0.0  ;;  %2201 = vmatprep.subr.bf16.mxu0 %v2438_v25 }
 0x64e   : > { %1399 = vadd.xlane.f32.xlu0 %v1398_v13 }
 0x6db   : > { %v1400_v14 = vpop.xlane.xlu0 %1399 }
 0x6dc   : > { %v1401_v15 = vmul.f32 0.03125, %v1400_v14 }
 0x6de   : > { %v1402_v16 = vsub.f32 %v2754_v11, %v1401_v15 }
 0x6e0   : > { %v1403_v17 = vmul.f32 %v1402_v16, %v1402_v16 }
 0x6e2   : > { %v1404_v18 = vsel %vm574_vm0, %v1403_v17, 0.0 }
 0x6e3   : > { %1405 = vadd.xlane.f32.xlu1 %v1404_v18 }
 0x770   : > { %v1406_v27 = vpop.xlane.xlu1 %1405 }
 0x771   : > { %v1407_v28 = vmul.f32 0.03125, %v1406_v27 }
 0x773   : > { %v1408_v29 = vadd.f32 1e-05, %v1407_v28 }
 0x775   : > { %2344 = vrsqrt.f32 %v1408_v29  ;;  %v1651_v29 = vrot.slane %v2650_v42, %v1645_v24  ;;  %v2317_v42 = vld [vmem:[%s2933_s15 + $0x18] sm:$0xff]  }
 0x77f   : > { %v2345_v32 = vpop.eup %2344 }
 0x780   : > { %v1410_v33 = vmul.f32 %v2345_v32, %v1402_v16 }
 0x782   : > { %v1415_v36 = vmul.f32 %v1414_v31, %v1410_v33  ;;  %v2314_v33 = vld [vmem:[%s2933_s15] sm:$0xff]  }
 0x784   : > { %v1420_v37 = vadd.f32 %v1419_v34, %v1415_v36  ;;  %v2318_v34 = vld [vmem:[%s2933_s15 + $0x20] sm:$0xff]   ;;  %v2319_v36 = vld [vmem:[%s2933_s15 + $0x28] sm:$0xff]  }
 0x786   : > { %v1425_v38 = vpack.c.bf16 %v1420_v37, %v1420_v37  ;;  %v2320_v37 = vld [vmem:[%s2933_s15 + $0x30] sm:$0xff]  }
 0x788   : > { %2178 = vmatmul.mubr.msk.bf16.vlgmr.msra.gmra.mrb[20].mxu0 %vm574_vm0, %v1425_v38  ;;  %v2321_v38 = vld [vmem:[%s2933_s15 + $0x38] sm:$0xff]  }
 0x789   : > { %2205 = vmatprep.mubr.msk.bf16.mxu0 %vm2439_vm1, %v2438_v25  ;;  %2202 = vmatpush3.bf16.msra.mxu0 %v2312_v20 }
 0x78a   : > { %2203 = vmatprep.subr.bf16.mxu0 %v2438_v25 }
 0x85b   : > { %v1482_v44 = vpop.f32.mrb[20].mxu0 }
 0x85c   : > { %v1483_v45 = vadd.f32 %v2012_v43, %v1482_v44  ;;  %v2179_v46 = vpop.f32.mrb[21].mxu0 }
 0x85d   : > { %v1485_v47 = vpop.f32.mrb[22].mxu0 }
 0x85e   : > { %v1488_v48 = vmax.f32 %v1483_v45, 0.0  ;;  %v2180_v49 = vpop.f32.mrb[23].mxu0 }
 0x860   : > { %v1505_v50 = vpack.c.bf16 %v1488_v48, %v1488_v48 }
 0x862   : > { %2198 = vmatmul.mubr.bf16.vlgmr.msra.gmra.mrb[16].mxu1 %v1505_v50 }
 0x935   : > { %v1595_v52 = vpop.f32.mrb[16].mxu1 }
 0x936   : > { %v1596_v53 = vadd.f32 %v2016_v51, %v1595_v52  ;;  %v2199_v54 = vpop.f32.mrb[17].mxu1 }
 0x937   : > { %v1598_v55 = vpop.f32.mrb[18].mxu1 }
 0x938   : > { %v2200_v56 = vpop.f32.mrb[19].mxu1  ;;  %v1601_v57 = vadd.f32 %v1596_v53, %v2754_v11  ;;  %v1627_v11 = vstv %s1625_s30  ;;  %s2038_s30 = sshll.u32 %s2548_s25, 7  ;;  %s1850_s25 = scalar_lea.sflag [#allocation7], %s550_s23 }
 0x939   : > { %s2875_s26 = scalar_lea.hbm %s2934_s16, %s2038_s30 }
 0x93a   : > { %v1602_v58 = vsel %vm574_vm0, %v1601_v57, 0.0 }
 0x93b   : > { %1603 = vadd.xlane.f32.xlu0 %v1602_v58 }
 0x9c8   : > { %v1604_v59 = vpop.xlane.xlu0 %1603 }
 0x9c9   : > { %v1605_v60 = vmul.f32 0.03125, %v1604_v59 }
 0x9cb   : > { %v1606_v61 = vsub.f32 %v1601_v57, %v1605_v60 }
 0x9cd   : > { %v1607_v62 = vmul.f32 %v1606_v61, %v1606_v61 }
 0x9cf   : > { %v1608_v63 = vsel %vm574_vm0, %v1607_v62, 0.0 }
 0x9d0   : > { %1609 = vadd.xlane.f32.xlu1 %v1608_v63 }
 0xa5d   : > { %v1610_v1 = vpop.xlane.xlu1 %1609 }
 0xa5e   : > { %v1611_v3 = vmul.f32 0.03125, %v1610_v1  ;;  %v2440_v1 = vmov -1.0  }
 0xa60   : > { %v1612_v4 = vadd.f32 1e-05, %v1611_v3 }
 0xa62   : > { %2346 = vrsqrt.f32 %v1612_v4 }
 0xa6c   : > { %v2347_v7 = vpop.eup %2346 }
 0xa6d   : > { %v1614_v8 = vmul.f32 %v2347_v7, %v1606_v61 }
 0xa6f   : > { %v1619_v10 = vmul.f32 %v1618_v6, %v1614_v8 }
 0xa71   : > { %v1624_v12 = vadd.f32 %v1623_v9, %v1619_v10  ;;  %v1845_v9 = vstv %s2025_s21  ;;  %s2375_s21 = scalar_lea.vmem %s2374_s3, 256 }
 0xa72   : > { %p2377_p0 = scmp.lt.s32.totalorder %s2375_s21, %s2369_s29 }
 0xa73   : > { %v1628_v13 = vmul.f32 %v1627_v11, %v1624_v12 }
 0xa74   : > { %p2378_p1 = por %p2377_p0, %p2376_p13 }
 0xa75   : > { %v2818_v14 = vadd.f32 %v1628_v13, %v2601_v0  ;;  %v2313_v0 = vld [vmem:[%s2932_s14 + $0x8] sm:$0xff]  }
 0xa76   : > { %2204 = vmatpush3.bf16.msra.mxu0 %v2313_v0  ;;  %p2379_p2 = pnand %p2378_p1, %p2372_p12 }
 0xa77   : > { %v1630_v15 = vsel %vm574_vm0, %v2818_v14, 0.0  ;;  %2209 = vmatprep.subr.bf16.mxu0 %v2438_v25 }
 0xa78   : > { %1631 = vadd.xlane.f32.xlu0 %v1630_v15 }
 0xb05   : > { %v1632_v16 = vpop.xlane.xlu0 %1631 }
 0xb06   : > { %v1633_v17 = vmul.f32 0.03125, %v1632_v16 }
 0xb08   : > { %v1634_v18 = vsub.f32 %v2818_v14, %v1633_v17 }
 0xb0a   : > { %v1635_v19 = vmul.f32 %v1634_v18, %v1634_v18 }
 0xb0c   : > { %v1636_v2 = vsel %vm574_vm0, %v1635_v19, 0.0 }
 0xb0d   : > { %1637 = vadd.xlane.f32.xlu1 %v1636_v2 }
 0xb9a   : > { %v1638_v21 = vpop.xlane.xlu1 %1637 }
 0xb9b   : > { %v1639_v22 = vmul.f32 0.03125, %v1638_v21 }
 0xb9d   : > { %v1640_v23 = vadd.f32 1e-05, %v1639_v22 }
 0xb9f   : > { %2348 = vrsqrt.f32 %v1640_v23 }
 0xba9   : > { %v2349_v27 = vpop.eup %2348 }
 0xbaa   : > { %v1642_v28 = vmul.f32 %v2349_v27, %v1634_v18 }
 0xbac   : > { %v1647_v30 = vmul.f32 %v1646_v26, %v1642_v28 }
 0xbae   : > { %v1652_v31 = vadd.f32 %v1651_v29, %v1647_v30 }
 0xbb0   : > { %v1657_v32 = vpack.c.bf16 %v1652_v31, %v1652_v31 }
 0xbb2   : > { %2206 = vmatmul.mubr.msk.bf16.vlgmr.msra.gmra.mrb[24].mxu0 %vm574_vm0, %v1657_v32 }
 0xbb3   : > { %2225 = vmatprep.mubr.msk.bf16.mxu0 %vm2439_vm1, %v2438_v25  ;;  %2210 = vmatpush3.bf16.msra.mxu0 %v2314_v33 }
 0xbb4   : > { %2211 = vmatprep.subr.bf16.mxu0 %v2438_v25 }
 0xbb7   : > { %2212 = vmatpush3.bf16.msra.mxu0 %v2315_v35 }
 0xbb8   : > { %2213 = vmatprep.subr.bf16.mxu0 %v2438_v25 }
 0xbbb   : > { %2214 = vmatpush3.bf16.msra.mxu0 %v2316_v40 }
 0xbbc   : > { %2215 = vmatprep.subr.bf16.mxu0 %v2438_v25 }
 0xbbf   : > { %2216 = vmatpush3.bf16.msra.mxu0 %v2317_v42 }
 0xbc0   : > { %2217 = vmatprep.subr.bf16.mxu0 %v2438_v25 }
 0xbc3   : > { %2218 = vmatpush3.bf16.msra.mxu0 %v2318_v34 }
 0xbc4   : > { %2219 = vmatprep.subr.bf16.mxu0 %v2438_v25 }
 0xbc7   : > { %2220 = vmatpush3.bf16.msra.mxu0 %v2319_v36 }
 0xbc8   : > { %2221 = vmatprep.subr.bf16.mxu0 %v2438_v25 }
 0xbcb   : > { %2222 = vmatpush3.bf16.msra.mxu0 %v2320_v37 }
 0xbcc   : > { %2223 = vmatprep.subr.bf16.mxu0 %v2438_v25 }
 0xbcf   : > { %2224 = vmatpush3.bf16.msra.mxu0 %v2321_v38 }
 0xc85   : > { %v1707_v39 = vpop.f32.mrb[24].mxu0 }
 0xc86   : > { %v1714_v41 = vmul.f32 0.70710677, %v1707_v39  ;;  %v2207_v43 = vpop.f32.mrb[25].mxu0  ;;  %v1713_v5 = vmul.f32 0.5, %v1707_v39 }
 0xc87   : > { %v1710_v44 = vpop.f32.mrb[26].mxu0 }
 0xc88   : > { %v1717_v45 = vand.u32 2147483647, %v1714_v41  ;;  %v2208_v46 = vpop.f32.mrb[27].mxu0  ;;  %vm1715_vm15 = vcmp.ge.f32.partialorder %v1714_v41, 0.0 }
 0xc89   : > { %v1716_v3 = vsel %vm1715_vm15, 1.0, %v2440_v1 }
 0xc8a   : > { %v1718_v47 = vmul.f32 0.3275911, %v1717_v45  ;;  %v1731_v49 = vsub.f32 0.0, %v1717_v45 }
 0xc8c   : > { %v1719_v48 = vadd.f32 1.0, %v1718_v47  ;;  %v1732_v51 = vmul.f32 %v1731_v49, %v1717_v45 }
 0xc8e   : > { %2350 = vrcp.f32 %v1719_v48  ;;  %v1733_v25 = vmul.f32 1.442695, %v1732_v51 }
 0xc90   : > { %2352 = vpow2.f32 %v1733_v25 }
 0xc98   : > { %v2351_v50 = vpop.eup %2350 }
 0xc99   : > { %v1722_v52 = vmul.f32 1.0614054, %v2351_v50 }
 0xc9a   : > { %v2353_v61 = vpop.eup %2352 }
 0xc9b   : > { %v1723_v53 = vadd.f32 -1.4531521, %v1722_v52 }
 0xc9d   : > { %v1724_v54 = vmul.f32 %v2351_v50, %v1723_v53 }
 0xc9f   : > { %v1725_v55 = vadd.f32 1.4214138, %v1724_v54 }
 0xca1   : > { %v1726_v56 = vmul.f32 %v2351_v50, %v1725_v55 }
 0xca3   : > { %v1727_v57 = vadd.f32 -0.28449672, %v1726_v56 }
 0xca5   : > { %v1728_v58 = vmul.f32 %v2351_v50, %v1727_v57 }
 0xca7   : > { %v1729_v59 = vadd.f32 0.2548296, %v1728_v58 }
 0xca9   : > { %v1730_v60 = vmul.f32 %v2351_v50, %v1729_v59 }
 0xcab   : > { %v1735_v62 = vmul.f32 %v2353_v61, %v1730_v60 }
 0xcad   : > { %v1736_v63 = vsub.f32 1.0, %v1735_v62 }
 0xcaf   : > { %v1737_v4 = vmul.f32 %v1736_v63, %v1716_v3 }
 0xcb1   : > { %v1738_v6 = vadd.f32 1.0, %v1737_v4 }
 0xcb3   : > { %v1739_v7 = vmul.f32 %v1738_v6, %v1713_v5 }
 0xcb5   : > { %v1756_v8 = vpack.c.bf16 %v1739_v7, %v1739_v7 }
 0xcb7   : > { %2226 = vmatmul.mubr.bf16.vlgmr.msra.gmra.mrb[28].mxu0 %v1756_v8 }
 0xd8a   : > { %v1839_v10 = vpop.f32.mrb[28].mxu0 }
 0xd8b   : > { %v1846_v11 = vmul.f32 %v1845_v9, %v1839_v10  ;;  %v2227_v12 = vpop.f32.mrb[29].mxu0 }
 0xd8c   : > { %v1842_v13 = vpop.f32.mrb[30].mxu0 }
 0xd8d   : > { %v1847_v15 = vadd.f32 %v1846_v11, %v2818_v14  ;;  %v2228_v16 = vpop.f32.mrb[31].mxu0 }
 0xd8f   : > { %1848 = vst.msk [vmem:[%s552_s17] sm:$0xff] %vm574_vm0, %v1847_v15 }
 0xd90   : > { %2382 = shalt.err (!%p2379_p2)
}
 0xd91   : > { %s2383_s23 = scalar_lea.hbm %s2875_s26, 128  ;;  %s2387_s17 = scalar_lea.hbm %s2934_s16, 256 }
 0xd92   : > { %p2384_p3 = scmp.ne.s32.totalorder %s2875_s26, %s2383_s23  ;;  %p2388_p8 = scmp.lt.u32.totalorder %s2875_s26, %s2934_s16 }
 0xd93   : > { %p2389_p11 = scmp.lt.u32.totalorder %s2387_s17, %s2383_s23  ;;  %p2391_p10 = scmp.lt.u32.totalorder %s2383_s23, %s2875_s26 }
 0xd94   : > { %p2385_p4 = pnand %p2384_p3, %p2565_p5 }
 0xd95   : > { %p2390_p9 = por %p2389_p11, %p2388_p8 }
 0xd96   : > { %p2386_p7 = pneg %p2385_p4 }
 0xd97   : > { %p2392_p12 = por %p2391_p10, %p2390_p9 }
 0xd99   : > { %p2393_p13 = pnand %p2392_p12, %p2386_p7 }
 0xd9b   : > { %2396 = shalt.err (!%p2393_p13)
}
 0xd9c   : > { %2245 = dma.vmem_to_hbm [thread:$0]  (%p2565_p5), %s2877_s19, 128, %s2875_s26, %s1850_s25  }
 0xd9d PF: > { %s2952_s29 = sld [smem:[#allocation12_spill]]  ;;  %p2257_p0 = scmp.ge.s32.totalorder %s2435_s24, 2 }
 0xd9f   : > { %p2252_p1 = pnand %p2257_p0, %p2569_p6 }
 0xda3   : > { %s1875_s3 = sand.u32 1, %s2952_s29  }
 0xda4   : > { %s1876_s21 = scalar_lea.sflag [#allocation7], %s1875_s3 }
 0xda5   : > { %2418 = dma.done.wait (!%p2252_p1), %s1876_s21, 128  }
 0xda6   : > { %2420 = vsyncadd (!%p2252_p1), %s1876_s21, 4294967168  ;;  %s2954_s24 = sld [smem:[#allocation14_spill]]  ;;  %s2955_s23 = sld [smem:[#allocation13_spill]] }
 0xda7   : > { %s2956_s27 = sld [smem:[#allocation15_spill]]  ;;  %s2957_s21 = smov %s2427_s22 }
 0xdac   : > { %p27_p2 = scmp.ge.s32.totalorder %s2954_s24, 4   ;;  %s2958_s22 = smov %s2955_s23 }
 0xdad   : > { %s2959_s23 = smov %s2956_s27 }
 0xdae   :  { %29 = sbr.rel (!%p27_p2) target bundleno = 7 (0x7), region = 146 }
 0xdb5   :  { %1881 = vsyncpa [#allocation7], 1 }
 0xdb6   :  { %1883 = vsyncpa [#allocation7 + $0x1], 1 }
 0xdb7   :  { %1884 = vsyncpa [#allocation8], 1 }
 0xdb8   :  { %1886 = vsyncpa [#allocation8 + $0x1], 1 }

</bundles_post_ra>
